<compile_context>
chip_gen: v7x
topology: tpu7x:2x2x1
jax: 0.10.0
libtpu: 0.0.40
codegen_flags: <defaults>
</compile_context>

<pallas_src>
from functools import partial

import numpy as np

import jax
import jax.numpy as jnp
from jax.experimental import pallas as pl
from jax.experimental.pallas import tpu as pltpu


# ---------------------------------------------------------------------------
# Fused LeNet kernel: TILE_B images per grid step
# ---------------------------------------------------------------------------

def _lenet_kernel(x_ref, w1b_ref, b1_ref, w2b_ref, b2_ref,
                  wf1_ref, bf1_ref, wf2_ref, bf2_ref, wf3_ref, bf3_ref,
                  o_ref):
    f32, bf16 = jnp.float32, jnp.bfloat16

    def mm(a, b):  # MXU matmul: bf16 operands, f32 accumulate
        return jnp.dot(a, b, preferred_element_type=f32)

    # ---- conv1 (1->6, 5x5) + ReLU + 2x2 max-pool ---------------------------
    # x_ref[b, m*28 + c] = img[b, m, c]  (flat row-major image in lanes).
    # For pooled output row p, conv rows 2p/2p+1 need image rows [2p, 2p+6)
    # = lane window [56p, 56p+168).  W1b folds kh into K and the four pool
    # phases (row phase rho, col phase q) into N:
    #   W1b[u*28+c, rho*144 + q*72 + j*6 + oc] = w1[oc,0,u-rho,c-2j-q]
    w1b = w1b_ref[...]                          # (168, 288) bf16
    b1 = b1_ref[...]                            # (1, 72) f32, tiled per column j
    rows = []                                   # 12 pooled rows, each (TB, 72)
    for p in range(12):
        lhs = x_ref[:, pl.ds(56 * p, 168)]      # (TB, 168) bf16
        r = mm(lhs, w1b)                        # (TB, 288) f32
        m = jnp.maximum(jnp.maximum(r[:, 0:72], r[:, 72:144]),
                        jnp.maximum(r[:, 144:216], r[:, 216:288]))
        rows.append(jnp.maximum(m + b1, 0.0).astype(bf16))
    # pooled1[b, s, j, ic] lives at lane s*72 + j*6 + ic of this flat value:
    p1 = jnp.concatenate(rows, axis=1)          # (TB, 864) bf16

    # ---- conv2 (6->16, 5x5) + ReLU + 2x2 max-pool --------------------------
    # For pooled output row h, conv rows 2h/2h+1 need pooled1 rows [2h, 2h+6)
    # = lane window [144h, 144h+432).  W2b folds kh and both pool phases:
    #   W2b[u*72+j*6+ic, rho*128 + q*64 + w*16 + oc] = w2[oc,ic,u-rho,j-2w-q]
    w2b = w2b_ref[...]                          # (432, 256) bf16
    b2 = b2_ref[...]                            # (1, 64) f32, tiled per column w
    feats = []                                  # 4 pooled rows, each (TB, 64)
    for h in range(4):
        lhs = p1[:, 144 * h:144 * h + 432]      # (TB, 432) bf16
        r = mm(lhs, w2b)                        # (TB, 256) f32
        m = jnp.maximum(jnp.maximum(r[:, 0:64], r[:, 64:128]),
                        jnp.maximum(r[:, 128:192], r[:, 192:256]))
        feats.append(jnp.maximum(m + b2, 0.0).astype(bf16))
    # feat[b, h*64 + w*16 + oc] = pooled2[b, h, w, oc]
    feat = jnp.concatenate(feats, axis=1)       # (TB, 256) bf16

    # ---- fc1 (256->120) + ReLU : one (TB,256)@(256,128) dot ----------------
    y = jnp.maximum(mm(feat, wf1_ref[...]) + bf1_ref[...], 0.0).astype(bf16)
    # ---- fc2 (120->84) + ReLU ----------------------------------------------
    y = jnp.maximum(mm(y, wf2_ref[...]) + bf2_ref[...], 0.0).astype(bf16)
    # ---- fc3 (84->10), zero-padded to 128 lanes (single lane-dense store) --
    o_ref[...] = (mm(y, wf3_ref[...]) + bf3_ref[...]).astype(o_ref.dtype)


# ---------------------------------------------------------------------------
# Parameters: PyTorch layout at init, converted once to the kernel layout
# ---------------------------------------------------------------------------

def init_lenet_params(key):
    """Synthetic LeNet parameters in the PyTorch (Conv2d / Linear) layout."""
    ks = jax.random.split(key, 10)
    s = 0.05
    return {
        "conv1_w": s * jax.random.normal(ks[0], (6, 1, 5, 5), jnp.float32),
        "conv1_b": s * jax.random.normal(ks[1], (6,), jnp.float32),
        "conv2_w": s * jax.random.normal(ks[2], (16, 6, 5, 5), jnp.float32),
        "conv2_b": s * jax.random.normal(ks[3], (16,), jnp.float32),
        "fc1_w": s * jax.random.normal(ks[4], (120, 16 * 4 * 4), jnp.float32),
        "fc1_b": s * jax.random.normal(ks[5], (120,), jnp.float32),
        "fc2_w": s * jax.random.normal(ks[6], (84, 120), jnp.float32),
        "fc2_b": s * jax.random.normal(ks[7], (84,), jnp.float32),
        "fc3_w": s * jax.random.normal(ks[8], (10, 84), jnp.float32),
        "fc3_b": s * jax.random.normal(ks[9], (10,), jnp.float32),
    }


def prepare_kernel_params(params):
    """One-time transform: banded conv matrices (kh and pool phases folded into
    K / N), tiled bias rows, permuted / transposed / 128-padded FC weights.
    Matmul operands are bf16; biases stay f32."""
    p = {k: np.asarray(jax.device_get(v), np.float32) for k, v in params.items()}

    # conv1 banded matrix (168, 288):
    #   W1b[u*28 + c, rho*144 + q*72 + j*6 + oc] = w1[oc, 0, u-rho, c-2j-q]
    w1 = p["conv1_w"]
    W1b = np.zeros((6 * 28, 2 * 144), np.float32)
    for rho in range(2):
        for q in range(2):
            for j in range(12):
                base = rho * 144 + q * 72 + j * 6
                for kh in range(5):
                    for kw in range(5):
                        u = rho + kh
                        c = 2 * j + q + kw
                        W1b[u * 28 + c, base:base + 6] = w1[:, 0, kh, kw]
    b1row = np.tile(p["conv1_b"], 12)[None, :]                     # (1, 72)

    # conv2 banded matrix (432, 256):
    #   W2b[u*72 + j*6 + ic, rho*128 + q*64 + w*16 + oc] = w2[oc, ic, u-rho, j-2w-q]
    w2 = p["conv2_w"]
    W2b = np.zeros((6 * 72, 256), np.float32)
    for rho in range(2):
        for q in range(2):
            for w in range(4):
                base = rho * 128 + q * 64 + w * 16
                for kh in range(5):
                    for kw in range(5):
                        u = rho + kh
                        j = 2 * w + q + kw
                        for ic in range(6):
                            W2b[u * 72 + j * 6 + ic, base:base + 16] = w2[:, ic, kh, kw]
    b2row = np.tile(p["conv2_b"], 4)[None, :]                      # (1, 64)

    # fc1: input lane order h*64 + w*16 + oc, PyTorch flatten k = oc*16 + h*4 + w,
    # transposed and zero-padded 120 -> 128 output lanes.
    fc1_w = p["fc1_w"]
    Wf1 = np.zeros((256, 128), np.float32)
    for h in range(4):
        for w in range(4):
            for oc in range(16):
                Wf1[h * 64 + w * 16 + oc, :120] = fc1_w[:, oc * 16 + h * 4 + w]
    bf1 = np.zeros((1, 128), np.float32)
    bf1[0, :120] = p["fc1_b"]

    Wf2 = np.zeros((128, 128), np.float32)                         # fc2, padded
    Wf2[:120, :84] = p["fc2_w"].T
    bf2 = np.zeros((1, 128), np.float32)
    bf2[0, :84] = p["fc2_b"]

    Wf3 = np.zeros((128, 128), np.float32)                         # fc3, padded
    Wf3[:84, :10] = p["fc3_w"].T
    bf3 = np.zeros((1, 128), np.float32)
    bf3[0, :10] = p["fc3_b"]

    bf16 = jnp.bfloat16
    return {
        "W1b": jnp.asarray(W1b, bf16), "b1": jnp.asarray(b1row),
        "W2b": jnp.asarray(W2b, bf16), "b2": jnp.asarray(b2row),
        "Wf1": jnp.asarray(Wf1, bf16), "bf1": jnp.asarray(bf1),
        "Wf2": jnp.asarray(Wf2, bf16), "bf2": jnp.asarray(bf2),
        "Wf3": jnp.asarray(Wf3, bf16), "bf3": jnp.asarray(bf3),
    }


# ---------------------------------------------------------------------------
# Forward pass (one pallas_call for the whole network, TILE_B images per step)
# ---------------------------------------------------------------------------

@partial(jax.jit, static_argnames=("tile_b",))
def lenet_forward(kparams, x, tile_b=32):
    """x: (B, 1, 28, 28) float32 NCHW -> logits (B, 10) float32."""
    B = x.shape[0]
    # Free reshape + bf16 cast (halves input HBM bytes); pad batch to TILE_B.
    xb = x.reshape(B, 28 * 28).astype(jnp.bfloat16)
    b_pad = ((B + tile_b - 1) // tile_b) * tile_b
    if b_pad != B:
        xb = jnp.pad(xb, ((0, b_pad - B), (0, 0)))
    grid_len = b_pad // tile_b

    const2 = lambda g: (0, 0)
    flops_per_img = 2 * (12 * 168 * 288 + 4 * 432 * 256
                         + 256 * 128 + 128 * 128 + 128 * 128)
    weight_bytes = 2 * (168 * 288 + 432 * 256 + 256 * 128 + 2 * 128 * 128)
    cost = pl.CostEstimate(
        flops=flops_per_img * b_pad,
        transcendentals=0,
        bytes_accessed=b_pad * (784 * 2 + 128 * 4) + weight_bytes,
    )

    out = pl.pallas_call(
        _lenet_kernel,
        out_shape=jax.ShapeDtypeStruct((b_pad, 128), jnp.float32),
        grid=(grid_len,),
        in_specs=[
            pl.BlockSpec((tile_b, 784), lambda g: (g, 0)),   # flat bf16 images
            pl.BlockSpec((168, 288), const2),                # conv1 banded weights
            pl.BlockSpec((1, 72), const2),                   # conv1 bias row
            pl.BlockSpec((432, 256), const2),                # conv2 banded weights
            pl.BlockSpec((1, 64), const2),                   # conv2 bias row
            pl.BlockSpec((256, 128), const2),                # fc1 (permuted, padded)
            pl.BlockSpec((1, 128), const2),                  # fc1 bias (padded)
            pl.BlockSpec((128, 128), const2),                # fc2 (padded)
            pl.BlockSpec((1, 128), const2),                  # fc2 bias (padded)
            pl.BlockSpec((128, 128), const2),                # fc3 (padded)
            pl.BlockSpec((1, 128), const2),                  # fc3 bias (padded)
        ],
        out_specs=pl.BlockSpec((tile_b, 128), lambda g: (g, 0)),  # lane-dense logits
        compiler_params=pltpu.CompilerParams(
            dimension_semantics=("parallel",),   # batch blocks split across TCs
        ),
        cost_estimate=cost,
    )(xb, kparams["W1b"], kparams["b1"], kparams["W2b"], kparams["b2"],
      kparams["Wf1"], kparams["bf1"], kparams["Wf2"], kparams["bf2"],
      kparams["Wf3"], kparams["bf3"])
    return out[:B, :10]


# ---------------------------------------------------------------------------
# Pure-JAX f32 reference of the PyTorch module (test harness only)
# ---------------------------------------------------------------------------

def _conv2d_nchw_ref(x, w, b):
    B, IC, H, W = x.shape
    OC, _, KH, KW = w.shape
    OH, OW = H - KH + 1, W - KW + 1
    cols = [x[:, ic, kh:kh + OH, kw:kw + OW]
            for ic in range(IC) for kh in range(KH) for kw in range(KW)]
    patches = jnp.stack(cols, axis=-1)                       # (B, OH, OW, IC*KH*KW)
    y = patches @ w.reshape(OC, -1).T + b
    return y.transpose(0, 3, 1, 2)


def _maxpool2x2_ref(x):
    return jnp.maximum(jnp.maximum(x[:, :, 0::2, 0::2], x[:, :, 0::2, 1::2]),
                       jnp.maximum(x[:, :, 1::2, 0::2], x[:, :, 1::2, 1::2]))


@jax.jit
def lenet_reference(params, x):
    x = _maxpool2x2_ref(jax.nn.relu(_conv2d_nchw_ref(x, params["conv1_w"], params["conv1_b"])))
    x = _maxpool2x2_ref(jax.nn.relu(_conv2d_nchw_ref(x, params["conv2_w"], params["conv2_b"])))
    x = x.reshape(x.shape[0], -1)
    x = jax.nn.relu(x @ params["fc1_w"].T + params["fc1_b"])
    x = jax.nn.relu(x @ params["fc2_w"].T + params["fc2_b"])
    return x @ params["fc3_w"].T + params["fc3_b"]


if __name__ == "__main__":
    key = jax.random.PRNGKey(0)
    k_params, k_x = jax.random.split(key)
    torch_params = init_lenet_params(k_params)
    kparams = prepare_kernel_params(torch_params)

    B = 12                                    # exercises batch padding (12 -> 16)
    x = jax.random.normal(k_x, (B, 1, 28, 28), jnp.float32)

    out = jax.block_until_ready(lenet_forward(kparams, x, tile_b=8))
    assert out.shape == (B, 10), out.shape

    ref = jax.block_until_ready(lenet_reference(torch_params, x))
    err = float(jnp.max(jnp.abs(out - ref)))
    # bf16 MXU operands / bf16 activations (f32 accumulate + f32 elementwise)
    # -> small deviation from the f32 reference.
    assert err < 5e-2, f"max abs err vs reference: {err}"

    print("KERNEL_OK")
</pallas_src>

<mosaic_0001>
module attributes {stable_mosaic.version = 11 : i64} {
  func.func @_lenet_kernel(%arg0: i32, %arg1: memref<8x784xbf16, #tpu.memory_space<vmem>>, %arg2: memref<168x288xbf16, #tpu.memory_space<vmem>>, %arg3: memref<1x72xf32, #tpu.memory_space<vmem>>, %arg4: memref<432x256xbf16, #tpu.memory_space<vmem>>, %arg5: memref<1x64xf32, #tpu.memory_space<vmem>>, %arg6: memref<256x128xbf16, #tpu.memory_space<vmem>>, %arg7: memref<1x128xf32, #tpu.memory_space<vmem>>, %arg8: memref<128x128xbf16, #tpu.memory_space<vmem>>, %arg9: memref<1x128xf32, #tpu.memory_space<vmem>>, %arg10: memref<128x128xbf16, #tpu.memory_space<vmem>>, %arg11: memref<1x128xf32, #tpu.memory_space<vmem>>, %arg12: memref<8x128xf32, #tpu.memory_space<vmem>>) attributes {dimension_semantics = [#tpu.dimension_semantics<parallel>], iteration_bounds = array<i64: 2>, scalar_prefetch = 0 : i64, scratch_operands = 0 : i64, tpu.core_type = #tpu.core_type<tc>, window_params = [{transform_indices = @transform_0, window_bounds = array<i64: 8, 784>}, {pipeline_mode = #tpu.pipeline_mode<synchronous>, transform_indices = @transform_1, window_bounds = array<i64: 168, 288>}, {pipeline_mode = #tpu.pipeline_mode<synchronous>, transform_indices = @transform_2, window_bounds = array<i64: 1, 72>}, {pipeline_mode = #tpu.pipeline_mode<synchronous>, transform_indices = @transform_3, window_bounds = array<i64: 432, 256>}, {pipeline_mode = #tpu.pipeline_mode<synchronous>, transform_indices = @transform_4, window_bounds = array<i64: 1, 64>}, {pipeline_mode = #tpu.pipeline_mode<synchronous>, transform_indices = @transform_5, window_bounds = array<i64: 256, 128>}, {pipeline_mode = #tpu.pipeline_mode<synchronous>, transform_indices = @transform_6, window_bounds = array<i64: 1, 128>}, {pipeline_mode = #tpu.pipeline_mode<synchronous>, transform_indices = @transform_7, window_bounds = array<i64: 128, 128>}, {pipeline_mode = #tpu.pipeline_mode<synchronous>, transform_indices = @transform_8, window_bounds = array<i64: 1, 128>}, {pipeline_mode = #tpu.pipeline_mode<synchronous>, transform_indices = @transform_9, window_bounds = array<i64: 128, 128>}, {pipeline_mode = #tpu.pipeline_mode<synchronous>, transform_indices = @transform_10, window_bounds = array<i64: 1, 128>}, {transform_indices = @transform_11, window_bounds = array<i64: 8, 128>}]} {
    %c0 = arith.constant 0 : index
    %c0_0 = arith.constant 0 : index
    %0 = vector.load %arg2[%c0, %c0_0] : memref<168x288xbf16, #tpu.memory_space<vmem>>, vector<168x288xbf16>
    %c0_1 = arith.constant 0 : index
    %c0_2 = arith.constant 0 : index
    %1 = vector.load %arg3[%c0_1, %c0_2] : memref<1x72xf32, #tpu.memory_space<vmem>>, vector<1x72xf32>
    %c0_3 = arith.constant 0 : index
    %c0_4 = arith.constant 0 : index
    %2 = vector.load %arg1[%c0_3, %c0_4] : memref<8x784xbf16, #tpu.memory_space<vmem>>, vector<8x168xbf16>
    %cst = arith.constant dense<0.000000e+00> : vector<8x288xf32>
    %3 = tpu.matmul %2, %0, %cst {dimension_numbers = #tpu.dot_dimension_numbers<[1], [0], [0], [1], [0, 0, 1, 1], [], []>} : vector<8x168xbf16>, vector<168x288xbf16>, vector<8x288xf32> -> vector<8x288xf32>
    %4 = vector.extract_strided_slice %3 {offsets = [0, 0], sizes = [8, 72], strides = [1, 1]} : vector<8x288xf32> to vector<8x72xf32>
    %5 = vector.extract_strided_slice %3 {offsets = [0, 72], sizes = [8, 72], strides = [1, 1]} : vector<8x288xf32> to vector<8x72xf32>
    %6 = arith.maximumf %4, %5 : vector<8x72xf32>
    %7 = vector.extract_strided_slice %3 {offsets = [0, 144], sizes = [8, 72], strides = [1, 1]} : vector<8x288xf32> to vector<8x72xf32>
    %8 = vector.extract_strided_slice %3 {offsets = [0, 216], sizes = [8, 72], strides = [1, 1]} : vector<8x288xf32> to vector<8x72xf32>
    %9 = arith.maximumf %7, %8 : vector<8x72xf32>
    %10 = arith.maximumf %6, %9 : vector<8x72xf32>
    %11 = vector.broadcast %1 : vector<1x72xf32> to vector<8x72xf32>
    %12 = arith.addf %10, %11 : vector<8x72xf32>
    %cst_5 = arith.constant 0.000000e+00 : f32
    %13 = vector.broadcast %cst_5 : f32 to vector<8x72xf32>
    %14 = arith.maximumf %12, %13 : vector<8x72xf32>
    %15 = arith.truncf %14 : vector<8x72xf32> to vector<8x72xbf16>
    %c0_6 = arith.constant 0 : index
    %c56 = arith.constant 56 : index
    %16 = vector.load %arg1[%c0_6, %c56] : memref<8x784xbf16, #tpu.memory_space<vmem>>, vector<8x168xbf16>
    %cst_7 = arith.constant dense<0.000000e+00> : vector<8x288xf32>
    %17 = tpu.matmul %16, %0, %cst_7 {dimension_numbers = #tpu.dot_dimension_numbers<[1], [0], [0], [1], [0, 0, 1, 1], [], []>} : vector<8x168xbf16>, vector<168x288xbf16>, vector<8x288xf32> -> vector<8x288xf32>
    %18 = vector.extract_strided_slice %17 {offsets = [0, 0], sizes = [8, 72], strides = [1, 1]} : vector<8x288xf32> to vector<8x72xf32>
    %19 = vector.extract_strided_slice %17 {offsets = [0, 72], sizes = [8, 72], strides = [1, 1]} : vector<8x288xf32> to vector<8x72xf32>
    %20 = arith.maximumf %18, %19 : vector<8x72xf32>
    %21 = vector.extract_strided_slice %17 {offsets = [0, 144], sizes = [8, 72], strides = [1, 1]} : vector<8x288xf32> to vector<8x72xf32>
    %22 = vector.extract_strided_slice %17 {offsets = [0, 216], sizes = [8, 72], strides = [1, 1]} : vector<8x288xf32> to vector<8x72xf32>
    %23 = arith.maximumf %21, %22 : vector<8x72xf32>
    %24 = arith.maximumf %20, %23 : vector<8x72xf32>
    %25 = vector.broadcast %1 : vector<1x72xf32> to vector<8x72xf32>
    %26 = arith.addf %24, %25 : vector<8x72xf32>
    %cst_8 = arith.constant 0.000000e+00 : f32
    %27 = vector.broadcast %cst_8 : f32 to vector<8x72xf32>
    %28 = arith.maximumf %26, %27 : vector<8x72xf32>
    %29 = arith.truncf %28 : vector<8x72xf32> to vector<8x72xbf16>
    %c0_9 = arith.constant 0 : index
    %c112 = arith.constant 112 : index
    %30 = vector.load %arg1[%c0_9, %c112] : memref<8x784xbf16, #tpu.memory_space<vmem>>, vector<8x168xbf16>
    %cst_10 = arith.constant dense<0.000000e+00> : vector<8x288xf32>
    %31 = tpu.matmul %30, %0, %cst_10 {dimension_numbers = #tpu.dot_dimension_numbers<[1], [0], [0], [1], [0, 0, 1, 1], [], []>} : vector<8x168xbf16>, vector<168x288xbf16>, vector<8x288xf32> -> vector<8x288xf32>
    %32 = vector.extract_strided_slice %31 {offsets = [0, 0], sizes = [8, 72], strides = [1, 1]} : vector<8x288xf32> to vector<8x72xf32>
    %33 = vector.extract_strided_slice %31 {offsets = [0, 72], sizes = [8, 72], strides = [1, 1]} : vector<8x288xf32> to vector<8x72xf32>
    %34 = arith.maximumf %32, %33 : vector<8x72xf32>
    %35 = vector.extract_strided_slice %31 {offsets = [0, 144], sizes = [8, 72], strides = [1, 1]} : vector<8x288xf32> to vector<8x72xf32>
    %36 = vector.extract_strided_slice %31 {offsets = [0, 216], sizes = [8, 72], strides = [1, 1]} : vector<8x288xf32> to vector<8x72xf32>
    %37 = arith.maximumf %35, %36 : vector<8x72xf32>
    %38 = arith.maximumf %34, %37 : vector<8x72xf32>
    %39 = vector.broadcast %1 : vector<1x72xf32> to vector<8x72xf32>
    %40 = arith.addf %38, %39 : vector<8x72xf32>
    %cst_11 = arith.constant 0.000000e+00 : f32
    %41 = vector.broadcast %cst_11 : f32 to vector<8x72xf32>
    %42 = arith.maximumf %40, %41 : vector<8x72xf32>
    %43 = arith.truncf %42 : vector<8x72xf32> to vector<8x72xbf16>
    %c0_12 = arith.constant 0 : index
    %c168 = arith.constant 168 : index
    %44 = vector.load %arg1[%c0_12, %c168] : memref<8x784xbf16, #tpu.memory_space<vmem>>, vector<8x168xbf16>
    %cst_13 = arith.constant dense<0.000000e+00> : vector<8x288xf32>
    %45 = tpu.matmul %44, %0, %cst_13 {dimension_numbers = #tpu.dot_dimension_numbers<[1], [0], [0], [1], [0, 0, 1, 1], [], []>} : vector<8x168xbf16>, vector<168x288xbf16>, vector<8x288xf32> -> vector<8x288xf32>
    %46 = vector.extract_strided_slice %45 {offsets = [0, 0], sizes = [8, 72], strides = [1, 1]} : vector<8x288xf32> to vector<8x72xf32>
    %47 = vector.extract_strided_slice %45 {offsets = [0, 72], sizes = [8, 72], strides = [1, 1]} : vector<8x288xf32> to vector<8x72xf32>
    %48 = arith.maximumf %46, %47 : vector<8x72xf32>
    %49 = vector.extract_strided_slice %45 {offsets = [0, 144], sizes = [8, 72], strides = [1, 1]} : vector<8x288xf32> to vector<8x72xf32>
    %50 = vector.extract_strided_slice %45 {offsets = [0, 216], sizes = [8, 72], strides = [1, 1]} : vector<8x288xf32> to vector<8x72xf32>
    %51 = arith.maximumf %49, %50 : vector<8x72xf32>
    %52 = arith.maximumf %48, %51 : vector<8x72xf32>
    %53 = vector.broadcast %1 : vector<1x72xf32> to vector<8x72xf32>
    %54 = arith.addf %52, %53 : vector<8x72xf32>
    %cst_14 = arith.constant 0.000000e+00 : f32
    %55 = vector.broadcast %cst_14 : f32 to vector<8x72xf32>
    %56 = arith.maximumf %54, %55 : vector<8x72xf32>
    %57 = arith.truncf %56 : vector<8x72xf32> to vector<8x72xbf16>
    %c0_15 = arith.constant 0 : index
    %c224 = arith.constant 224 : index
    %58 = vector.load %arg1[%c0_15, %c224] : memref<8x784xbf16, #tpu.memory_space<vmem>>, vector<8x168xbf16>
    %cst_16 = arith.constant dense<0.000000e+00> : vector<8x288xf32>
    %59 = tpu.matmul %58, %0, %cst_16 {dimension_numbers = #tpu.dot_dimension_numbers<[1], [0], [0], [1], [0, 0, 1, 1], [], []>} : vector<8x168xbf16>, vector<168x288xbf16>, vector<8x288xf32> -> vector<8x288xf32>
    %60 = vector.extract_strided_slice %59 {offsets = [0, 0], sizes = [8, 72], strides = [1, 1]} : vector<8x288xf32> to vector<8x72xf32>
    %61 = vector.extract_strided_slice %59 {offsets = [0, 72], sizes = [8, 72], strides = [1, 1]} : vector<8x288xf32> to vector<8x72xf32>
    %62 = arith.maximumf %60, %61 : vector<8x72xf32>
    %63 = vector.extract_strided_slice %59 {offsets = [0, 144], sizes = [8, 72], strides = [1, 1]} : vector<8x288xf32> to vector<8x72xf32>
    %64 = vector.extract_strided_slice %59 {offsets = [0, 216], sizes = [8, 72], strides = [1, 1]} : vector<8x288xf32> to vector<8x72xf32>
    %65 = arith.maximumf %63, %64 : vector<8x72xf32>
    %66 = arith.maximumf %62, %65 : vector<8x72xf32>
    %67 = vector.broadcast %1 : vector<1x72xf32> to vector<8x72xf32>
    %68 = arith.addf %66, %67 : vector<8x72xf32>
    %cst_17 = arith.constant 0.000000e+00 : f32
    %69 = vector.broadcast %cst_17 : f32 to vector<8x72xf32>
    %70 = arith.maximumf %68, %69 : vector<8x72xf32>
    %71 = arith.truncf %70 : vector<8x72xf32> to vector<8x72xbf16>
    %c0_18 = arith.constant 0 : index
    %c280 = arith.constant 280 : index
    %72 = vector.load %arg1[%c0_18, %c280] : memref<8x784xbf16, #tpu.memory_space<vmem>>, vector<8x168xbf16>
    %cst_19 = arith.constant dense<0.000000e+00> : vector<8x288xf32>
    %73 = tpu.matmul %72, %0, %cst_19 {dimension_numbers = #tpu.dot_dimension_numbers<[1], [0], [0], [1], [0, 0, 1, 1], [], []>} : vector<8x168xbf16>, vector<168x288xbf16>, vector<8x288xf32> -> vector<8x288xf32>
    %74 = vector.extract_strided_slice %73 {offsets = [0, 0], sizes = [8, 72], strides = [1, 1]} : vector<8x288xf32> to vector<8x72xf32>
    %75 = vector.extract_strided_slice %73 {offsets = [0, 72], sizes = [8, 72], strides = [1, 1]} : vector<8x288xf32> to vector<8x72xf32>
    %76 = arith.maximumf %74, %75 : vector<8x72xf32>
    %77 = vector.extract_strided_slice %73 {offsets = [0, 144], sizes = [8, 72], strides = [1, 1]} : vector<8x288xf32> to vector<8x72xf32>
    %78 = vector.extract_strided_slice %73 {offsets = [0, 216], sizes = [8, 72], strides = [1, 1]} : vector<8x288xf32> to vector<8x72xf32>
    %79 = arith.maximumf %77, %78 : vector<8x72xf32>
    %80 = arith.maximumf %76, %79 : vector<8x72xf32>
    %81 = vector.broadcast %1 : vector<1x72xf32> to vector<8x72xf32>
    %82 = arith.addf %80, %81 : vector<8x72xf32>
    %cst_20 = arith.constant 0.000000e+00 : f32
    %83 = vector.broadcast %cst_20 : f32 to vector<8x72xf32>
    %84 = arith.maximumf %82, %83 : vector<8x72xf32>
    %85 = arith.truncf %84 : vector<8x72xf32> to vector<8x72xbf16>
    %c0_21 = arith.constant 0 : index
    %c336 = arith.constant 336 : index
    %86 = vector.load %arg1[%c0_21, %c336] : memref<8x784xbf16, #tpu.memory_space<vmem>>, vector<8x168xbf16>
    %cst_22 = arith.constant dense<0.000000e+00> : vector<8x288xf32>
    %87 = tpu.matmul %86, %0, %cst_22 {dimension_numbers = #tpu.dot_dimension_numbers<[1], [0], [0], [1], [0, 0, 1, 1], [], []>} : vector<8x168xbf16>, vector<168x288xbf16>, vector<8x288xf32> -> vector<8x288xf32>
    %88 = vector.extract_strided_slice %87 {offsets = [0, 0], sizes = [8, 72], strides = [1, 1]} : vector<8x288xf32> to vector<8x72xf32>
    %89 = vector.extract_strided_slice %87 {offsets = [0, 72], sizes = [8, 72], strides = [1, 1]} : vector<8x288xf32> to vector<8x72xf32>
    %90 = arith.maximumf %88, %89 : vector<8x72xf32>
    %91 = vector.extract_strided_slice %87 {offsets = [0, 144], sizes = [8, 72], strides = [1, 1]} : vector<8x288xf32> to vector<8x72xf32>
    %92 = vector.extract_strided_slice %87 {offsets = [0, 216], sizes = [8, 72], strides = [1, 1]} : vector<8x288xf32> to vector<8x72xf32>
    %93 = arith.maximumf %91, %92 : vector<8x72xf32>
    %94 = arith.maximumf %90, %93 : vector<8x72xf32>
    %95 = vector.broadcast %1 : vector<1x72xf32> to vector<8x72xf32>
    %96 = arith.addf %94, %95 : vector<8x72xf32>
    %cst_23 = arith.constant 0.000000e+00 : f32
    %97 = vector.broadcast %cst_23 : f32 to vector<8x72xf32>
    %98 = arith.maximumf %96, %97 : vector<8x72xf32>
    %99 = arith.truncf %98 : vector<8x72xf32> to vector<8x72xbf16>
    %c0_24 = arith.constant 0 : index
    %c392 = arith.constant 392 : index
    %100 = vector.load %arg1[%c0_24, %c392] : memref<8x784xbf16, #tpu.memory_space<vmem>>, vector<8x168xbf16>
    %cst_25 = arith.constant dense<0.000000e+00> : vector<8x288xf32>
    %101 = tpu.matmul %100, %0, %cst_25 {dimension_numbers = #tpu.dot_dimension_numbers<[1], [0], [0], [1], [0, 0, 1, 1], [], []>} : vector<8x168xbf16>, vector<168x288xbf16>, vector<8x288xf32> -> vector<8x288xf32>
    %102 = vector.extract_strided_slice %101 {offsets = [0, 0], sizes = [8, 72], strides = [1, 1]} : vector<8x288xf32> to vector<8x72xf32>
    %103 = vector.extract_strided_slice %101 {offsets = [0, 72], sizes = [8, 72], strides = [1, 1]} : vector<8x288xf32> to vector<8x72xf32>
    %104 = arith.maximumf %102, %103 : vector<8x72xf32>
    %105 = vector.extract_strided_slice %101 {offsets = [0, 144], sizes = [8, 72], strides = [1, 1]} : vector<8x288xf32> to vector<8x72xf32>
    %106 = vector.extract_strided_slice %101 {offsets = [0, 216], sizes = [8, 72], strides = [1, 1]} : vector<8x288xf32> to vector<8x72xf32>
    %107 = arith.maximumf %105, %106 : vector<8x72xf32>
    %108 = arith.maximumf %104, %107 : vector<8x72xf32>
    %109 = vector.broadcast %1 : vector<1x72xf32> to vector<8x72xf32>
    %110 = arith.addf %108, %109 : vector<8x72xf32>
    %cst_26 = arith.constant 0.000000e+00 : f32
    %111 = vector.broadcast %cst_26 : f32 to vector<8x72xf32>
    %112 = arith.maximumf %110, %111 : vector<8x72xf32>
    %113 = arith.truncf %112 : vector<8x72xf32> to vector<8x72xbf16>
    %c0_27 = arith.constant 0 : index
    %c448 = arith.constant 448 : index
    %114 = vector.load %arg1[%c0_27, %c448] : memref<8x784xbf16, #tpu.memory_space<vmem>>, vector<8x168xbf16>
    %cst_28 = arith.constant dense<0.000000e+00> : vector<8x288xf32>
    %115 = tpu.matmul %114, %0, %cst_28 {dimension_numbers = #tpu.dot_dimension_numbers<[1], [0], [0], [1], [0, 0, 1, 1], [], []>} : vector<8x168xbf16>, vector<168x288xbf16>, vector<8x288xf32> -> vector<8x288xf32>
    %116 = vector.extract_strided_slice %115 {offsets = [0, 0], sizes = [8, 72], strides = [1, 1]} : vector<8x288xf32> to vector<8x72xf32>
    %117 = vector.extract_strided_slice %115 {offsets = [0, 72], sizes = [8, 72], strides = [1, 1]} : vector<8x288xf32> to vector<8x72xf32>
    %118 = arith.maximumf %116, %117 : vector<8x72xf32>
    %119 = vector.extract_strided_slice %115 {offsets = [0, 144], sizes = [8, 72], strides = [1, 1]} : vector<8x288xf32> to vector<8x72xf32>
    %120 = vector.extract_strided_slice %115 {offsets = [0, 216], sizes = [8, 72], strides = [1, 1]} : vector<8x288xf32> to vector<8x72xf32>
    %121 = arith.maximumf %119, %120 : vector<8x72xf32>
    %122 = arith.maximumf %118, %121 : vector<8x72xf32>
    %123 = vector.broadcast %1 : vector<1x72xf32> to vector<8x72xf32>
    %124 = arith.addf %122, %123 : vector<8x72xf32>
    %cst_29 = arith.constant 0.000000e+00 : f32
    %125 = vector.broadcast %cst_29 : f32 to vector<8x72xf32>
    %126 = arith.maximumf %124, %125 : vector<8x72xf32>
    %127 = arith.truncf %126 : vector<8x72xf32> to vector<8x72xbf16>
    %c0_30 = arith.constant 0 : index
    %c504 = arith.constant 504 : index
    %128 = vector.load %arg1[%c0_30, %c504] : memref<8x784xbf16, #tpu.memory_space<vmem>>, vector<8x168xbf16>
    %cst_31 = arith.constant dense<0.000000e+00> : vector<8x288xf32>
    %129 = tpu.matmul %128, %0, %cst_31 {dimension_numbers = #tpu.dot_dimension_numbers<[1], [0], [0], [1], [0, 0, 1, 1], [], []>} : vector<8x168xbf16>, vector<168x288xbf16>, vector<8x288xf32> -> vector<8x288xf32>
    %130 = vector.extract_strided_slice %129 {offsets = [0, 0], sizes = [8, 72], strides = [1, 1]} : vector<8x288xf32> to vector<8x72xf32>
    %131 = vector.extract_strided_slice %129 {offsets = [0, 72], sizes = [8, 72], strides = [1, 1]} : vector<8x288xf32> to vector<8x72xf32>
    %132 = arith.maximumf %130, %131 : vector<8x72xf32>
    %133 = vector.extract_strided_slice %129 {offsets = [0, 144], sizes = [8, 72], strides = [1, 1]} : vector<8x288xf32> to vector<8x72xf32>
    %134 = vector.extract_strided_slice %129 {offsets = [0, 216], sizes = [8, 72], strides = [1, 1]} : vector<8x288xf32> to vector<8x72xf32>
    %135 = arith.maximumf %133, %134 : vector<8x72xf32>
    %136 = arith.maximumf %132, %135 : vector<8x72xf32>
    %137 = vector.broadcast %1 : vector<1x72xf32> to vector<8x72xf32>
    %138 = arith.addf %136, %137 : vector<8x72xf32>
    %cst_32 = arith.constant 0.000000e+00 : f32
    %139 = vector.broadcast %cst_32 : f32 to vector<8x72xf32>
    %140 = arith.maximumf %138, %139 : vector<8x72xf32>
    %141 = arith.truncf %140 : vector<8x72xf32> to vector<8x72xbf16>
    %c0_33 = arith.constant 0 : index
    %c560 = arith.constant 560 : index
    %142 = vector.load %arg1[%c0_33, %c560] : memref<8x784xbf16, #tpu.memory_space<vmem>>, vector<8x168xbf16>
    %cst_34 = arith.constant dense<0.000000e+00> : vector<8x288xf32>
    %143 = tpu.matmul %142, %0, %cst_34 {dimension_numbers = #tpu.dot_dimension_numbers<[1], [0], [0], [1], [0, 0, 1, 1], [], []>} : vector<8x168xbf16>, vector<168x288xbf16>, vector<8x288xf32> -> vector<8x288xf32>
    %144 = vector.extract_strided_slice %143 {offsets = [0, 0], sizes = [8, 72], strides = [1, 1]} : vector<8x288xf32> to vector<8x72xf32>
    %145 = vector.extract_strided_slice %143 {offsets = [0, 72], sizes = [8, 72], strides = [1, 1]} : vector<8x288xf32> to vector<8x72xf32>
    %146 = arith.maximumf %144, %145 : vector<8x72xf32>
    %147 = vector.extract_strided_slice %143 {offsets = [0, 144], sizes = [8, 72], strides = [1, 1]} : vector<8x288xf32> to vector<8x72xf32>
    %148 = vector.extract_strided_slice %143 {offsets = [0, 216], sizes = [8, 72], strides = [1, 1]} : vector<8x288xf32> to vector<8x72xf32>
    %149 = arith.maximumf %147, %148 : vector<8x72xf32>
    %150 = arith.maximumf %146, %149 : vector<8x72xf32>
    %151 = vector.broadcast %1 : vector<1x72xf32> to vector<8x72xf32>
    %152 = arith.addf %150, %151 : vector<8x72xf32>
    %cst_35 = arith.constant 0.000000e+00 : f32
    %153 = vector.broadcast %cst_35 : f32 to vector<8x72xf32>
    %154 = arith.maximumf %152, %153 : vector<8x72xf32>
    %155 = arith.truncf %154 : vector<8x72xf32> to vector<8x72xbf16>
    %c0_36 = arith.constant 0 : index
    %c616 = arith.constant 616 : index
    %156 = vector.load %arg1[%c0_36, %c616] : memref<8x784xbf16, #tpu.memory_space<vmem>>, vector<8x168xbf16>
    %cst_37 = arith.constant dense<0.000000e+00> : vector<8x288xf32>
    %157 = tpu.matmul %156, %0, %cst_37 {dimension_numbers = #tpu.dot_dimension_numbers<[1], [0], [0], [1], [0, 0, 1, 1], [], []>} : vector<8x168xbf16>, vector<168x288xbf16>, vector<8x288xf32> -> vector<8x288xf32>
    %158 = vector.extract_strided_slice %157 {offsets = [0, 0], sizes = [8, 72], strides = [1, 1]} : vector<8x288xf32> to vector<8x72xf32>
    %159 = vector.extract_strided_slice %157 {offsets = [0, 72], sizes = [8, 72], strides = [1, 1]} : vector<8x288xf32> to vector<8x72xf32>
    %160 = arith.maximumf %158, %159 : vector<8x72xf32>
    %161 = vector.extract_strided_slice %157 {offsets = [0, 144], sizes = [8, 72], strides = [1, 1]} : vector<8x288xf32> to vector<8x72xf32>
    %162 = vector.extract_strided_slice %157 {offsets = [0, 216], sizes = [8, 72], strides = [1, 1]} : vector<8x288xf32> to vector<8x72xf32>
    %163 = arith.maximumf %161, %162 : vector<8x72xf32>
    %164 = arith.maximumf %160, %163 : vector<8x72xf32>
    %165 = vector.broadcast %1 : vector<1x72xf32> to vector<8x72xf32>
    %166 = arith.addf %164, %165 : vector<8x72xf32>
    %cst_38 = arith.constant 0.000000e+00 : f32
    %167 = vector.broadcast %cst_38 : f32 to vector<8x72xf32>
    %168 = arith.maximumf %166, %167 : vector<8x72xf32>
    %169 = arith.truncf %168 : vector<8x72xf32> to vector<8x72xbf16>
    %170 = tpu.concatenate %15, %29, %43, %57, %71, %85, %99, %113, %127, %141, %155, %169 in 1 : vector<8x72xbf16>, vector<8x72xbf16>, vector<8x72xbf16>, vector<8x72xbf16>, vector<8x72xbf16>, vector<8x72xbf16>, vector<8x72xbf16>, vector<8x72xbf16>, vector<8x72xbf16>, vector<8x72xbf16>, vector<8x72xbf16>, vector<8x72xbf16> -> vector<8x864xbf16>
    %c0_39 = arith.constant 0 : index
    %c0_40 = arith.constant 0 : index
    %171 = vector.load %arg4[%c0_39, %c0_40] : memref<432x256xbf16, #tpu.memory_space<vmem>>, vector<432x256xbf16>
    %c0_41 = arith.constant 0 : index
    %c0_42 = arith.constant 0 : index
    %172 = vector.load %arg5[%c0_41, %c0_42] : memref<1x64xf32, #tpu.memory_space<vmem>>, vector<1x64xf32>
    %173 = vector.extract_strided_slice %170 {offsets = [0, 0], sizes = [8, 432], strides = [1, 1]} : vector<8x864xbf16> to vector<8x432xbf16>
    %cst_43 = arith.constant dense<0.000000e+00> : vector<8x256xf32>
    %174 = tpu.matmul %173, %171, %cst_43 {dimension_numbers = #tpu.dot_dimension_numbers<[1], [0], [0], [1], [0, 0, 1, 1], [], []>} : vector<8x432xbf16>, vector<432x256xbf16>, vector<8x256xf32> -> vector<8x256xf32>
    %175 = vector.extract_strided_slice %174 {offsets = [0, 0], sizes = [8, 64], strides = [1, 1]} : vector<8x256xf32> to vector<8x64xf32>
    %176 = vector.extract_strided_slice %174 {offsets = [0, 64], sizes = [8, 64], strides = [1, 1]} : vector<8x256xf32> to vector<8x64xf32>
    %177 = arith.maximumf %175, %176 : vector<8x64xf32>
    %178 = vector.extract_strided_slice %174 {offsets = [0, 128], sizes = [8, 64], strides = [1, 1]} : vector<8x256xf32> to vector<8x64xf32>
    %179 = vector.extract_strided_slice %174 {offsets = [0, 192], sizes = [8, 64], strides = [1, 1]} : vector<8x256xf32> to vector<8x64xf32>
    %180 = arith.maximumf %178, %179 : vector<8x64xf32>
    %181 = arith.maximumf %177, %180 : vector<8x64xf32>
    %182 = vector.broadcast %172 : vector<1x64xf32> to vector<8x64xf32>
    %183 = arith.addf %181, %182 : vector<8x64xf32>
    %cst_44 = arith.constant 0.000000e+00 : f32
    %184 = vector.broadcast %cst_44 : f32 to vector<8x64xf32>
    %185 = arith.maximumf %183, %184 : vector<8x64xf32>
    %186 = arith.truncf %185 : vector<8x64xf32> to vector<8x64xbf16>
    %187 = vector.extract_strided_slice %170 {offsets = [0, 144], sizes = [8, 432], strides = [1, 1]} : vector<8x864xbf16> to vector<8x432xbf16>
    %cst_45 = arith.constant dense<0.000000e+00> : vector<8x256xf32>
    %188 = tpu.matmul %187, %171, %cst_45 {dimension_numbers = #tpu.dot_dimension_numbers<[1], [0], [0], [1], [0, 0, 1, 1], [], []>} : vector<8x432xbf16>, vector<432x256xbf16>, vector<8x256xf32> -> vector<8x256xf32>
    %189 = vector.extract_strided_slice %188 {offsets = [0, 0], sizes = [8, 64], strides = [1, 1]} : vector<8x256xf32> to vector<8x64xf32>
    %190 = vector.extract_strided_slice %188 {offsets = [0, 64], sizes = [8, 64], strides = [1, 1]} : vector<8x256xf32> to vector<8x64xf32>
    %191 = arith.maximumf %189, %190 : vector<8x64xf32>
    %192 = vector.extract_strided_slice %188 {offsets = [0, 128], sizes = [8, 64], strides = [1, 1]} : vector<8x256xf32> to vector<8x64xf32>
    %193 = vector.extract_strided_slice %188 {offsets = [0, 192], sizes = [8, 64], strides = [1, 1]} : vector<8x256xf32> to vector<8x64xf32>
    %194 = arith.maximumf %192, %193 : vector<8x64xf32>
    %195 = arith.maximumf %191, %194 : vector<8x64xf32>
    %196 = vector.broadcast %172 : vector<1x64xf32> to vector<8x64xf32>
    %197 = arith.addf %195, %196 : vector<8x64xf32>
    %cst_46 = arith.constant 0.000000e+00 : f32
    %198 = vector.broadcast %cst_46 : f32 to vector<8x64xf32>
    %199 = arith.maximumf %197, %198 : vector<8x64xf32>
    %200 = arith.truncf %199 : vector<8x64xf32> to vector<8x64xbf16>
    %201 = vector.extract_strided_slice %170 {offsets = [0, 288], sizes = [8, 432], strides = [1, 1]} : vector<8x864xbf16> to vector<8x432xbf16>
    %cst_47 = arith.constant dense<0.000000e+00> : vector<8x256xf32>
    %202 = tpu.matmul %201, %171, %cst_47 {dimension_numbers = #tpu.dot_dimension_numbers<[1], [0], [0], [1], [0, 0, 1, 1], [], []>} : vector<8x432xbf16>, vector<432x256xbf16>, vector<8x256xf32> -> vector<8x256xf32>
    %203 = vector.extract_strided_slice %202 {offsets = [0, 0], sizes = [8, 64], strides = [1, 1]} : vector<8x256xf32> to vector<8x64xf32>
    %204 = vector.extract_strided_slice %202 {offsets = [0, 64], sizes = [8, 64], strides = [1, 1]} : vector<8x256xf32> to vector<8x64xf32>
    %205 = arith.maximumf %203, %204 : vector<8x64xf32>
    %206 = vector.extract_strided_slice %202 {offsets = [0, 128], sizes = [8, 64], strides = [1, 1]} : vector<8x256xf32> to vector<8x64xf32>
    %207 = vector.extract_strided_slice %202 {offsets = [0, 192], sizes = [8, 64], strides = [1, 1]} : vector<8x256xf32> to vector<8x64xf32>
    %208 = arith.maximumf %206, %207 : vector<8x64xf32>
    %209 = arith.maximumf %205, %208 : vector<8x64xf32>
    %210 = vector.broadcast %172 : vector<1x64xf32> to vector<8x64xf32>
    %211 = arith.addf %209, %210 : vector<8x64xf32>
    %cst_48 = arith.constant 0.000000e+00 : f32
    %212 = vector.broadcast %cst_48 : f32 to vector<8x64xf32>
    %213 = arith.maximumf %211, %212 : vector<8x64xf32>
    %214 = arith.truncf %213 : vector<8x64xf32> to vector<8x64xbf16>
    %215 = vector.extract_strided_slice %170 {offsets = [0, 432], sizes = [8, 432], strides = [1, 1]} : vector<8x864xbf16> to vector<8x432xbf16>
    %cst_49 = arith.constant dense<0.000000e+00> : vector<8x256xf32>
    %216 = tpu.matmul %215, %171, %cst_49 {dimension_numbers = #tpu.dot_dimension_numbers<[1], [0], [0], [1], [0, 0, 1, 1], [], []>} : vector<8x432xbf16>, vector<432x256xbf16>, vector<8x256xf32> -> vector<8x256xf32>
    %217 = vector.extract_strided_slice %216 {offsets = [0, 0], sizes = [8, 64], strides = [1, 1]} : vector<8x256xf32> to vector<8x64xf32>
    %218 = vector.extract_strided_slice %216 {offsets = [0, 64], sizes = [8, 64], strides = [1, 1]} : vector<8x256xf32> to vector<8x64xf32>
    %219 = arith.maximumf %217, %218 : vector<8x64xf32>
    %220 = vector.extract_strided_slice %216 {offsets = [0, 128], sizes = [8, 64], strides = [1, 1]} : vector<8x256xf32> to vector<8x64xf32>
    %221 = vector.extract_strided_slice %216 {offsets = [0, 192], sizes = [8, 64], strides = [1, 1]} : vector<8x256xf32> to vector<8x64xf32>
    %222 = arith.maximumf %220, %221 : vector<8x64xf32>
    %223 = arith.maximumf %219, %222 : vector<8x64xf32>
    %224 = vector.broadcast %172 : vector<1x64xf32> to vector<8x64xf32>
    %225 = arith.addf %223, %224 : vector<8x64xf32>
    %cst_50 = arith.constant 0.000000e+00 : f32
    %226 = vector.broadcast %cst_50 : f32 to vector<8x64xf32>
    %227 = arith.maximumf %225, %226 : vector<8x64xf32>
    %228 = arith.truncf %227 : vector<8x64xf32> to vector<8x64xbf16>
    %229 = tpu.concatenate %186, %200, %214, %228 in 1 : vector<8x64xbf16>, vector<8x64xbf16>, vector<8x64xbf16>, vector<8x64xbf16> -> vector<8x256xbf16>
    %c0_51 = arith.constant 0 : index
    %c0_52 = arith.constant 0 : index
    %230 = vector.load %arg6[%c0_51, %c0_52] : memref<256x128xbf16, #tpu.memory_space<vmem>>, vector<256x128xbf16>
    %cst_53 = arith.constant dense<0.000000e+00> : vector<8x128xf32>
    %231 = tpu.matmul %229, %230, %cst_53 {dimension_numbers = #tpu.dot_dimension_numbers<[1], [0], [0], [1], [0, 0, 1, 1], [], []>} : vector<8x256xbf16>, vector<256x128xbf16>, vector<8x128xf32> -> vector<8x128xf32>
    %c0_54 = arith.constant 0 : index
    %c0_55 = arith.constant 0 : index
    %232 = vector.load %arg7[%c0_54, %c0_55] : memref<1x128xf32, #tpu.memory_space<vmem>>, vector<1x128xf32>
    %233 = vector.broadcast %232 : vector<1x128xf32> to vector<8x128xf32>
    %234 = arith.addf %231, %233 : vector<8x128xf32>
    %cst_56 = arith.constant 0.000000e+00 : f32
    %235 = vector.broadcast %cst_56 : f32 to vector<8x128xf32>
    %236 = arith.maximumf %234, %235 : vector<8x128xf32>
    %237 = arith.truncf %236 : vector<8x128xf32> to vector<8x128xbf16>
    %c0_57 = arith.constant 0 : index
    %c0_58 = arith.constant 0 : index
    %238 = vector.load %arg8[%c0_57, %c0_58] : memref<128x128xbf16, #tpu.memory_space<vmem>>, vector<128x128xbf16>
    %cst_59 = arith.constant dense<0.000000e+00> : vector<8x128xf32>
    %239 = tpu.matmul %237, %238, %cst_59 {dimension_numbers = #tpu.dot_dimension_numbers<[1], [0], [0], [1], [0, 0, 1, 1], [], []>} : vector<8x128xbf16>, vector<128x128xbf16>, vector<8x128xf32> -> vector<8x128xf32>
    %c0_60 = arith.constant 0 : index
    %c0_61 = arith.constant 0 : index
    %240 = vector.load %arg9[%c0_60, %c0_61] : memref<1x128xf32, #tpu.memory_space<vmem>>, vector<1x128xf32>
    %241 = vector.broadcast %240 : vector<1x128xf32> to vector<8x128xf32>
    %242 = arith.addf %239, %241 : vector<8x128xf32>
    %cst_62 = arith.constant 0.000000e+00 : f32
    %243 = vector.broadcast %cst_62 : f32 to vector<8x128xf32>
    %244 = arith.maximumf %242, %243 : vector<8x128xf32>
    %245 = arith.truncf %244 : vector<8x128xf32> to vector<8x128xbf16>
    %c0_63 = arith.constant 0 : index
    %c0_64 = arith.constant 0 : index
    %246 = vector.load %arg10[%c0_63, %c0_64] : memref<128x128xbf16, #tpu.memory_space<vmem>>, vector<128x128xbf16>
    %cst_65 = arith.constant dense<0.000000e+00> : vector<8x128xf32>
    %247 = tpu.matmul %245, %246, %cst_65 {dimension_numbers = #tpu.dot_dimension_numbers<[1], [0], [0], [1], [0, 0, 1, 1], [], []>} : vector<8x128xbf16>, vector<128x128xbf16>, vector<8x128xf32> -> vector<8x128xf32>
    %c0_66 = arith.constant 0 : index
    %c0_67 = arith.constant 0 : index
    %248 = vector.load %arg11[%c0_66, %c0_67] : memref<1x128xf32, #tpu.memory_space<vmem>>, vector<1x128xf32>
    %249 = vector.broadcast %248 : vector<1x128xf32> to vector<8x128xf32>
    %250 = arith.addf %247, %249 : vector<8x128xf32>
    %c0_68 = arith.constant 0 : index
    %c0_69 = arith.constant 0 : index
    %251 = vector.load %arg12[%c0_68, %c0_69] : memref<8x128xf32, #tpu.memory_space<vmem>>, vector<8x128xf32>
    tpu.vector_store %arg12[%c0_68, %c0_69], %250 {strides = array<i32>} : memref<8x128xf32, #tpu.memory_space<vmem>>, vector<8x128xf32>,
    return
  }
  func.func @transform_0(%arg0: i32) -> (i32, i32) {
    %c0_i32 = arith.constant 0 : i32
    %c0_i32_0 = arith.constant 0 : i32
    return %arg0, %c0_i32 : i32, i32
  }
  func.func @transform_1(%arg0: i32) -> (i32, i32) {
    %c0_i32 = arith.constant 0 : i32
    %c0_i32_0 = arith.constant 0 : i32
    %c0_i32_1 = arith.constant 0 : i32
    return %c0_i32, %c0_i32_0 : i32, i32
  }
  func.func @transform_2(%arg0: i32) -> (i32, i32) {
    %c0_i32 = arith.constant 0 : i32
    %c0_i32_0 = arith.constant 0 : i32
    %c0_i32_1 = arith.constant 0 : i32
    return %c0_i32, %c0_i32_0 : i32, i32
  }
  func.func @transform_3(%arg0: i32) -> (i32, i32) {
    %c0_i32 = arith.constant 0 : i32
    %c0_i32_0 = arith.constant 0 : i32
    %c0_i32_1 = arith.constant 0 : i32
    return %c0_i32, %c0_i32_0 : i32, i32
  }
  func.func @transform_4(%arg0: i32) -> (i32, i32) {
    %c0_i32 = arith.constant 0 : i32
    %c0_i32_0 = arith.constant 0 : i32
    %c0_i32_1 = arith.constant 0 : i32
    return %c0_i32, %c0_i32_0 : i32, i32
  }
  func.func @transform_5(%arg0: i32) -> (i32, i32) {
    %c0_i32 = arith.constant 0 : i32
    %c0_i32_0 = arith.constant 0 : i32
    %c0_i32_1 = arith.constant 0 : i32
    return %c0_i32, %c0_i32_0 : i32, i32
  }
  func.func @transform_6(%arg0: i32) -> (i32, i32) {
    %c0_i32 = arith.constant 0 : i32
    %c0_i32_0 = arith.constant 0 : i32
    %c0_i32_1 = arith.constant 0 : i32
    return %c0_i32, %c0_i32_0 : i32, i32
  }
  func.func @transform_7(%arg0: i32) -> (i32, i32) {
    %c0_i32 = arith.constant 0 : i32
    %c0_i32_0 = arith.constant 0 : i32
    %c0_i32_1 = arith.constant 0 : i32
    return %c0_i32, %c0_i32_0 : i32, i32
  }
  func.func @transform_8(%arg0: i32) -> (i32, i32) {
    %c0_i32 = arith.constant 0 : i32
    %c0_i32_0 = arith.constant 0 : i32
    %c0_i32_1 = arith.constant 0 : i32
    return %c0_i32, %c0_i32_0 : i32, i32
  }
  func.func @transform_9(%arg0: i32) -> (i32, i32) {
    %c0_i32 = arith.constant 0 : i32
    %c0_i32_0 = arith.constant 0 : i32
    %c0_i32_1 = arith.constant 0 : i32
    return %c0_i32, %c0_i32_0 : i32, i32
  }
  func.func @transform_10(%arg0: i32) -> (i32, i32) {
    %c0_i32 = arith.constant 0 : i32
    %c0_i32_0 = arith.constant 0 : i32
    %c0_i32_1 = arith.constant 0 : i32
    return %c0_i32, %c0_i32_0 : i32, i32
  }
  func.func @transform_11(%arg0: i32) -> (i32, i32) {
    %c0_i32 = arith.constant 0 : i32
    %c0_i32_0 = arith.constant 0 : i32
    return %arg0, %c0_i32 : i32, i32
  }
}

</mosaic_0001>

<bundles_post_ra>
// kernel: lenet_forward.1
= control target key start
LH: loop header
LB: loop body
LE: loop exit
PB: predicated region body
PF: predicated region fallthrough
CT: control target
= control target key end

     0   :  { %16 = vsyncpa [#allocation3], 0  ;;  %s6199_s0 = inlined_call_operand.vmem [shape: bf16[16,784], index: 0, kind: input, shape index: {}]   ;;  %s6200_s1 = inlined_call_operand.vmem [shape: bf16[168,288], index: 1, kind: input, shape index: {}]   ;;  %s6201_s2 = inlined_call_operand.vmem [shape: f32[1,72], index: 2, kind: input, shape index: {}]   ;;  %s6202_s3 = inlined_call_operand.vmem [shape: bf16[432,256], index: 3, kind: input, shape index: {}]   ;;  %s6203_s4 = inlined_call_operand.vmem [shape: f32[1,64], index: 4, kind: input, shape index: {}]   ;;  %s6204_s5 = inlined_call_operand.vmem [shape: bf16[256,128], index: 5, kind: input, shape index: {}]   ;;  %s6205_s6 = inlined_call_operand.vmem [shape: f32[1,128], index: 6, kind: input, shape index: {}]   ;;  %s6206_s7 = inlined_call_operand.vmem [shape: bf16[128,128], index: 7, kind: input, shape index: {}]   ;;  %s6207_s8 = inlined_call_operand.vmem [shape: f32[1,128], index: 8, kind: input, shape index: {}]   ;;  %s6208_s9 = inlined_call_operand.hbm [shape: bf16[128,128], index: 9, kind: input, shape index: {}]   ;;  %s6209_s10 = inlined_call_operand.vmem [shape: f32[1,128], index: 10, kind: input, shape index: {}]   ;;  %s6210_s11 = inlined_call_operand.hbm [shape: f32[16,128], index: 11, kind: output, shape index: {}]  }
   0x1   :  { %17 = vsyncpa [#allocation4], 0 }
   0x2   :  { %19 = vsyncpa [#allocation4 + $0x1], 0  ;;  %s4162_s17 = smov 0   ;;  %s4164_s18 = smov 0  }
   0x3   :  { %s4166_s19 = smov 0   ;;  %s4168_s20 = smov 0  }
   0x4 LB: > { %s4183_s21 = sadd.s32 4294967295, %s4079_s20   ;;  %s3421_s22 = sadd.s32 4294967294, %s4079_s20   ;;  %s4079_s20 = sphi %s4168_s20, %s6266_s20   ;;  %s4075_s19 = sphi %s4166_s19, %s6265_s19   ;;  %s4071_s18 = sphi %s4164_s18, %s6264_s18   ;;  %s4067_s17 = sphi %s4162_s17, %s6263_s17  }
   0x5   : > { %s4187_s23 = sadd.s32 1, %s4079_s20   ;;  %s268_s24 = sadd.s32 1, %s4075_s19 }
   0x6   : > { %s265_s25 = ssub.s32 %s4079_s20, %s4187_s23  ;;  %p278_p0 = scmp.ne.s32.totalorder %s4075_s19, %s4071_s18 }
   0x7   : > { %p266_p1 = scmp.eq.s32.totalorder %s265_s25, 0  ;;  %p279_p2 = scmp.eq.s32.totalorder %s4183_s21, 1 }
   0x8   : > { %p284_p3 = scmp.ne.s32.totalorder %s4071_s18, %s4067_s17  ;;  %p285_p4 = scmp.eq.s32.totalorder %s3421_s22, 1 }
   0x9   : > { %s4198_s26 = scalar_select %p266_p1, %s4075_s19, %s268_s24  }
   0xa   : > { %p4200_p5 = por %p279_p2, %p278_p0  ;;  %p4204_p6 = por %p285_p4, %p284_p3 }
   0xb   : > { %6233 = sst [smem:[#allocation8_spill]] %s4198_s26  ;;  %p3422_p7 = scmp.ge.s32.totalorder %s4079_s20, 1 }
   0xc   : > { %s6234_s27 = scalar_select %p4200_p5, 1, 0 }
   0xd   : > { %s6235_s28 = scalar_select %p4204_p6, 1, 0 }
   0xe   : > { %p292_p8 = scmp.lt.s32.totalorder %s4079_s20, 3  ;;  %p6211_p9 = scmp.eq.s32.totalorder %s4183_s21, 0 }
   0xf   : > { %s4081_s30 = smov [#allocation2]   ;;  %s3985_s16 = scalar_lea.hbm %s6208_s9, 1024 }
  0x10   : > { %p4211_p10 = pnand %p3422_p7, %p292_p8  ;;  %s328_s12 = sshll.u32 %s4081_s30, 4  ;;  %s329_s12 = int_to_ptr.vmem [resolvable:$true] %s328_s12 }
  0x11   : > { %p3986_p13 = scmp.ne.s32.totalorder %s6208_s9, %s3985_s16  ;;  %p3992_p3 = scmp.lt.u32.totalorder %s3985_s16, %s6208_s9 }
  0x12   : > { %s6236_s29 = scalar_select %p4211_p10, 1, 0 }
  0x13   : > { %p3722_p11 = pneg %p4211_p10 }
  0x15   : > { %p4219_p12 = pnand %p6211_p9, %p3722_p11 }
  0x17   : > { %p3987_p0 = pneg %p4219_p12 }
  0x19   : > { %p3988_p1 = pnand %p3987_p0, %p3986_p13 }
  0x1b   : > { %p3989_p2 = pneg %p3988_p1 }
  0x1d   : > { %p3994_p4 = pnand %p3992_p3, %p3989_p2 }
  0x1f   : > { %3997 = shalt.err (!%p3994_p4)
}
  0x20   : > { %s3998_s26 = scalar_lea.vmem %s329_s12, 1024  ;;  %p4006_p9 = scmp.lt.s32.totalorder %s329_s12, %s329_s12 }
  0x21   : > { %p3999_p7 = scmp.ne.s32.totalorder %s329_s12, %s3998_s26  ;;  %p4007_p6 = scmp.lt.s32.totalorder %s3998_s26, %s3998_s26 }
  0x23   : > { %p4001_p8 = pnand %p3999_p7, %p3987_p0  ;;  %p4008_p5 = por %p4007_p6, %p4006_p9 }
  0x25   : > { %p4002_p11 = pneg %p4001_p8 }
  0x27   : > { %p4009_p10 = pnand %p4008_p5, %p4002_p11 }
  0x29   : > { %4012 = shalt.err (!%p4009_p10)
}
  0x2a   : > { %s4082_s14 = smov 64   ;;  %s4083_s15 = smov 4  }
  0x2b   : > { %3725 = dma.hbm_to_vmem [thread:$0]  (!%p4219_p12), %s6208_s9, 1024, %s329_s12, [#allocation3], %s4082_s14, %s4082_s14, %s4083_s15  }
  0x2c   : > { %p6238_p13 = scmp.ne.s32.totalorder %s6236_s29, 0 }
  0x2e   : > { %355 = sbr.rel (%p6238_p13) target bundleno = 2507 (0x9cb), region = 64 }
  0x35   : > { %p6239_p1 = scmp.eq.s32.totalorder %s4183_s21, 0 }
  0x37   : > { %4058 = dma.done.wait (%p6239_p1), [#allocation3], 1024   ;;  %p6240_p0 = pmov %p6239_p1 }
  0x38   : > { %p395_p5 = scmp.lt.s32.totalorder %s4183_s21, 1  ;;  %v4084_v0 = vmov 0   ;;  %v4259_v3 = vld [vmem:[%s6200_s1 + $0x4] ss:$12 sps:$4 sm:$0xff]   ;;  %v4264_v4 = vld [vmem:[%s6200_s1] ss:$12 sps:$4 sm:$0xff]  }
  0x39   : > { %4060 = vsyncadd (%p6240_p0), [#allocation3], 4294966272  ;;  %674 = vmatprep.subr.bf16.mxu1 %v4084_v0  ;;  %v4269_v5 = vld [vmem:[%s6200_s1 + $0x8] ss:$12 sps:$4 sm:$0xff]   ;;  %633 = vmatprep.subr.bf16.mxu0 %v4259_v3  ;;  %v4282_v8 = vld [vmem:[%s6200_s1 + $0x18] ss:$12 sps:$4 sm:$0xff]  }
  0x3a   : > { %s396_s26 = scalar_select %p395_p5, %s4183_s21, 1  ;;  %v4277_v7 = vld [vmem:[%s6200_s1 + $0x1c] ss:$12 sps:$4 sm:$0xff]   ;;  %vm619_vm0 = vcmask 326656   ;;  %634 = vmatpush1.bf16.msra.mxu0 %v4264_v4  ;;  %675 = vmatpush1.bf16.msra.mxu1 %v4269_v5  ;;  %v4289_v9 = vld [vmem:[%s6200_s1 + $0x20] ss:$12 sps:$4 sm:$0xff]  }
  0x3b   : > { %635 = vmatprep.subr.bf16.mxu0 %v4277_v7  ;;  %676 = vmatprep.subr.bf16.mxu1 %v4084_v0  ;;  %v4296_v10 = vld [vmem:[%s6200_s1 + $0x34] ss:$12 sps:$4 sm:$0xff]   ;;  %s6221_s24 = smov 16   ;;  %v4304_v11 = vld [vmem:[%s6200_s1 + $0x30] ss:$12 sps:$4 sm:$0xff]   ;;  %s4088_s25 = smov 32  }
  0x3c   : > { %s3715_s13 = smul.u32 28, %s396_s26  ;;  %s4085_s26 = smov 72   ;;  %v4312_v12 = vld [vmem:[%s6200_s1 + $0x38] ss:$12 sps:$4 sm:$0xff]   ;;  %v4325_v15 = vld [vmem:[%s6200_s1 + $0x48] ss:$12 sps:$4 sm:$0xff]  }
  0x3d   : > { %v4317_v13 = vld [vmem:[%s6200_s1 + $0x4c] ss:$12 sps:$4 sm:$0xff]   ;;  %v4335_v16 = vld [vmem:[%s6200_s1 + $0x50] ss:$12 sps:$4 sm:$0xff]   ;;  %v4354_v19 = vld [vmem:[%s6200_s1 + $0x68] ss:$12 sps:$4 sm:$0xff]  }
  0x3e   : > { %s4251_s12 = scalar_lea.vmem %s6199_s0, %s3715_s13  ;;  %636 = vmatpush1.bf16.msra.mxu0 %v4282_v8  ;;  %677 = vmatpush1.bf16.msra.mxu1 %v4289_v9  ;;  %v4342_v17 = vld [vmem:[%s6200_s1 + $0x64] ss:$12 sps:$4 sm:$0xff]   ;;  %v4349_v18 = vld [vmem:[%s6200_s1 + $0x60] ss:$12 sps:$4 sm:$0xff]   ;;  %v4361_v20 = vld [vmem:[%s6200_s1 + $0x7c] ss:$12 sps:$4 sm:$0xff]  }
  0x3f   : > { %v444_v1 = vld [vmem:[%s4251_s12] sm:$0xff]  ;;  %637 = vmatprep.subr.bf16.mxu0 %v4296_v10  ;;  %678 = vmatprep.subr.bf16.mxu1 %v4084_v0  ;;  %v3802_v14 = vld [vmem:[%s4251_s12 + $0x8] ss:$0 sps:$4 sm:$0xff]   ;;  %v4387_v24 = vld [vmem:[%s6200_s1 + $0x90] ss:$12 sps:$4 sm:$0xff]   ;;  %s4087_s13 = smov 88  }
  0x40   : > { %v4254_v2 = vcombine.low %v444_v1, %v444_v1  ;;  %v3430_v6 = vcombine.high %v444_v1, %v444_v1  ;;  %v4366_v21 = vld [vmem:[%s6200_s1 + $0x78] ss:$12 sps:$4 sm:$0xff]   ;;  %v4373_v22 = vld [vmem:[%s6200_s1 + $0x80] ss:$12 sps:$4 sm:$0xff]   ;;  %v4405_v28 = vld [vmem:[%s6200_s1 + $0xa8] ss:$12 sps:$4 sm:$0xff]  }
  0x41   : > { %v4380_v23 = vld [vmem:[%s6200_s1 + $0x94] ss:$12 sps:$4 sm:$0xff]   ;;  %v4392_v25 = vld [vmem:[%s6200_s1 + $0x98] ss:$12 sps:$4 sm:$0xff]   ;;  %v4410_v29 = vld [vmem:[%s6200_s1 + $0xb0] ss:$12 sps:$4 sm:$0xff]  }
  0x42   : > { %744 = vrot.lane.b32.xlu0 %v4254_v2, %s4085_s26  ;;  %870 = vrot.lane.b32.xlu1 %v3430_v6, %s6221_s24  ;;  %v4399_v26 = vld [vmem:[%s6200_s1 + $0xac] ss:$12 sps:$4 sm:$0xff]   ;;  %v985_v27 = vld [vmem:[%s4251_s12 + $0x4] sm:$0xff]  ;;  %vm623_vm1 = vcmask 1043456   ;;  %s4089_s14 = smov 104   ;;  %s6222_s15 = smov 48  }
  0x43   : > { %3465 = vmatprep.mubr.msk.bf16.mxu0 %vm619_vm0, %v3430_v6  ;;  %3466 = vmatprep.mubr.msk.bf16.mxu1 %vm619_vm0, %v3430_v6  ;;  %v3477_v30 = vcombine.low %v985_v27, %v985_v27  ;;  %v3478_v31 = vcombine.high %v985_v27, %v985_v27  ;;  %v4415_v32 = vld [vmem:[%s6200_s1 + $0xc4] ss:$12 sps:$4 sm:$0xff]   ;;  %v3833_v33 = vld [vmem:[%s4251_s12 + $0xc] ss:$0 sps:$4 sm:$0xff]   ;;  %v4430_v35 = vld [vmem:[%s6200_s1 + $0xc8] ss:$12 sps:$4 sm:$0xff]  }
  0x44   : > { %638 = vmatpush1.bf16.msra.mxu0 %v4304_v11  ;;  %679 = vmatpush1.bf16.msra.mxu1 %v4312_v12  ;;  %v4425_v34 = vld [vmem:[%s6200_s1 + $0xc0] ss:$12 sps:$4 sm:$0xff]   ;;  %v4437_v36 = vld [vmem:[%s6200_s1 + $0xdc] ss:$12 sps:$4 sm:$0xff]   ;;  %v441_v37 = vld [vmem:[%s6200_s1 + $0xf0] sm:$0xff]  ;;  %vm748_vm2 = vcmask 588800  }
  0x45   : > { %639 = vmatprep.subr.bf16.mxu0 %v4317_v13  ;;  %680 = vmatprep.subr.bf16.mxu1 %v4084_v0  ;;  %v4449_v38 = vld [vmem:[%s6200_s1 + $0xd8] ss:$12 sps:$4 sm:$0xff]   ;;  %v4454_v39 = vld [vmem:[%s6200_s1 + $0xe0] ss:$12 sps:$4 sm:$0xff]   ;;  %v4465_v41 = vcombine.high %v441_v37, %v441_v37  ;;  %v3461_v42 = vcombine.low %v441_v37, %v441_v37  ;;  %vm874_vm3 = vcmask 130048   ;;  %s6220_s22 = smov 120  }
  0x46   : > { %746 = vrot.lane.b32.xlu0 %v3430_v6, %s4085_s26  ;;  %872 = vrot.lane.b32.xlu1 %v3802_v14, %s6221_s24  ;;  %v3830_v40 = vld [vmem:[%s6200_s1 + $0xf8] ss:$0 sps:$4 sm:$0xff]   ;;  %v1232_v45 = vld [vmem:[%s4251_s12 + $0x8] sm:$0xff]  ;;  %s6218_s16 = smov 64   ;;  %s6214_s29 = smov 8   ;;  %vm995_vm4 = vcmask 719872  }
  0x47   : > { %v4473_v43 = vsel %vm623_vm1, %v3461_v42, 0  ;;  %v4477_v44 = vsel %vm623_vm1, %v3830_v40, 0  ;;  %v3489_v46 = vcombine.high %v1232_v45, %v1232_v45  ;;  %v3488_v47 = vcombine.low %v1232_v45, %v1232_v45  ;;  %v1466_v54 = vld [vmem:[%s4251_s12 + $0xc] sm:$0xff]  ;;  %v3838_v60 = vld [vmem:[%s4251_s12 + $0x14] ss:$0 sps:$4 sm:$0xff]   ;;  %s6216_s30 = smov 80  }
  0x48   : > { %640 = vmatpush1.bf16.msra.mxu0 %v4325_v15  ;;  %681 = vmatpush1.bf16.msra.mxu1 %v4335_v16  ;;  %v4565_v55 = vcombine.high %v1466_v54, %v1466_v54  ;;  %v4567_v56 = vcombine.low %v1466_v54, %v1466_v54  ;;  %v1827_v61 = vld [vmem:[%s4251_s12 + $0x10] sm:$0xff]  ;;  %v3841_v1 = vld [vmem:[%s4251_s12 + $0x18] ss:$0 sps:$4 sm:$0xff]   ;;  %vm1121_vm5 = vcmask 261120   ;;  %vm1242_vm6 = vcmask 850944   ;;  %s6253_s12 = smov 24  }
  0x49   : > { %641 = vmatprep.subr.bf16.mxu0 %v4342_v17  ;;  %682 = vmatprep.subr.bf16.mxu1 %v4084_v0  ;;  %v3510_v62 = vcombine.low %v1827_v61, %v1827_v61  ;;  %v3516_v63 = vcombine.high %v1827_v61, %v1827_v61  ;;  %v4739_v45 = vld [vmem:[%s6200_s1 + $0x18] ss:$12 sps:$4 sm:$0xff]   ;;  %vm1356_vm7 = vcmask 392192   ;;  %v4961_v54 = vld [vmem:[%s6200_s1 + $0x90] ss:$12 sps:$4 sm:$0xff]   ;;  %vm1476_vm8 = vcmask 982016  }
  0x4a   : > { %868 = vrot.lane.b32.xlu0 %v4254_v2, %s6221_s24  ;;  %991 = vrot.lane.b32.xlu1 %v3477_v30, %s4087_s13  ;;  %s4096_s24 = smov 56   ;;  %v5005_v61 = vld [vmem:[%s6200_s1 + $0xc8] ss:$12 sps:$4 sm:$0xff]   ;;  %vm1590_vm9 = vcmask 523264   ;;  %vm1716_vm10 = vcmask 64512   ;;  %vm1837_vm11 = vcmask 654336  }
  0x4b   : > { %vm1963_vm12 = vcmask 195584   ;;  %vm720_vm13 = vcmask 457728   ;;  %vm2585_vm14 = vcmask 916480   ;;  %vm2700_vm15 = vcmask 785408   ;;  %p6260_p9 = scmp.ne.s32.totalorder %s6234_s27, 0 }
  0x4c   : > { %642 = vmatpush1.bf16.msra.mxu0 %v4349_v18  ;;  %683 = vmatpush1.bf16.msra.mxu1 %v4354_v19 }
  0x4d   : > { %643 = vmatprep.subr.bf16.mxu0 %v4361_v20  ;;  %684 = vmatprep.subr.bf16.mxu1 %v4084_v0 }
  0x4e   : > { %993 = vrot.lane.b32.xlu0 %v3478_v31, %s4087_s13  ;;  %1117 = vrot.lane.b32.xlu1 %v3478_v31, %s4088_s25 }
  0x50   : > { %644 = vmatpush1.bf16.msra.mxu0 %v4366_v21  ;;  %685 = vmatpush1.bf16.msra.mxu1 %v4373_v22 }
  0x51   : > { %645 = vmatprep.subr.bf16.mxu0 %v4380_v23  ;;  %686 = vmatprep.subr.bf16.mxu1 %v4084_v0 }
  0x52   : > { %1119 = vrot.lane.b32.xlu0 %v3833_v33, %s4088_s25  ;;  %1115 = vrot.lane.b32.xlu1 %v3477_v30, %s4088_s25  ;;  %v4722_v33 = vld [vmem:[%s6200_s1] ss:$12 sps:$4 sm:$0xff]  }
  0x54   : > { %646 = vmatpush1.bf16.msra.mxu0 %v4387_v24  ;;  %687 = vmatpush1.bf16.msra.mxu1 %v4392_v25 }
  0x55   : > { %647 = vmatprep.subr.bf16.mxu0 %v4399_v26  ;;  %688 = vmatprep.subr.bf16.mxu1 %v4084_v0 }
  0x56   : > { %1240 = vrot.lane.b32.xlu1 %v3489_v46, %s4089_s14  ;;  %1238 = vrot.lane.b32.xlu0 %v3488_v47, %s4089_s14 }
  0x58   : > { %648 = vmatpush1.bf16.msra.mxu0 %v4405_v28  ;;  %689 = vmatpush1.bf16.msra.mxu1 %v4410_v29 }
  0x59   : > { %649 = vmatprep.subr.bf16.mxu0 %v4415_v32  ;;  %690 = vmatprep.subr.bf16.mxu1 %v4084_v0 }
  0x5a   : > { %1354 = vrot.lane.b32.xlu1 %v3489_v46, %s6222_s15  ;;  %1352 = vrot.lane.b32.xlu0 %v3488_v47, %s6222_s15  ;;  %s4097_s15 = smov 112  }
  0x5c   : > { %650 = vmatpush1.bf16.msra.mxu0 %v4425_v34  ;;  %691 = vmatpush1.bf16.msra.mxu1 %v4430_v35 }
  0x5d   : > { %651 = vmatprep.subr.bf16.mxu0 %v4437_v36  ;;  %692 = vmatprep.subr.bf16.mxu1 %v4084_v0 }
  0x5e   : > { %1474 = vrot.lane.b32.xlu1 %v4565_v55, %s6220_s22  ;;  %1472 = vrot.lane.b32.xlu0 %v4567_v56, %s6220_s22 }
  0x60   : > { %652 = vmatpush1.bf16.msra.mxu0 %v4449_v38  ;;  %693 = vmatpush1.bf16.msra.mxu1 %v4454_v39 }
  0x61   : > { %3464 = vmatprep.subr.msk.bf16.mxu0 %vm623_vm1, %v4465_v41  ;;  %694 = vmatprep.subr.bf16.mxu1 %v4084_v0 }
  0x62   : > { %1588 = vrot.lane.b32.xlu1 %v4565_v55, %s6218_s16  ;;  %1586 = vrot.lane.b32.xlu0 %v4567_v56, %s6218_s16 }
  0x64   : > { %654 = vmatpush1.bf16.msra.mxu0 %v4473_v43  ;;  %695 = vmatpush1.bf16.msra.mxu1 %v4477_v44 }
  0x65   : > { %754 = vmatprep.subr.bf16.mxu0 %v4259_v3  ;;  %795 = vmatprep.subr.bf16.mxu1 %v4084_v0 }
  0x66   : > { %1712 = vrot.lane.b32.xlu0 %v4565_v55, %s6214_s29  ;;  %1714 = vrot.lane.b32.xlu1 %v3838_v60, %s6214_s29  ;;  %v4967_v55 = vld [vmem:[%s6200_s1 + $0x98] ss:$12 sps:$4 sm:$0xff]   ;;  %v4999_v60 = vld [vmem:[%s6200_s1 + $0xc0] ss:$12 sps:$4 sm:$0xff]  }
  0x67   : > { %666 = vmatmul.mubr.bf16.vlgmr.msra.gmra.mrb[0].mxu0 %v4254_v2  ;;  %707 = vmatmul.mubr.bf16.vlgmr.msra.gmra.mrb[0].mxu1 %v4254_v2 }
  0x68   : > { %755 = vmatpush1.bf16.msra.mxu0 %v4264_v4  ;;  %796 = vmatpush1.bf16.msra.mxu1 %v4269_v5 }
  0x69   : > { %756 = vmatprep.subr.bf16.mxu0 %v4277_v7  ;;  %797 = vmatprep.subr.bf16.mxu1 %v4084_v0 }
  0x6a   : > { %1710 = vrot.lane.b32.xlu0 %v4567_v56, %s6214_s29  ;;  %1833 = vrot.lane.b32.xlu1 %v3510_v62, %s6216_s30  ;;  %s6215_s29 = smov 24   ;;  %v4973_v56 = vld [vmem:[%s6200_s1 + $0xac] ss:$12 sps:$4 sm:$0xff]  }
  0x6c   : > { %757 = vmatpush1.bf16.msra.mxu0 %v4282_v8  ;;  %798 = vmatpush1.bf16.msra.mxu1 %v4289_v9 }
  0x6d   : > { %758 = vmatprep.subr.bf16.mxu0 %v4296_v10  ;;  %799 = vmatprep.subr.bf16.mxu1 %v4084_v0 }
  0x6e   : > { %1835 = vrot.lane.b32.xlu0 %v3516_v63, %s6216_s30  ;;  %1959 = vrot.lane.b32.xlu1 %v3516_v63, %s6215_s29  ;;  %s6252_s30 = smov 80  }
  0x70   : > { %759 = vmatpush1.bf16.msra.mxu0 %v4304_v11  ;;  %800 = vmatpush1.bf16.msra.mxu1 %v4312_v12 }
  0x71   : > { %760 = vmatprep.subr.bf16.mxu0 %v4317_v13  ;;  %801 = vmatprep.subr.bf16.mxu1 %v4084_v0 }
  0x72   : > { %1957 = vrot.lane.b32.xlu1 %v3510_v62, %s6215_s29  ;;  %1961 = vrot.lane.b32.xlu0 %v3841_v1, %s6215_s29  ;;  %v5012_v62 = vld [vmem:[%s6200_s1 + $0xdc] ss:$12 sps:$4 sm:$0xff]   ;;  %s4098_s29 = smov 96  }
  0x74   : > { %761 = vmatpush1.bf16.msra.mxu0 %v4325_v15  ;;  %802 = vmatpush1.bf16.msra.mxu1 %v4335_v16 }
  0x75   : > { %762 = vmatprep.subr.bf16.mxu0 %v4342_v17  ;;  %803 = vmatprep.subr.bf16.mxu1 %v4084_v0 }
  0x78   : > { %763 = vmatpush1.bf16.msra.mxu0 %v4349_v18  ;;  %804 = vmatpush1.bf16.msra.mxu1 %v4354_v19 }
  0x79   : > { %764 = vmatprep.subr.bf16.mxu0 %v4361_v20  ;;  %805 = vmatprep.subr.bf16.mxu1 %v4084_v0 }
  0x7c   : > { %765 = vmatpush1.bf16.msra.mxu0 %v4366_v21  ;;  %806 = vmatpush1.bf16.msra.mxu1 %v4373_v22 }
  0x7d   : > { %766 = vmatprep.subr.bf16.mxu0 %v4380_v23  ;;  %807 = vmatprep.subr.bf16.mxu1 %v4084_v0 }
  0x80   : > { %767 = vmatpush1.bf16.msra.mxu0 %v4387_v24  ;;  %808 = vmatpush1.bf16.msra.mxu1 %v4392_v25 }
  0x81   : > { %768 = vmatprep.subr.bf16.mxu0 %v4399_v26  ;;  %809 = vmatprep.subr.bf16.mxu1 %v4084_v0 }
  0x84   : > { %769 = vmatpush1.bf16.msra.mxu0 %v4405_v28  ;;  %810 = vmatpush1.bf16.msra.mxu1 %v4410_v29 }
  0x85   : > { %770 = vmatprep.subr.bf16.mxu0 %v4415_v32  ;;  %811 = vmatprep.subr.bf16.mxu1 %v4084_v0 }
  0x88   : > { %771 = vmatpush1.bf16.msra.mxu0 %v4425_v34  ;;  %812 = vmatpush1.bf16.msra.mxu1 %v4430_v35 }
  0x89   : > { %772 = vmatprep.subr.bf16.mxu0 %v4437_v36  ;;  %813 = vmatprep.subr.bf16.mxu1 %v4084_v0 }
  0x8c   : > { %773 = vmatpush1.bf16.msra.mxu0 %v4449_v38  ;;  %814 = vmatpush1.bf16.msra.mxu1 %v4454_v39 }
  0x8d   : > { %3468 = vmatprep.subr.msk.bf16.mxu0 %vm623_vm1, %v4465_v41  ;;  %815 = vmatprep.subr.bf16.mxu1 %v4084_v0 }
  0x90   : > { %775 = vmatpush1.bf16.msra.mxu0 %v4473_v43  ;;  %816 = vmatpush1.bf16.msra.mxu1 %v4477_v44 }
  0x91   : > { %881 = vmatprep.subr.bf16.mxu0 %v4259_v3  ;;  %922 = vmatprep.subr.bf16.mxu1 %v4084_v0 }
  0xb4   : > { %v745_v48 = vpop.permute.xlu0 %744  ;;  %v4535_v49 = vpop.permute.xlu1 %870 }
  0xb8   : > { %v747_v50 = vpop.permute.xlu0 %746  ;;  %v873_v52 = vpop.permute.xlu1 %872 }
  0xb9   : > { %3469 = vmatprep.mubr.msk.bf16.mxu0 %vm619_vm0, %v747_v50  ;;  %3470 = vmatprep.mubr.msk.bf16.mxu1 %vm619_vm0, %v747_v50  ;;  %v749_v51 = vsel %vm748_vm2, %v745_v48, %v747_v50  ;;  %v876_v53 = vsel %vm874_vm3, %v4535_v49, %v873_v52  ;;  %v4863_v48 = vld [vmem:[%s6200_s1 + $0x60] ss:$12 sps:$4 sm:$0xff]   ;;  %v4875_v50 = vld [vmem:[%s6200_s1 + $0x7c] ss:$12 sps:$4 sm:$0xff]  }
  0xba   : > { %787 = vmatmul.mubr.bf16.vlgmr.msra.gmra.mrb[4].mxu0 %v749_v51  ;;  %828 = vmatmul.mubr.bf16.vlgmr.msra.gmra.mrb[4].mxu1 %v749_v51  ;;  %v4882_v51 = vld [vmem:[%s6200_s1 + $0x78] ss:$12 sps:$4 sm:$0xff]   ;;  %v4888_v52 = vld [vmem:[%s6200_s1 + $0x80] ss:$12 sps:$4 sm:$0xff]  }
  0xbb   : > { %882 = vmatpush1.bf16.msra.mxu0 %v4264_v4  ;;  %923 = vmatpush1.bf16.msra.mxu1 %v4269_v5 }
  0xbc   : > { %883 = vmatprep.subr.bf16.mxu0 %v4277_v7  ;;  %924 = vmatprep.subr.bf16.mxu1 %v4084_v0  ;;  %v869_v57 = vpop.permute.xlu0 %868  ;;  %v992_v2 = vpop.permute.xlu1 %991 }
  0xbd   : > { %3475 = vmatprep.mubr.msk.bf16.mxu0 %vm619_vm0, %v876_v53  ;;  %3476 = vmatprep.mubr.msk.bf16.mxu1 %vm619_vm0, %v876_v53  ;;  %v875_v58 = vsel %vm874_vm3, %v869_v57, %v4535_v49  ;;  %v4869_v49 = vld [vmem:[%s6200_s1 + $0x68] ss:$12 sps:$4 sm:$0xff]  }
  0xbe   : > { %v4894_v53 = vld [vmem:[%s6200_s1 + $0x94] ss:$12 sps:$4 sm:$0xff]  }
  0xbf   : > { %884 = vmatpush1.bf16.msra.mxu0 %v4282_v8  ;;  %925 = vmatpush1.bf16.msra.mxu1 %v4289_v9  ;;  %v4980_v57 = vld [vmem:[%s6200_s1 + $0xa8] ss:$12 sps:$4 sm:$0xff]  }
  0xc0   : > { %885 = vmatprep.subr.bf16.mxu0 %v4296_v10  ;;  %926 = vmatprep.subr.bf16.mxu1 %v4084_v0  ;;  %v4600_v59 = vpop.permute.xlu0 %993  ;;  %v1118_v27 = vpop.permute.xlu1 %1117 }
  0xc1   : > { %v996_v6 = vsel %vm995_vm4, %v992_v2, %v4600_v59 }
  0xc3   : > { %886 = vmatpush1.bf16.msra.mxu0 %v4304_v11  ;;  %927 = vmatpush1.bf16.msra.mxu1 %v4312_v12 }
  0xc4   : > { %887 = vmatprep.subr.bf16.mxu0 %v4317_v13  ;;  %928 = vmatprep.subr.bf16.mxu1 %v4084_v0  ;;  %v1120_v14 = vpop.permute.xlu0 %1119 }
  0xc5   : > { %v1123_v30 = vsel %vm1121_vm5, %v1118_v27, %v1120_v14 }
  0xc7   : > { %888 = vmatpush1.bf16.msra.mxu0 %v4325_v15  ;;  %929 = vmatpush1.bf16.msra.mxu1 %v4335_v16 }
  0xc8   : > { %889 = vmatprep.subr.bf16.mxu0 %v4342_v17  ;;  %930 = vmatprep.subr.bf16.mxu1 %v4084_v0 }
  0xcb   : > { %890 = vmatpush1.bf16.msra.mxu0 %v4349_v18  ;;  %931 = vmatpush1.bf16.msra.mxu1 %v4354_v19 }
  0xcc   : > { %891 = vmatprep.subr.bf16.mxu0 %v4361_v20  ;;  %932 = vmatprep.subr.bf16.mxu1 %v4084_v0 }
  0xcf   : > { %892 = vmatpush1.bf16.msra.mxu0 %v4366_v21  ;;  %933 = vmatpush1.bf16.msra.mxu1 %v4373_v22 }
  0xd0   : > { %893 = vmatprep.subr.bf16.mxu0 %v4380_v23  ;;  %934 = vmatprep.subr.bf16.mxu1 %v4084_v0 }
  0xd3   : > { %894 = vmatpush1.bf16.msra.mxu0 %v4387_v24  ;;  %935 = vmatpush1.bf16.msra.mxu1 %v4392_v25 }
  0xd4   : > { %895 = vmatprep.subr.bf16.mxu0 %v4399_v26  ;;  %936 = vmatprep.subr.bf16.mxu1 %v4084_v0 }
  0xd7   : > { %896 = vmatpush1.bf16.msra.mxu0 %v4405_v28  ;;  %937 = vmatpush1.bf16.msra.mxu1 %v4410_v29 }
  0xd8   : > { %897 = vmatprep.subr.bf16.mxu0 %v4415_v32  ;;  %938 = vmatprep.subr.bf16.mxu1 %v4084_v0 }
  0xdb   : > { %898 = vmatpush1.bf16.msra.mxu0 %v4425_v34  ;;  %939 = vmatpush1.bf16.msra.mxu1 %v4430_v35 }
  0xdc   : > { %899 = vmatprep.subr.bf16.mxu0 %v4437_v36  ;;  %940 = vmatprep.subr.bf16.mxu1 %v4084_v0 }
  0xdf   : > { %900 = vmatpush1.bf16.msra.mxu0 %v4449_v38  ;;  %941 = vmatpush1.bf16.msra.mxu1 %v4454_v39 }
  0xe0   : > { %3474 = vmatprep.subr.msk.bf16.mxu0 %vm623_vm1, %v4465_v41  ;;  %942 = vmatprep.subr.bf16.mxu1 %v4084_v0 }
  0xe3   : > { %902 = vmatpush1.bf16.msra.mxu0 %v4473_v43  ;;  %943 = vmatpush1.bf16.msra.mxu1 %v4477_v44 }
  0xe4   : > { %1001 = vmatprep.subr.bf16.mxu0 %v4259_v3  ;;  %1042 = vmatprep.subr.bf16.mxu1 %v4084_v0 }
  0xe6   : > { %914 = vmatmul.mubr.bf16.vlgmr.msra.gmra.mrb[8].mxu0 %v875_v58  ;;  %955 = vmatmul.mubr.bf16.vlgmr.msra.gmra.mrb[8].mxu1 %v875_v58  ;;  %v4986_v58 = vld [vmem:[%s6200_s1 + $0xb0] ss:$12 sps:$4 sm:$0xff]  }
  0xe7   : > { %1002 = vmatpush1.bf16.msra.mxu0 %v4264_v4  ;;  %1043 = vmatpush1.bf16.msra.mxu1 %v4269_v5 }
  0xe8   : > { %1003 = vmatprep.subr.bf16.mxu0 %v4277_v7  ;;  %1044 = vmatprep.subr.bf16.mxu1 %v4084_v0 }
  0xe9   : > { %3480 = vmatprep.mubr.msk.bf16.mxu0 %vm619_vm0, %v4600_v59  ;;  %3481 = vmatprep.mubr.msk.bf16.mxu1 %vm619_vm0, %v4600_v59  ;;  %v4992_v59 = vld [vmem:[%s6200_s1 + $0xc4] ss:$12 sps:$4 sm:$0xff]  }
  0xeb   : > { %1004 = vmatpush1.bf16.msra.mxu0 %v4282_v8  ;;  %1045 = vmatpush1.bf16.msra.mxu1 %v4289_v9 }
  0xec   : > { %1005 = vmatprep.subr.bf16.mxu0 %v4296_v10  ;;  %1046 = vmatprep.subr.bf16.mxu1 %v4084_v0 }
  0xef   : > { %1006 = vmatpush1.bf16.msra.mxu0 %v4304_v11  ;;  %1047 = vmatpush1.bf16.msra.mxu1 %v4312_v12 }
  0xf0   : > { %1007 = vmatprep.subr.bf16.mxu0 %v4317_v13  ;;  %1048 = vmatprep.subr.bf16.mxu1 %v4084_v0 }
  0xf3   : > { %1008 = vmatpush1.bf16.msra.mxu0 %v4325_v15  ;;  %1049 = vmatpush1.bf16.msra.mxu1 %v4335_v16 }
  0xf4   : > { %1009 = vmatprep.subr.bf16.mxu0 %v4342_v17  ;;  %1050 = vmatprep.subr.bf16.mxu1 %v4084_v0 }
  0xf7   : > { %1010 = vmatpush1.bf16.msra.mxu0 %v4349_v18  ;;  %1051 = vmatpush1.bf16.msra.mxu1 %v4354_v19 }
  0xf8   : > { %1011 = vmatprep.subr.bf16.mxu0 %v4361_v20  ;;  %1052 = vmatprep.subr.bf16.mxu1 %v4084_v0 }
  0xfb   : > { %1012 = vmatpush1.bf16.msra.mxu0 %v4366_v21  ;;  %1053 = vmatpush1.bf16.msra.mxu1 %v4373_v22 }
  0xfc   : > { %1013 = vmatprep.subr.bf16.mxu0 %v4380_v23  ;;  %1054 = vmatprep.subr.bf16.mxu1 %v4084_v0 }
  0xff   : > { %1014 = vmatpush1.bf16.msra.mxu0 %v4387_v24  ;;  %1055 = vmatpush1.bf16.msra.mxu1 %v4392_v25 }
 0x100   : > { %1015 = vmatprep.subr.bf16.mxu0 %v4399_v26  ;;  %1056 = vmatprep.subr.bf16.mxu1 %v4084_v0 }
 0x103   : > { %1016 = vmatpush1.bf16.msra.mxu0 %v4405_v28  ;;  %1057 = vmatpush1.bf16.msra.mxu1 %v4410_v29 }
 0x104   : > { %1017 = vmatprep.subr.bf16.mxu0 %v4415_v32  ;;  %1058 = vmatprep.subr.bf16.mxu1 %v4084_v0 }
 0x107   : > { %1018 = vmatpush1.bf16.msra.mxu0 %v4425_v34  ;;  %1059 = vmatpush1.bf16.msra.mxu1 %v4430_v35 }
 0x108   : > { %1019 = vmatprep.subr.bf16.mxu0 %v4437_v36  ;;  %1060 = vmatprep.subr.bf16.mxu1 %v4084_v0 }
 0x10b   : > { %1020 = vmatpush1.bf16.msra.mxu0 %v4449_v38  ;;  %1061 = vmatpush1.bf16.msra.mxu1 %v4454_v39 }
 0x10c   : > { %3479 = vmatprep.subr.msk.bf16.mxu0 %vm623_vm1, %v4465_v41  ;;  %1062 = vmatprep.subr.bf16.mxu1 %v4084_v0 }
 0x10f   : > { %1022 = vmatpush1.bf16.msra.mxu0 %v4473_v43  ;;  %1063 = vmatpush1.bf16.msra.mxu1 %v4477_v44 }
 0x110   : > { %1128 = vmatprep.subr.bf16.mxu0 %v4259_v3  ;;  %1169 = vmatprep.subr.bf16.mxu1 %v4084_v0 }
 0x112   : > { %1034 = vmatmul.mubr.bf16.vlgmr.msra.gmra.mrb[12].mxu0 %v996_v6  ;;  %1075 = vmatmul.mubr.bf16.vlgmr.msra.gmra.mrb[12].mxu1 %v996_v6 }
 0x113   : > { %1129 = vmatpush1.bf16.msra.mxu0 %v4264_v4  ;;  %1170 = vmatpush1.bf16.msra.mxu1 %v4269_v5  ;;  %v1116_v4 = vpop.permute.xlu1 %1115 }
 0x114   : > { %1130 = vmatprep.subr.bf16.mxu0 %v4277_v7  ;;  %1171 = vmatprep.subr.bf16.mxu1 %v4084_v0 }
 0x115   : > { %3486 = vmatprep.mubr.msk.bf16.mxu0 %vm619_vm0, %v1123_v30  ;;  %3487 = vmatprep.mubr.msk.bf16.mxu1 %vm619_vm0, %v1123_v30  ;;  %v5023_v30 = vld [vmem:[%s6200_s1 + $0xd8] ss:$12 sps:$4 sm:$0xff]  }
 0x117   : > { %1131 = vmatpush1.bf16.msra.mxu0 %v4282_v8  ;;  %1172 = vmatpush1.bf16.msra.mxu1 %v4289_v9  ;;  %v1122_v8 = vsel %vm1121_vm5, %v1116_v4, %v1118_v27  ;;  %v1241_v31 = vpop.permute.xlu1 %1240  ;;  %v5029_v4 = vld [vmem:[%s6200_s1 + $0xe0] ss:$12 sps:$4 sm:$0xff]  }
 0x118   : > { %1132 = vmatprep.subr.bf16.mxu0 %v4296_v10  ;;  %1173 = vmatprep.subr.bf16.mxu1 %v4084_v0 }
 0x11b   : > { %1133 = vmatpush1.bf16.msra.mxu0 %v4304_v11  ;;  %1174 = vmatpush1.bf16.msra.mxu1 %v4312_v12 }
 0x11c   : > { %1134 = vmatprep.subr.bf16.mxu0 %v4317_v13  ;;  %1175 = vmatprep.subr.bf16.mxu1 %v4084_v0 }
 0x11f   : > { %1135 = vmatpush1.bf16.msra.mxu0 %v4325_v15  ;;  %1176 = vmatpush1.bf16.msra.mxu1 %v4335_v16 }
 0x120   : > { %1136 = vmatprep.subr.bf16.mxu0 %v4342_v17  ;;  %1177 = vmatprep.subr.bf16.mxu1 %v4084_v0 }
 0x123   : > { %1137 = vmatpush1.bf16.msra.mxu0 %v4349_v18  ;;  %1178 = vmatpush1.bf16.msra.mxu1 %v4354_v19 }
 0x124   : > { %1138 = vmatprep.subr.bf16.mxu0 %v4361_v20  ;;  %1179 = vmatprep.subr.bf16.mxu1 %v4084_v0 }
 0x127   : > { %1139 = vmatpush1.bf16.msra.mxu0 %v4366_v21  ;;  %1180 = vmatpush1.bf16.msra.mxu1 %v4373_v22 }
 0x128   : > { %1140 = vmatprep.subr.bf16.mxu0 %v4380_v23  ;;  %1181 = vmatprep.subr.bf16.mxu1 %v4084_v0 }
 0x12b   : > { %1141 = vmatpush1.bf16.msra.mxu0 %v4387_v24  ;;  %1182 = vmatpush1.bf16.msra.mxu1 %v4392_v25 }
 0x12c   : > { %1142 = vmatprep.subr.bf16.mxu0 %v4399_v26  ;;  %1183 = vmatprep.subr.bf16.mxu1 %v4084_v0 }
 0x12f   : > { %1143 = vmatpush1.bf16.msra.mxu0 %v4405_v28  ;;  %1184 = vmatpush1.bf16.msra.mxu1 %v4410_v29 }
 0x130   : > { %1144 = vmatprep.subr.bf16.mxu0 %v4415_v32  ;;  %1185 = vmatprep.subr.bf16.mxu1 %v4084_v0 }
 0x133   : > { %1145 = vmatpush1.bf16.msra.mxu0 %v4425_v34  ;;  %1186 = vmatpush1.bf16.msra.mxu1 %v4430_v35 }
 0x134   : > { %1146 = vmatprep.subr.bf16.mxu0 %v4437_v36  ;;  %1187 = vmatprep.subr.bf16.mxu1 %v4084_v0 }
 0x137   : > { %1147 = vmatpush1.bf16.msra.mxu0 %v4449_v38  ;;  %1188 = vmatpush1.bf16.msra.mxu1 %v4454_v39 }
 0x138   : > { %3485 = vmatprep.subr.msk.bf16.mxu0 %vm623_vm1, %v4465_v41  ;;  %1189 = vmatprep.subr.bf16.mxu1 %v4084_v0 }
 0x13a   : > { %v4730_v37 = vpop.f32.mrb[0].mxu1 }
 0x13b   : > { %1149 = vmatpush1.bf16.msra.mxu0 %v4473_v43  ;;  %1190 = vmatpush1.bf16.msra.mxu1 %v4477_v44  ;;  %v710_v42 = vpop.f32.mrb[1].mxu1 }
 0x13c   : > { %1248 = vmatprep.subr.bf16.mxu0 %v4259_v3  ;;  %1289 = vmatprep.subr.bf16.mxu1 %v4084_v0  ;;  %v4728_v3 = vpop.f32.mrb[0].mxu0 }
 0x13d   : > { %v4734_v40 = vpop.f32.mrb[1].mxu0 }
 0x13e   : > { %1161 = vmatmul.mubr.bf16.vlgmr.msra.gmra.mrb[16].mxu0 %v1122_v8  ;;  %1202 = vmatmul.mubr.bf16.vlgmr.msra.gmra.mrb[16].mxu1 %v1122_v8 }
 0x13f   : > { %1249 = vmatpush1.bf16.msra.mxu0 %v4722_v33  ;;  %1290 = vmatpush1.bf16.msra.mxu1 %v4269_v5  ;;  %v671_v5 = vpop.f32.mrb[2].mxu0 }
 0x140   : > { %1250 = vmatprep.subr.bf16.mxu0 %v4277_v7  ;;  %1291 = vmatprep.subr.bf16.mxu1 %v4084_v0  ;;  %v711_v7 = vpop.f32.mrb[2].mxu1  ;;  %v672_v46 = vpop.f32.mrb[3].mxu0 }
 0x141   : > { %3491 = vmatprep.mubr.msk.bf16.mxu0 %vm619_vm0, %v1241_v31  ;;  %3492 = vmatprep.mubr.msk.bf16.mxu1 %vm619_vm0, %v1241_v31  ;;  %v712_v47 = vpop.f32.mrb[3].mxu1 }
 0x143   : > { %1251 = vmatpush1.bf16.msra.mxu0 %v4739_v45  ;;  %1292 = vmatpush1.bf16.msra.mxu1 %v4289_v9  ;;  %v1239_v9 = vpop.permute.xlu0 %1238 }
 0x144   : > { %1252 = vmatprep.subr.bf16.mxu0 %v4296_v10  ;;  %1293 = vmatprep.subr.bf16.mxu1 %v4084_v0  ;;  %v1243_v10 = vsel %vm1242_vm6, %v1239_v9, %v1241_v31 }
 0x147   : > { %1253 = vmatpush1.bf16.msra.mxu0 %v4304_v11  ;;  %1294 = vmatpush1.bf16.msra.mxu1 %v4312_v12  ;;  %v4784_v11 = vld [vmem:[%s6200_s1 + $0x4] ss:$12 sps:$4 sm:$0xff]   ;;  %v4788_v12 = vpop.permute.xlu1 %1354 }
 0x148   : > { %1254 = vmatprep.subr.bf16.mxu0 %v4317_v13  ;;  %1295 = vmatprep.subr.bf16.mxu1 %v4084_v0  ;;  %v4794_v13 = vld [vmem:[%s6200_s1 + $0x8] ss:$12 sps:$4 sm:$0xff]  }
 0x14b   : > { %1255 = vmatpush1.bf16.msra.mxu0 %v4325_v15  ;;  %1296 = vmatpush1.bf16.msra.mxu1 %v4335_v16  ;;  %v4800_v15 = vld [vmem:[%s6200_s1 + $0x1c] ss:$12 sps:$4 sm:$0xff]   ;;  %v4812_v16 = vld [vmem:[%s6200_s1 + $0x20] ss:$12 sps:$4 sm:$0xff]  }
 0x14c   : > { %1256 = vmatprep.subr.bf16.mxu0 %v4342_v17  ;;  %1297 = vmatprep.subr.bf16.mxu1 %v4084_v0  ;;  %v4818_v17 = vld [vmem:[%s6200_s1 + $0x34] ss:$12 sps:$4 sm:$0xff]  }
 0x14f   : > { %1257 = vmatpush1.bf16.msra.mxu0 %v4349_v18  ;;  %1298 = vmatpush1.bf16.msra.mxu1 %v4354_v19  ;;  %v4825_v18 = vld [vmem:[%s6200_s1 + $0x30] ss:$12 sps:$4 sm:$0xff]   ;;  %v4831_v19 = vld [vmem:[%s6200_s1 + $0x38] ss:$12 sps:$4 sm:$0xff]  }
 0x150   : > { %1258 = vmatprep.subr.bf16.mxu0 %v4361_v20  ;;  %1299 = vmatprep.subr.bf16.mxu1 %v4084_v0  ;;  %v4837_v20 = vld [vmem:[%s6200_s1 + $0x4c] ss:$12 sps:$4 sm:$0xff]  }
 0x153   : > { %1259 = vmatpush1.bf16.msra.mxu0 %v4366_v21  ;;  %1300 = vmatpush1.bf16.msra.mxu1 %v4373_v22  ;;  %v4844_v21 = vld [vmem:[%s6200_s1 + $0x48] ss:$12 sps:$4 sm:$0xff]   ;;  %v4850_v22 = vld [vmem:[%s6200_s1 + $0x50] ss:$12 sps:$4 sm:$0xff]  }
 0x154   : > { %1260 = vmatprep.subr.bf16.mxu0 %v4380_v23  ;;  %1301 = vmatprep.subr.bf16.mxu1 %v4084_v0  ;;  %v4856_v23 = vld [vmem:[%s6200_s1 + $0x64] ss:$12 sps:$4 sm:$0xff]  }
 0x157   : > { %1261 = vmatpush1.bf16.msra.mxu0 %v4387_v24  ;;  %1302 = vmatpush1.bf16.msra.mxu1 %v4392_v25 }
 0x158   : > { %1262 = vmatprep.subr.bf16.mxu0 %v4399_v26  ;;  %1303 = vmatprep.subr.bf16.mxu1 %v4084_v0 }
 0x15b   : > { %1263 = vmatpush1.bf16.msra.mxu0 %v4405_v28  ;;  %1304 = vmatpush1.bf16.msra.mxu1 %v4410_v29 }
 0x15c   : > { %1264 = vmatprep.subr.bf16.mxu0 %v4415_v32  ;;  %1305 = vmatprep.subr.bf16.mxu1 %v4084_v0 }
 0x15f   : > { %1265 = vmatpush1.bf16.msra.mxu0 %v4425_v34  ;;  %1306 = vmatpush1.bf16.msra.mxu1 %v4430_v35 }
 0x160   : > { %1266 = vmatprep.subr.bf16.mxu0 %v4437_v36  ;;  %1307 = vmatprep.subr.bf16.mxu1 %v4084_v0 }
 0x163   : > { %1267 = vmatpush1.bf16.msra.mxu0 %v4449_v38  ;;  %1308 = vmatpush1.bf16.msra.mxu1 %v4454_v39 }
 0x164   : > { %3490 = vmatprep.subr.msk.bf16.mxu0 %vm623_vm1, %v4465_v41  ;;  %1309 = vmatprep.subr.bf16.mxu1 %v4084_v0 }
 0x167   : > { %1269 = vmatpush1.bf16.msra.mxu0 %v4473_v43  ;;  %1310 = vmatpush1.bf16.msra.mxu1 %v4477_v44 }
 0x168   : > { %1362 = vmatprep.subr.bf16.mxu0 %v4784_v11  ;;  %1403 = vmatprep.subr.bf16.mxu1 %v4084_v0 }
 0x16a   : > { %1281 = vmatmul.mubr.bf16.vlgmr.msra.gmra.mrb[20].mxu0 %v1243_v10  ;;  %1322 = vmatmul.mubr.bf16.vlgmr.msra.gmra.mrb[20].mxu1 %v1243_v10 }
 0x16b   : > { %1363 = vmatpush1.bf16.msra.mxu0 %v4722_v33  ;;  %1404 = vmatpush1.bf16.msra.mxu1 %v4794_v13 }
 0x16c   : > { %1364 = vmatprep.subr.bf16.mxu0 %v4800_v15  ;;  %1405 = vmatprep.subr.bf16.mxu1 %v4084_v0 }
 0x16d   : > { %3494 = vmatprep.mubr.msk.bf16.mxu0 %vm619_vm0, %v4788_v12  ;;  %3495 = vmatprep.mubr.msk.bf16.mxu1 %vm619_vm0, %v4788_v12 }
 0x16f   : > { %1365 = vmatpush1.bf16.msra.mxu0 %v4739_v45  ;;  %1406 = vmatpush1.bf16.msra.mxu1 %v4812_v16 }
 0x170   : > { %1366 = vmatprep.subr.bf16.mxu0 %v4818_v17  ;;  %1407 = vmatprep.subr.bf16.mxu1 %v4084_v0 }
 0x173   : > { %1367 = vmatpush1.bf16.msra.mxu0 %v4825_v18  ;;  %1408 = vmatpush1.bf16.msra.mxu1 %v4831_v19 }
 0x174   : > { %1368 = vmatprep.subr.bf16.mxu0 %v4837_v20  ;;  %1409 = vmatprep.subr.bf16.mxu1 %v4084_v0 }
 0x177   : > { %1369 = vmatpush1.bf16.msra.mxu0 %v4844_v21  ;;  %1410 = vmatpush1.bf16.msra.mxu1 %v4850_v22 }
 0x178   : > { %1370 = vmatprep.subr.bf16.mxu0 %v4856_v23  ;;  %1411 = vmatprep.subr.bf16.mxu1 %v4084_v0 }
 0x17b   : > { %1371 = vmatpush1.bf16.msra.mxu0 %v4863_v48  ;;  %1412 = vmatpush1.bf16.msra.mxu1 %v4869_v49 }
 0x17c   : > { %1372 = vmatprep.subr.bf16.mxu0 %v4875_v50  ;;  %1413 = vmatprep.subr.bf16.mxu1 %v4084_v0 }
 0x17f   : > { %1373 = vmatpush1.bf16.msra.mxu0 %v4882_v51  ;;  %1414 = vmatpush1.bf16.msra.mxu1 %v4888_v52 }
 0x180   : > { %1374 = vmatprep.subr.bf16.mxu0 %v4894_v53  ;;  %1415 = vmatprep.subr.bf16.mxu1 %v4084_v0 }
 0x183   : > { %1375 = vmatpush1.bf16.msra.mxu0 %v4387_v24  ;;  %1416 = vmatpush1.bf16.msra.mxu1 %v4392_v25  ;;  %v1353_v24 = vpop.permute.xlu0 %1352 }
 0x184   : > { %1376 = vmatprep.subr.bf16.mxu0 %v4399_v26  ;;  %1417 = vmatprep.subr.bf16.mxu1 %v4084_v0 }
 0x187   : > { %1377 = vmatpush1.bf16.msra.mxu0 %v4405_v28  ;;  %1418 = vmatpush1.bf16.msra.mxu1 %v4410_v29  ;;  %v1473_v63 = vpop.permute.xlu0 %1472 }
 0x188   : > { %1378 = vmatprep.subr.bf16.mxu0 %v4415_v32  ;;  %1419 = vmatprep.subr.bf16.mxu1 %v4084_v0 }
 0x18b   : > { %1379 = vmatpush1.bf16.msra.mxu0 %v4425_v34  ;;  %1420 = vmatpush1.bf16.msra.mxu1 %v4430_v35  ;;  %v1587_v46 = vpop.permute.xlu0 %1586 }
 0x18c   : > { %1380 = vmatprep.subr.bf16.mxu0 %v4437_v36  ;;  %1421 = vmatprep.subr.bf16.mxu1 %v4084_v0 }
 0x18d   : > { %v4910_v25 = vpop.f32.mrb[4].mxu0  ;;  %v829_v26 = vpop.f32.mrb[4].mxu1 }
 0x18e   : > { %845 = vrot.lane.b32.xlu1 %v829_v26, %s4096_s24  ;;  %v4913_v28 = vpop.f32.mrb[5].mxu0  ;;  %v831_v29 = vpop.f32.mrb[5].mxu1 }
 0x18f   : > { %1422 = vmatpush1.bf16.msra.mxu1 %v4454_v39  ;;  %1381 = vmatpush1.bf16.msra.mxu0 %v4449_v38  ;;  %v832_v32 = vpop.f32.mrb[6].mxu1  ;;  %v792_v34 = vpop.f32.mrb[6].mxu0  ;;  %v1357_v38 = vsel %vm1356_vm7, %v1353_v24, %v4788_v12 }
 0x190   : > { %839 = vrot.lane.b32.xlu0 %v4913_v28, %s4096_s24  ;;  %v793_v35 = vpop.f32.mrb[7].mxu0  ;;  %v833_v36 = vpop.f32.mrb[7].mxu1  ;;  %3493 = vmatprep.subr.msk.bf16.mxu0 %vm623_vm1, %v4465_v41 }
 0x191   : > { %1423 = vmatprep.subr.bf16.mxu1 %v4084_v0  ;;  %v4928_v39 = vpop.permute.xlu1 %1474  ;;  %v1713_v36 = vpop.permute.xlu0 %1712 }
 0x192   : > { %v1477_v5 = vsel %vm1476_vm8, %v1473_v63, %v4928_v39 }
 0x193   : > { %1383 = vmatpush1.bf16.msra.mxu0 %v4473_v43  ;;  %1424 = vmatpush1.bf16.msra.mxu1 %v4477_v44 }
 0x194   : > { %1482 = vmatprep.subr.bf16.mxu0 %v4784_v11  ;;  %1523 = vmatprep.subr.bf16.mxu1 %v4084_v0 }
 0x195   : > { %v1589_v7 = vpop.permute.xlu1 %1588 }
 0x196   : > { %1395 = vmatmul.mubr.bf16.vlgmr.msra.gmra.mrb[24].mxu0 %v1357_v38  ;;  %1436 = vmatmul.mubr.bf16.vlgmr.msra.gmra.mrb[24].mxu1 %v1357_v38  ;;  %v1591_v34 = vsel %vm1590_vm9, %v1587_v46, %v1589_v7 }
 0x197   : > { %1483 = vmatpush1.bf16.msra.mxu0 %v4722_v33  ;;  %1524 = vmatpush1.bf16.msra.mxu1 %v4794_v13 }
 0x198   : > { %1484 = vmatprep.subr.bf16.mxu0 %v4800_v15  ;;  %1525 = vmatprep.subr.bf16.mxu1 %v4084_v0 }
 0x199   : > { %3499 = vmatprep.mubr.msk.bf16.mxu0 %vm619_vm0, %v4928_v39  ;;  %3500 = vmatprep.mubr.msk.bf16.mxu1 %vm619_vm0, %v4928_v39  ;;  %v1715_v35 = vpop.permute.xlu1 %1714 }
 0x19a   : > { %v1718_v38 = vsel %vm1716_vm10, %v1713_v36, %v1715_v35 }
 0x19b   : > { %1485 = vmatpush1.bf16.msra.mxu0 %v4739_v45  ;;  %1526 = vmatpush1.bf16.msra.mxu1 %v4812_v16 }
 0x19c   : > { %1486 = vmatprep.subr.bf16.mxu0 %v4818_v17  ;;  %1527 = vmatprep.subr.bf16.mxu1 %v4084_v0 }
 0x19f   : > { %1487 = vmatpush1.bf16.msra.mxu0 %v4825_v18  ;;  %1528 = vmatpush1.bf16.msra.mxu1 %v4831_v19 }
 0x1a0   : > { %1488 = vmatprep.subr.bf16.mxu0 %v4837_v20  ;;  %1529 = vmatprep.subr.bf16.mxu1 %v4084_v0 }
 0x1a3   : > { %1489 = vmatpush1.bf16.msra.mxu0 %v4844_v21  ;;  %1530 = vmatpush1.bf16.msra.mxu1 %v4850_v22 }
 0x1a4   : > { %1490 = vmatprep.subr.bf16.mxu0 %v4856_v23  ;;  %1531 = vmatprep.subr.bf16.mxu1 %v4084_v0 }
 0x1a7   : > { %1491 = vmatpush1.bf16.msra.mxu0 %v4863_v48  ;;  %1532 = vmatpush1.bf16.msra.mxu1 %v4869_v49 }
 0x1a8   : > { %1492 = vmatprep.subr.bf16.mxu0 %v4875_v50  ;;  %1533 = vmatprep.subr.bf16.mxu1 %v4084_v0 }
 0x1ab   : > { %1493 = vmatpush1.bf16.msra.mxu0 %v4882_v51  ;;  %1534 = vmatpush1.bf16.msra.mxu1 %v4888_v52 }
 0x1ac   : > { %1494 = vmatprep.subr.bf16.mxu0 %v4894_v53  ;;  %1535 = vmatprep.subr.bf16.mxu1 %v4084_v0 }
 0x1af   : > { %1495 = vmatpush1.bf16.msra.mxu0 %v4961_v54  ;;  %1536 = vmatpush1.bf16.msra.mxu1 %v4967_v55 }
 0x1b0   : > { %1496 = vmatprep.subr.bf16.mxu0 %v4973_v56  ;;  %1537 = vmatprep.subr.bf16.mxu1 %v4084_v0 }
 0x1b3   : > { %1497 = vmatpush1.bf16.msra.mxu0 %v4980_v57  ;;  %1538 = vmatpush1.bf16.msra.mxu1 %v4986_v58 }
 0x1b4   : > { %1498 = vmatprep.subr.bf16.mxu0 %v4992_v59  ;;  %1539 = vmatprep.subr.bf16.mxu1 %v4084_v0 }
 0x1b7   : > { %1499 = vmatpush1.bf16.msra.mxu0 %v4999_v60  ;;  %1540 = vmatpush1.bf16.msra.mxu1 %v5005_v61 }
 0x1b8   : > { %1541 = vmatprep.subr.bf16.mxu1 %v4084_v0  ;;  %1500 = vmatprep.subr.bf16.mxu0 %v5012_v62 }
 0x1b9   : > { %v5015_v1 = vpop.f32.mrb[8].mxu0  ;;  %v956_v2 = vpop.f32.mrb[8].mxu1 }
 0x1ba   : > { %972 = vrot.lane.b32.xlu1 %v956_v2, %s4096_s24  ;;  %v5018_v6 = vpop.f32.mrb[9].mxu0  ;;  %v958_v14 = vpop.f32.mrb[9].mxu1 }
 0x1bb   : > { %v959_v27 = vpop.f32.mrb[10].mxu1  ;;  %1501 = vmatpush1.bf16.msra.mxu0 %v5023_v30  ;;  %1542 = vmatpush1.bf16.msra.mxu1 %v5029_v4  ;;  %v919_v8 = vpop.f32.mrb[10].mxu0 }
 0x1bc   : > { %966 = vrot.lane.b32.xlu0 %v5018_v6, %s4096_s24  ;;  %v920_v31 = vpop.f32.mrb[11].mxu0  ;;  %v960_v42 = vpop.f32.mrb[11].mxu1  ;;  %3498 = vmatprep.subr.msk.bf16.mxu0 %vm623_vm1, %v4465_v41 }
 0x1bd   : > { %1543 = vmatprep.subr.bf16.mxu1 %v4084_v0 }
 0x1bf   : > { %1503 = vmatpush1.bf16.msra.mxu0 %v4473_v43  ;;  %1544 = vmatpush1.bf16.msra.mxu1 %v4477_v44 }
 0x1c0   : > { %1596 = vmatprep.subr.bf16.mxu0 %v4784_v11  ;;  %1637 = vmatprep.subr.bf16.mxu1 %v4084_v0 }
 0x1c2   : > { %1515 = vmatmul.mubr.bf16.vlgmr.msra.gmra.mrb[28].mxu0 %v1477_v5  ;;  %1556 = vmatmul.mubr.bf16.vlgmr.msra.gmra.mrb[28].mxu1 %v1477_v5  ;;  %v1711_v5 = vpop.permute.xlu0 %1710 }
 0x1c3   : > { %1597 = vmatpush1.bf16.msra.mxu0 %v4722_v33  ;;  %1638 = vmatpush1.bf16.msra.mxu1 %v4794_v13 }
 0x1c4   : > { %1598 = vmatprep.subr.bf16.mxu0 %v4800_v15  ;;  %1639 = vmatprep.subr.bf16.mxu1 %v4084_v0 }
 0x1c5   : > { %3502 = vmatprep.mubr.msk.bf16.mxu0 %vm619_vm0, %v1589_v7  ;;  %3503 = vmatprep.mubr.msk.bf16.mxu1 %vm619_vm0, %v1589_v7  ;;  %v1717_v7 = vsel %vm1716_vm10, %v1711_v5, %v1713_v36 }
 0x1c6   : > { %v1836_v46 = vpop.permute.xlu0 %1835 }
 0x1c7   : > { %1599 = vmatpush1.bf16.msra.mxu0 %v4739_v45  ;;  %1640 = vmatpush1.bf16.msra.mxu1 %v4812_v16 }
 0x1c8   : > { %1600 = vmatprep.subr.bf16.mxu0 %v4818_v17  ;;  %1641 = vmatprep.subr.bf16.mxu1 %v4084_v0 }
 0x1cb   : > { %1601 = vmatpush1.bf16.msra.mxu0 %v4825_v18  ;;  %1642 = vmatpush1.bf16.msra.mxu1 %v4831_v19 }
 0x1cc   : > { %1602 = vmatprep.subr.bf16.mxu0 %v4837_v20  ;;  %1643 = vmatprep.subr.bf16.mxu1 %v4084_v0 }
 0x1cf   : > { %1603 = vmatpush1.bf16.msra.mxu0 %v4844_v21  ;;  %1644 = vmatpush1.bf16.msra.mxu1 %v4850_v22 }
 0x1d0   : > { %1604 = vmatprep.subr.bf16.mxu0 %v4856_v23  ;;  %1645 = vmatprep.subr.bf16.mxu1 %v4084_v0 }
 0x1d3   : > { %1605 = vmatpush1.bf16.msra.mxu0 %v4863_v48  ;;  %1646 = vmatpush1.bf16.msra.mxu1 %v4869_v49 }
 0x1d4   : > { %1606 = vmatprep.subr.bf16.mxu0 %v4875_v50  ;;  %1647 = vmatprep.subr.bf16.mxu1 %v4084_v0 }
 0x1d7   : > { %1607 = vmatpush1.bf16.msra.mxu0 %v4882_v51  ;;  %1648 = vmatpush1.bf16.msra.mxu1 %v4888_v52 }
 0x1d8   : > { %1608 = vmatprep.subr.bf16.mxu0 %v4894_v53  ;;  %1649 = vmatprep.subr.bf16.mxu1 %v4084_v0 }
 0x1db   : > { %1609 = vmatpush1.bf16.msra.mxu0 %v4961_v54  ;;  %1650 = vmatpush1.bf16.msra.mxu1 %v4967_v55 }
 0x1dc   : > { %1610 = vmatprep.subr.bf16.mxu0 %v4973_v56  ;;  %1651 = vmatprep.subr.bf16.mxu1 %v4084_v0 }
 0x1df   : > { %1611 = vmatpush1.bf16.msra.mxu0 %v4980_v57  ;;  %1652 = vmatpush1.bf16.msra.mxu1 %v4986_v58 }
 0x1e0   : > { %1612 = vmatprep.subr.bf16.mxu0 %v4992_v59  ;;  %1653 = vmatprep.subr.bf16.mxu1 %v4084_v0 }
 0x1e3   : > { %1613 = vmatpush1.bf16.msra.mxu0 %v4999_v60  ;;  %1654 = vmatpush1.bf16.msra.mxu1 %v5005_v61 }
 0x1e4   : > { %1614 = vmatprep.subr.bf16.mxu0 %v5012_v62  ;;  %1655 = vmatprep.subr.bf16.mxu1 %v4084_v0 }
 0x1e5   : > { %v5081_v47 = vpop.f32.mrb[12].mxu0  ;;  %v1076_v9 = vpop.f32.mrb[12].mxu1 }
 0x1e6   : > { %v5083_v10 = vpop.f32.mrb[13].mxu0  ;;  %v1078_v12 = vpop.f32.mrb[13].mxu1  ;;  %1092 = vrot.lane.b32.xlu1 %v1076_v9, %s4096_s24 }
 0x1e7   : > { %1656 = vmatpush1.bf16.msra.mxu1 %v5029_v4  ;;  %v1079_v24 = vpop.f32.mrb[14].mxu1  ;;  %1615 = vmatpush1.bf16.msra.mxu0 %v5023_v30  ;;  %v1039_v26 = vpop.f32.mrb[14].mxu0 }
 0x1e8   : > { %1086 = vrot.lane.b32.xlu0 %v5083_v10, %s4096_s24  ;;  %v1040_v29 = vpop.f32.mrb[15].mxu0  ;;  %v1080_v32 = vpop.f32.mrb[15].mxu1  ;;  %3501 = vmatprep.subr.msk.bf16.mxu0 %vm623_vm1, %v4465_v41 }
 0x1e9   : > { %1657 = vmatprep.subr.bf16.mxu1 %v4084_v0  ;;  %v1834_v9 = vpop.permute.xlu1 %1833 }
 0x1eb   : > { %1617 = vmatpush1.bf16.msra.mxu0 %v4473_v43  ;;  %1658 = vmatpush1.bf16.msra.mxu1 %v4477_v44 }
 0x1ec   : > { %1723 = vmatprep.subr.bf16.mxu0 %v4784_v11  ;;  %1764 = vmatprep.subr.bf16.mxu1 %v4084_v0 }
 0x1ee   : > { %1629 = vmatmul.mubr.bf16.vlgmr.msra.gmra.mrb[32].mxu0 %v1591_v34  ;;  %1670 = vmatmul.mubr.bf16.vlgmr.msra.gmra.mrb[32].mxu1 %v1591_v34 }
 0x1ef   : > { %1724 = vmatpush1.bf16.msra.mxu0 %v4722_v33  ;;  %1765 = vmatpush1.bf16.msra.mxu1 %v4794_v13 }
 0x1f0   : > { %1725 = vmatprep.subr.bf16.mxu0 %v4800_v15  ;;  %1766 = vmatprep.subr.bf16.mxu1 %v4084_v0 }
 0x1f1   : > { %3508 = vmatprep.mubr.msk.bf16.mxu0 %vm619_vm0, %v1718_v38  ;;  %3509 = vmatprep.mubr.msk.bf16.mxu1 %vm619_vm0, %v1718_v38  ;;  %v1838_v38 = vsel %vm1837_vm11, %v1834_v9, %v1836_v46 }
 0x1f3   : > { %1726 = vmatpush1.bf16.msra.mxu0 %v4739_v45  ;;  %1767 = vmatpush1.bf16.msra.mxu1 %v4812_v16 }
 0x1f4   : > { %1727 = vmatprep.subr.bf16.mxu0 %v4818_v17  ;;  %1768 = vmatprep.subr.bf16.mxu1 %v4084_v0 }
 0x1f7   : > { %1728 = vmatpush1.bf16.msra.mxu0 %v4825_v18  ;;  %1769 = vmatpush1.bf16.msra.mxu1 %v4831_v19 }
 0x1f8   : > { %1729 = vmatprep.subr.bf16.mxu0 %v4837_v20  ;;  %1770 = vmatprep.subr.bf16.mxu1 %v4084_v0 }
 0x1fb   : > { %1730 = vmatpush1.bf16.msra.mxu0 %v4844_v21  ;;  %1771 = vmatpush1.bf16.msra.mxu1 %v4850_v22 }
 0x1fc   : > { %1731 = vmatprep.subr.bf16.mxu0 %v4856_v23  ;;  %1772 = vmatprep.subr.bf16.mxu1 %v4084_v0 }
 0x1ff   : > { %1732 = vmatpush1.bf16.msra.mxu0 %v4863_v48  ;;  %1773 = vmatpush1.bf16.msra.mxu1 %v4869_v49 }
 0x200   : > { %1733 = vmatprep.subr.bf16.mxu0 %v4875_v50  ;;  %1774 = vmatprep.subr.bf16.mxu1 %v4084_v0 }
 0x203   : > { %1734 = vmatpush1.bf16.msra.mxu0 %v4882_v51  ;;  %1775 = vmatpush1.bf16.msra.mxu1 %v4888_v52 }
 0x204   : > { %1735 = vmatprep.subr.bf16.mxu0 %v4894_v53  ;;  %1776 = vmatprep.subr.bf16.mxu1 %v4084_v0 }
 0x207   : > { %1736 = vmatpush1.bf16.msra.mxu0 %v4961_v54  ;;  %1777 = vmatpush1.bf16.msra.mxu1 %v4967_v55 }
 0x208   : > { %1737 = vmatprep.subr.bf16.mxu0 %v4973_v56  ;;  %1778 = vmatprep.subr.bf16.mxu1 %v4084_v0 }
 0x20b   : > { %1738 = vmatpush1.bf16.msra.mxu0 %v4980_v57  ;;  %1779 = vmatpush1.bf16.msra.mxu1 %v4986_v58 }
 0x20c   : > { %1739 = vmatprep.subr.bf16.mxu0 %v4992_v59  ;;  %1780 = vmatprep.subr.bf16.mxu1 %v4084_v0 }
 0x20f   : > { %1740 = vmatpush1.bf16.msra.mxu0 %v4999_v60  ;;  %1781 = vmatpush1.bf16.msra.mxu1 %v5005_v61 }
 0x210   : > { %1741 = vmatprep.subr.bf16.mxu0 %v5012_v62  ;;  %1782 = vmatprep.subr.bf16.mxu1 %v4084_v0 }
 0x211   : > { %v5137_v39 = vpop.f32.mrb[16].mxu0  ;;  %v1203_v63 = vpop.f32.mrb[16].mxu1 }
 0x212   : > { %1219 = vrot.lane.b32.xlu1 %v1203_v63, %s4096_s24  ;;  %v5140_v2 = vpop.f32.mrb[17].mxu0  ;;  %v1205_v14 = vpop.f32.mrb[17].mxu1 }
 0x213   : > { %v1206_v27 = vpop.f32.mrb[18].mxu1  ;;  %1213 = vrot.lane.b32.xlu0 %v5140_v2, %s4096_s24  ;;  %v1166_v8 = vpop.f32.mrb[18].mxu0  ;;  %1742 = vmatpush1.bf16.msra.mxu0 %v5023_v30 }
 0x214   : > { %v1167_v31 = vpop.f32.mrb[19].mxu0  ;;  %v1207_v42 = vpop.f32.mrb[19].mxu1  ;;  %3507 = vmatprep.subr.msk.bf16.mxu0 %vm623_vm1, %v4465_v41  ;;  %1783 = vmatpush1.bf16.msra.mxu1 %v5029_v4 }
 0x215   : > { %1784 = vmatprep.subr.bf16.mxu1 %v4084_v0  ;;  %v1960_v63 = vpop.permute.xlu1 %1959  ;;  %v1962_v14 = vpop.permute.xlu0 %1961 }
 0x216   : > { %v1965_v27 = vsel %vm1963_vm12, %v1960_v63, %v1962_v14 }
 0x217   : > { %1744 = vmatpush1.bf16.msra.mxu0 %v4473_v43 }
 0x218   : > { %1843 = vmatprep.subr.bf16.mxu0 %v4784_v11  ;;  %1785 = vmatpush1.bf16.msra.mxu1 %v4477_v44 }
 0x219   : > { %1884 = vmatprep.subr.bf16.mxu1 %v4084_v0 }
 0x21a   : > { %1756 = vmatmul.mubr.bf16.vlgmr.msra.gmra.mrb[36].mxu0 %v1717_v7 }
 0x21b   : > { %1844 = vmatpush1.bf16.msra.mxu0 %v4722_v33  ;;  %1797 = vmatmul.mubr.bf16.vlgmr.msra.gmra.mrb[36].mxu1 %v1717_v7 }
 0x21c   : > { %1845 = vmatprep.subr.bf16.mxu0 %v4800_v15  ;;  %1885 = vmatpush1.bf16.msra.mxu1 %v4794_v13 }
 0x21d   : > { %1886 = vmatprep.subr.bf16.mxu1 %v4084_v0  ;;  %3513 = vmatprep.mubr.msk.bf16.mxu0 %vm619_vm0, %v1836_v46 }
 0x21e   : > { %3514 = vmatprep.mubr.msk.bf16.mxu1 %vm619_vm0, %v1836_v46 }
 0x21f   : > { %1846 = vmatpush1.bf16.msra.mxu0 %v4739_v45 }
 0x220   : > { %1847 = vmatprep.subr.bf16.mxu0 %v4818_v17  ;;  %1887 = vmatpush1.bf16.msra.mxu1 %v4812_v16 }
 0x221   : > { %1888 = vmatprep.subr.bf16.mxu1 %v4084_v0 }
 0x223   : > { %1848 = vmatpush1.bf16.msra.mxu0 %v4825_v18 }
 0x224   : > { %1849 = vmatprep.subr.bf16.mxu0 %v4837_v20  ;;  %1889 = vmatpush1.bf16.msra.mxu1 %v4831_v19 }
 0x225   : > { %1890 = vmatprep.subr.bf16.mxu1 %v4084_v0 }
 0x227   : > { %1850 = vmatpush1.bf16.msra.mxu0 %v4844_v21 }
 0x228   : > { %1851 = vmatprep.subr.bf16.mxu0 %v4856_v23  ;;  %1891 = vmatpush1.bf16.msra.mxu1 %v4850_v22 }
 0x229   : > { %1892 = vmatprep.subr.bf16.mxu1 %v4084_v0 }
 0x22b   : > { %1852 = vmatpush1.bf16.msra.mxu0 %v4863_v48 }
 0x22c   : > { %1853 = vmatprep.subr.bf16.mxu0 %v4875_v50  ;;  %1893 = vmatpush1.bf16.msra.mxu1 %v4869_v49 }
 0x22d   : > { %1894 = vmatprep.subr.bf16.mxu1 %v4084_v0 }
 0x22f   : > { %1854 = vmatpush1.bf16.msra.mxu0 %v4882_v51 }
 0x230   : > { %1855 = vmatprep.subr.bf16.mxu0 %v4894_v53  ;;  %1895 = vmatpush1.bf16.msra.mxu1 %v4888_v52 }
 0x231   : > { %1896 = vmatprep.subr.bf16.mxu1 %v4084_v0 }
 0x233   : > { %1856 = vmatpush1.bf16.msra.mxu0 %v4961_v54 }
 0x234   : > { %1857 = vmatprep.subr.bf16.mxu0 %v4973_v56  ;;  %1897 = vmatpush1.bf16.msra.mxu1 %v4967_v55 }
 0x235   : > { %1898 = vmatprep.subr.bf16.mxu1 %v4084_v0 }
 0x237   : > { %1858 = vmatpush1.bf16.msra.mxu0 %v4980_v57 }
 0x238   : > { %1859 = vmatprep.subr.bf16.mxu0 %v4992_v59  ;;  %1899 = vmatpush1.bf16.msra.mxu1 %v4986_v58 }
 0x239   : > { %1900 = vmatprep.subr.bf16.mxu1 %v4084_v0 }
 0x23b   : > { %1860 = vmatpush1.bf16.msra.mxu0 %v4999_v60 }
 0x23c   : > { %1861 = vmatprep.subr.bf16.mxu0 %v5012_v62  ;;  %1901 = vmatpush1.bf16.msra.mxu1 %v5005_v61 }
 0x23d   : > { %v5191_v12 = vpop.f32.mrb[20].mxu0  ;;  %v1323_v24 = vpop.f32.mrb[20].mxu1  ;;  %1902 = vmatprep.subr.bf16.mxu1 %v4084_v0 }
 0x23e   : > { %v5194_v26 = vpop.f32.mrb[21].mxu0  ;;  %v1325_v29 = vpop.f32.mrb[21].mxu1  ;;  %1339 = vrot.lane.b32.xlu1 %v1323_v24, %s4096_s24 }
 0x23f   : > { %v1326_v32 = vpop.f32.mrb[22].mxu1  ;;  %1333 = vrot.lane.b32.xlu0 %v5194_v26, %s4096_s24  ;;  %v1286_v34 = vpop.f32.mrb[22].mxu0  ;;  %1862 = vmatpush1.bf16.msra.mxu0 %v5023_v30 }
 0x240   : > { %v1287_v35 = vpop.f32.mrb[23].mxu0  ;;  %v1327_v36 = vpop.f32.mrb[23].mxu1  ;;  %3512 = vmatprep.subr.msk.bf16.mxu0 %vm623_vm1, %v4465_v41  ;;  %1903 = vmatpush1.bf16.msra.mxu1 %v5029_v4 }
 0x241   : > { %1904 = vmatprep.subr.bf16.mxu1 %v4084_v0 }
 0x243   : > { %1864 = vmatpush1.bf16.msra.mxu0 %v4473_v43 }
 0x244   : > { %1970 = vmatprep.subr.bf16.mxu0 %v4784_v11  ;;  %1905 = vmatpush1.bf16.msra.mxu1 %v4477_v44 }
 0x245   : > { %2011 = vmatprep.subr.bf16.mxu1 %v4084_v0 }
 0x246   : > { %1876 = vmatmul.mubr.bf16.vlgmr.msra.gmra.mrb[40].mxu0 %v1838_v38 }
 0x247   : > { %1971 = vmatpush1.bf16.msra.mxu0 %v4722_v33  ;;  %1917 = vmatmul.mubr.bf16.vlgmr.msra.gmra.mrb[40].mxu1 %v1838_v38 }
 0x248   : > { %1972 = vmatprep.subr.bf16.mxu0 %v4800_v15  ;;  %2012 = vmatpush1.bf16.msra.mxu1 %v4794_v13 }
 0x249   : > { %2013 = vmatprep.subr.bf16.mxu1 %v4084_v0  ;;  %3519 = vmatprep.mubr.msk.bf16.mxu0 %vm619_vm0, %v1965_v27 }
 0x24a   : > { %3520 = vmatprep.mubr.msk.bf16.mxu1 %vm619_vm0, %v1965_v27  ;;  %vm4100_vm0 = vmmov 0  }
 0x24b   : > { %1973 = vmatpush1.bf16.msra.mxu0 %v4739_v45 }
 0x24c   : > { %1974 = vmatprep.subr.bf16.mxu0 %v4818_v17  ;;  %2014 = vmatpush1.bf16.msra.mxu1 %v4812_v16 }
 0x24d   : > { %2015 = vmatprep.subr.bf16.mxu1 %v4084_v0 }
 0x24f   : > { %1975 = vmatpush1.bf16.msra.mxu0 %v4825_v18 }
 0x250   : > { %1976 = vmatprep.subr.bf16.mxu0 %v4837_v20  ;;  %2016 = vmatpush1.bf16.msra.mxu1 %v4831_v19  ;;  %v1958_v19 = vpop.permute.xlu1 %1957 }
 0x251   : > { %2017 = vmatprep.subr.bf16.mxu1 %v4084_v0  ;;  %v1964_v20 = vsel %vm1963_vm12, %v1958_v19, %v1960_v63 }
 0x253   : > { %1977 = vmatpush1.bf16.msra.mxu0 %v4844_v21 }
 0x254   : > { %1978 = vmatprep.subr.bf16.mxu0 %v4856_v23  ;;  %2018 = vmatpush1.bf16.msra.mxu1 %v4850_v22 }
 0x255   : > { %2019 = vmatprep.subr.bf16.mxu1 %v4084_v0 }
 0x257   : > { %1979 = vmatpush1.bf16.msra.mxu0 %v4863_v48 }
 0x258   : > { %1980 = vmatprep.subr.bf16.mxu0 %v4875_v50  ;;  %2020 = vmatpush1.bf16.msra.mxu1 %v4869_v49 }
 0x259   : > { %2021 = vmatprep.subr.bf16.mxu1 %v4084_v0 }
 0x25b   : > { %1981 = vmatpush1.bf16.msra.mxu0 %v4882_v51 }
 0x25c   : > { %1982 = vmatprep.subr.bf16.mxu0 %v4894_v53  ;;  %2022 = vmatpush1.bf16.msra.mxu1 %v4888_v52 }
 0x25d   : > { %2023 = vmatprep.subr.bf16.mxu1 %v4084_v0 }
 0x25f   : > { %1983 = vmatpush1.bf16.msra.mxu0 %v4961_v54 }
 0x260   : > { %1984 = vmatprep.subr.bf16.mxu0 %v4973_v56  ;;  %2024 = vmatpush1.bf16.msra.mxu1 %v4967_v55 }
 0x261   : > { %2025 = vmatprep.subr.bf16.mxu1 %v4084_v0 }
 0x263   : > { %1985 = vmatpush1.bf16.msra.mxu0 %v4980_v57 }
 0x264   : > { %1986 = vmatprep.subr.bf16.mxu0 %v4992_v59  ;;  %2026 = vmatpush1.bf16.msra.mxu1 %v4986_v58 }
 0x265   : > { %2027 = vmatprep.subr.bf16.mxu1 %v4084_v0 }
 0x267   : > { %1987 = vmatpush1.bf16.msra.mxu0 %v4999_v60 }
 0x268   : > { %1988 = vmatprep.subr.bf16.mxu0 %v5012_v62  ;;  %2028 = vmatpush1.bf16.msra.mxu1 %v5005_v61 }
 0x269   : > { %v5247_v33 = vpop.f32.mrb[24].mxu0  ;;  %v1437_v45 = vpop.f32.mrb[24].mxu1  ;;  %2029 = vmatprep.subr.bf16.mxu1 %v4084_v0 }
 0x26a   : > { %v5250_v11 = vpop.f32.mrb[25].mxu0  ;;  %v1439_v13 = vpop.f32.mrb[25].mxu1  ;;  %1453 = vrot.lane.b32.xlu1 %v1437_v45, %s4096_s24 }
 0x26b   : > { %v1440_v15 = vpop.f32.mrb[26].mxu1  ;;  %1447 = vrot.lane.b32.xlu0 %v5250_v11, %s4096_s24  ;;  %v1400_v16 = vpop.f32.mrb[26].mxu0  ;;  %1989 = vmatpush1.bf16.msra.mxu0 %v5023_v30 }
 0x26c   : > { %v1401_v17 = vpop.f32.mrb[27].mxu0  ;;  %v1441_v18 = vpop.f32.mrb[27].mxu1  ;;  %3518 = vmatprep.subr.msk.bf16.mxu0 %vm623_vm1, %v4465_v41  ;;  %2030 = vmatpush1.bf16.msra.mxu1 %v5029_v4 }
 0x26d   : > { %2031 = vmatprep.subr.bf16.mxu1 %v4084_v0 }
 0x26f   : > { %1991 = vmatpush1.bf16.msra.mxu0 %v4473_v43  ;;  %v846_v43 = vpop.permute.xlu1 %845 }
 0x270   : > { %2032 = vmatpush1.bf16.msra.mxu1 %v4477_v44  ;;  %v5282_v44 = vpop.permute.xlu0 %839 }
 0x271   : > { %v847_v24 = vsel %vm720_vm13, %v5282_v44, %v846_v43 }
 0x272   : > { %2003 = vmatmul.mubr.bf16.vlgmr.msra.gmra.mrb[44].mxu0 %v1964_v20  ;;  %v849_v29 = vmax.f32 %v4913_v28, %v847_v24 }
 0x273   : > { %2044 = vmatmul.mubr.bf16.vlgmr.msra.gmra.mrb[44].mxu1 %v1964_v20  ;;  %v973_v51 = vpop.permute.xlu1 %972 }
 0x274   : > { %v5284_v52 = vpop.permute.xlu0 %966 }
 0x277   : > { %v1093_v53 = vpop.permute.xlu1 %1092 }
 0x278   : > { %v5286_v54 = vpop.permute.xlu0 %1086 }
 0x279   : > { %v1094_v59 = vsel %vm720_vm13, %v5286_v54, %v1093_v53 }
 0x27a   : > { %v1096_v31 = vmax.f32 %v5083_v10, %v1094_v59 }
 0x284   : > { %v1220_v55 = vpop.permute.xlu1 %1219 }
 0x285   : > { %v5288_v56 = vpop.permute.xlu0 %1213 }
 0x286   : > { %v1221_v46 = vsel %vm720_vm13, %v5288_v56, %v1220_v55 }
 0x287   : > { %v1223_v10 = vmax.f32 %v5140_v2, %v1221_v46 }
 0x295   : > { %v5263_v21 = vpop.f32.mrb[28].mxu0  ;;  %v1557_v22 = vpop.f32.mrb[28].mxu1 }
 0x296   : > { %1573 = vrot.lane.b32.xlu1 %v1557_v22, %s4096_s24  ;;  %v5266_v23 = vpop.f32.mrb[29].mxu0  ;;  %v1559_v41 = vpop.f32.mrb[29].mxu1 }
 0x297   : > { %v1560_v48 = vpop.f32.mrb[30].mxu1  ;;  %1567 = vrot.lane.b32.xlu0 %v5266_v23, %s4096_s24  ;;  %v1520_v0 = vpop.f32.mrb[30].mxu0 }
 0x298   : > { %v1521_v49 = vpop.f32.mrb[31].mxu0  ;;  %v1561_v50 = vpop.f32.mrb[31].mxu1 }
 0x29a   : > { %1211 = vrot.lane.b32.xlu1 %v5137_v39, %s4096_s24 }
 0x29b   : > { %1084 = vrot.lane.b32.xlu0 %v5081_v47, %s4096_s24 }
 0x29e   : > { %1445 = vrot.lane.b32.xlu1 %v5247_v33, %s4096_s24 }
 0x29f   : > { %1331 = vrot.lane.b32.xlu0 %v5191_v12, %s4096_s24 }
 0x2a2   : > { %964 = vrot.lane.b32.xlu1 %v5015_v1, %s4096_s24 }
 0x2a3   : > { %837 = vrot.lane.b32.xlu0 %v4910_v25, %s4096_s24 }
 0x2b0   : > { %v1340_v57 = vpop.permute.xlu1 %1339 }
 0x2b1   : > { %v5290_v58 = vpop.permute.xlu0 %1333 }
 0x2b2   : > { %v1341_v7 = vsel %vm720_vm13, %v5290_v58, %v1340_v57 }
 0x2b3   : > { %v1343_v9 = vmax.f32 %v5194_v26, %v1341_v7  ;;  %v974_v26 = vsel %vm720_vm13, %v5284_v52, %v973_v51  ;;  %v5357_v7 = vld [vmem:[%s6201_s2] ss:$0 sm:$0xff] }
 0x2b4   : > { %v976_v2 = vmax.f32 %v5018_v6, %v974_v26 }
 0x2c1   : > { %v5294_v60 = vpop.f32.mrb[32].mxu0  ;;  %v1671_v61 = vpop.f32.mrb[32].mxu1 }
 0x2c2   : > { %1687 = vrot.lane.b32.xlu1 %v1671_v61, %s4096_s24  ;;  %v5297_v62 = vpop.f32.mrb[33].mxu0  ;;  %v1673_v30 = vpop.f32.mrb[33].mxu1 }
 0x2c3   : > { %1681 = vrot.lane.b32.xlu0 %v5297_v62, %s4096_s24  ;;  %v1634_v4 = vpop.f32.mrb[34].mxu0  ;;  %v1674_v8 = vpop.f32.mrb[34].mxu1 }
 0x2c4   : > { %v1675_v42 = vpop.f32.mrb[35].mxu1  ;;  %v1635_v5 = vpop.f32.mrb[35].mxu0 }
 0x2c6   : > { %1098 = vrot.lane.b32.xlu1 %v1096_v31, %s4097_s15 }
 0x2c7   : > { %1565 = vrot.lane.b32.xlu0 %v5263_v21, %s4096_s24 }
 0x2ca   : > { %1345 = vrot.lane.b32.xlu1 %v1343_v9, %s4097_s15 }
 0x2cb   : > { %1225 = vrot.lane.b32.xlu0 %v1223_v10, %s4097_s15 }
 0x2ce   : > { %851 = vrot.lane.b32.xlu1 %v849_v29, %s4097_s15 }
 0x2dc   : > { %v1454_v32 = vpop.permute.xlu1 %1453 }
 0x2dd   : > { %v1448_v34 = vpop.permute.xlu0 %1447 }
 0x2de   : > { %v1455_v35 = vsel %vm720_vm13, %v1448_v34, %v1454_v32 }
 0x2df   : > { %v1457_v36 = vmax.f32 %v5250_v11, %v1455_v35 }
 0x2e1   : > { %1459 = vrot.lane.b32.xlu0 %v1457_v36, %s4097_s15 }
 0x2e5   : > { %978 = vrot.lane.b32.xlu0 %v976_v2, %s4097_s15 }
 0x2e9   : > { %1679 = vrot.lane.b32.xlu0 %v5294_v60, %s4096_s24 }
 0x2ed   : > { %v5326_v28 = vpop.f32.mrb[36].mxu0 }
 0x2ee   : > { %v1798_v38 = vpop.f32.mrb[36].mxu1  ;;  %v5328_v63 = vpop.f32.mrb[37].mxu0 }
 0x2ef   : > { %1808 = vrot.lane.b32.xlu0 %v5328_v63, %s4096_s24  ;;  %v1800_v14 = vpop.f32.mrb[37].mxu1  ;;  %v1761_v27 = vpop.f32.mrb[38].mxu0 }
 0x2f0   : > { %v1801_v45 = vpop.f32.mrb[38].mxu1  ;;  %v1762_v11 = vpop.f32.mrb[39].mxu0 }
 0x2f1   : > { %v1802_v13 = vpop.f32.mrb[39].mxu1 }
 0x308   : > { %v1574_v15 = vpop.permute.xlu1 %1573 }
 0x309   : > { %v1568_v6 = vpop.permute.xlu0 %1567 }
 0x30a   : > { %v1575_v16 = vsel %vm720_vm13, %v1568_v6, %v1574_v15 }
 0x30b   : > { %v1577_v17 = vmax.f32 %v5266_v23, %v1575_v16 }
 0x30c   : > { %v1212_v18 = vpop.permute.xlu1 %1211 }
 0x30d   : > { %1579 = vrot.lane.b32.xlu1 %v1577_v17, %s4097_s15  ;;  %v1085_v53 = vpop.permute.xlu0 %1084 }
 0x30e   : > { %v1088_v61 = vsel %vm720_vm13, %v1085_v53, %v5286_v54  ;;  %v1215_v54 = vsel %vm720_vm13, %v1212_v18, %v5288_v56 }
 0x30f   : > { %v1090_v42 = vmax.f32 %v5081_v47, %v1088_v61 }
 0x310   : > { %v1446_v19 = vpop.permute.xlu1 %1445 }
 0x311   : > { %v5336_v20 = vsel %vm720_vm13, %v1446_v19, %v1448_v34  ;;  %1814 = vrot.lane.b32.xlu1 %v1798_v38, %s4096_s24  ;;  %v1332_v55 = vpop.permute.xlu0 %1331  ;;  %v1217_v34 = vmax.f32 %v5137_v39, %v1215_v54 }
 0x312   : > { %v1451_v22 = vmax.f32 %v5247_v33, %v5336_v20  ;;  %v1335_v5 = vsel %vm720_vm13, %v1332_v55, %v5290_v58 }
 0x313   : > { %v1337_v10 = vmax.f32 %v5191_v12, %v1335_v5 }
 0x314   : > { %v965_v57 = vpop.permute.xlu1 %964 }
 0x315   : > { %v838_v59 = vpop.permute.xlu0 %837 }
 0x316   : > { %v841_v29 = vsel %vm720_vm13, %v838_v59, %v5282_v44 }
 0x317   : > { %v843_v14 = vmax.f32 %v4910_v25, %v841_v29 }
 0x319   : > { %v5341_v41 = vpop.f32.mrb[40].mxu0 }
 0x31a   : > { %v1918_v48 = vpop.f32.mrb[40].mxu1  ;;  %v5343_v0 = vpop.f32.mrb[41].mxu0 }
 0x31b   : > { %1928 = vrot.lane.b32.xlu0 %v5343_v0, %s4096_s24  ;;  %v1920_v23 = vpop.f32.mrb[41].mxu1  ;;  %v1881_v49 = vpop.f32.mrb[42].mxu0 }
 0x31c   : > { %v1921_v50 = vpop.f32.mrb[42].mxu1  ;;  %v1882_v43 = vpop.f32.mrb[43].mxu0 }
 0x31d   : > { %v1922_v51 = vpop.f32.mrb[43].mxu1  ;;  %v968_v50 = vsel %vm720_vm13, %v965_v57, %v5284_v52 }
 0x31e   : > { %v970_v55 = vmax.f32 %v5015_v1, %v968_v50  ;;  %v5559_v50 = vld [vmem:[%s6202_s3 + $0x94] ss:$8 sps:$4 sm:$0xff]  }
 0x334   : > { %v1688_v30 = vpop.permute.xlu1 %1687 }
 0x335   : > { %v1682_v4 = vpop.permute.xlu0 %1681 }
 0x336   : > { %v1689_v8 = vsel %vm720_vm13, %v1682_v4, %v1688_v30 }
 0x337   : > { %v1691_v31 = vmax.f32 %v5297_v62, %v1689_v8 }
 0x338   : > { %v1099_v46 = vpop.permute.xlu1 %1098 }
 0x339   : > { %v1101_v9 = vmax.f32 %v1090_v42, %v1099_v46  ;;  %1693 = vrot.lane.b32.xlu1 %v1691_v31, %s4097_s15  ;;  %v1566_v24 = vpop.permute.xlu0 %1565 }
 0x33a   : > { %v1569_v62 = vsel %vm720_vm13, %v1566_v24, %v1568_v6 }
 0x33b   : > { %v1102_v47 = vadd.f32 %v5357_v7, %v1101_v9  ;;  %v1571_v58 = vmax.f32 %v5263_v21, %v1569_v62 }
 0x33c   : > { %v1346_v32 = vpop.permute.xlu1 %1345 }
 0x33d   : > { %v1103_v35 = vmax.f32 %v1102_v47, 0.0  ;;  %v1348_v56 = vmax.f32 %v1337_v10, %v1346_v32  ;;  %1934 = vrot.lane.b32.xlu1 %v1918_v48, %s4096_s24  ;;  %v1226_v36 = vpop.permute.xlu0 %1225 }
 0x33e   : > { %v1228_v26 = vmax.f32 %v1217_v34, %v1226_v36 }
 0x33f   : > { %v1104_v2 = vpack.c.bf16 %v1103_v35, %v1103_v35  ;;  %v1349_v38 = vadd.f32 %v5357_v7, %v1348_v56  ;;  %v5423_v35 = vld [vmem:[%s6202_s3] ss:$8 sps:$4 sm:$0xff]   ;;  %v5428_v56 = vld [vmem:[%s6202_s3 + $0x14] ss:$8 sps:$4 sm:$0xff]  }
 0x340   : > { %v1229_v12 = vadd.f32 %v5357_v7, %v1228_v26  ;;  %v852_v21 = vpop.permute.xlu1 %851 }
 0x341   : > { %v1350_v27 = vmax.f32 %v1349_v38, 0.0  ;;  %v854_v45 = vmax.f32 %v843_v14, %v852_v21  ;;  %2081 = vrot.lane.b32.xlu0 %v1104_v2, %s4087_s13  ;;  %s6242_s13 = smov 16   ;;  %v5442_v38 = vld [vmem:[%s6202_s3 + $0x10] ss:$8 sps:$4 sm:$0xff]   ;;  %v5465_v21 = vld [vmem:[%s6202_s3 + $0x34] ss:$8 sps:$4 sm:$0xff]  }
 0x342   : > { %v1230_v44 = vmax.f32 %v1229_v12, 0.0  ;;  %v5460_v12 = vld [vmem:[%s6202_s3 + $0x20] ss:$8 sps:$4 sm:$0xff]  }
 0x343   : > { %v1351_v39 = vpack.c.bf16 %v1350_v27, %v1350_v27  ;;  %v855_v11 = vadd.f32 %v5357_v7, %v854_v45 }
 0x344   : > { %v1231_v13 = vpack.c.bf16 %v1230_v44, %v1230_v44  ;;  %v5484_v44 = vld [vmem:[%s6202_s3 + $0x30] ss:$8 sps:$4 sm:$0xff]  }
 0x345   : > { %v856_v15 = vmax.f32 %v855_v11, 0.0  ;;  %2087 = vrot.lane.b32.xlu0 %v1351_v39, %s4089_s14  ;;  %v5376_v6 = vpop.f32.mrb[44].mxu0  ;;  %v5489_v39 = vld [vmem:[%s6202_s3 + $0x44] ss:$8 sps:$4 sm:$0xff]   ;;  %v5499_v11 = vld [vmem:[%s6202_s3 + $0x40] ss:$8 sps:$4 sm:$0xff]  }
 0x346   : > { %2084 = vrot.lane.b32.xlu1 %v1231_v13, %s4088_s25  ;;  %v5379_v25 = vpop.f32.mrb[45].mxu0  ;;  %v2045_v16 = vpop.f32.mrb[44].mxu1  ;;  %s6243_s25 = smov 120   ;;  %v5504_v13 = vld [vmem:[%s6202_s3 + $0x54] ss:$8 sps:$4 sm:$0xff]  }
 0x347   : > { %v857_v17 = vpack.c.bf16 %v856_v15, %v856_v15  ;;  %v2047_v18 = vpop.f32.mrb[45].mxu1  ;;  %v2008_v19 = vpop.f32.mrb[46].mxu0  ;;  %v5510_v15 = vld [vmem:[%s6202_s3 + $0x50] ss:$8 sps:$4 sm:$0xff]  }
 0x348   : > { %v2048_v48 = vpop.f32.mrb[46].mxu1  ;;  %v2009_v23 = vpop.f32.mrb[47].mxu0  ;;  %v5530_v18 = vld [vmem:[%s6202_s3 + $0x74] ss:$8 sps:$4 sm:$0xff]   ;;  %v5538_v19 = vld [vmem:[%s6202_s3 + $0x70] ss:$8 sps:$4 sm:$0xff]  }
 0x349   : > { %2075 = vrot.lane.b32.xlu0 %v857_v17, %s4085_s26  ;;  %v2049_v49 = vpop.f32.mrb[47].mxu1  ;;  %s6241_s26 = smov 48   ;;  %v5525_v17 = vld [vmem:[%s6202_s3 + $0x60] ss:$8 sps:$4 sm:$0xff]   ;;  %v5545_v48 = vld [vmem:[%s6202_s3 + $0x84] ss:$8 sps:$4 sm:$0xff]  }
 0x34a   : > { %v5552_v49 = vld [vmem:[%s6202_s3 + $0x80] ss:$8 sps:$4 sm:$0xff]  }
 0x353   : > { %v1460_v43 = vpop.permute.xlu0 %1459 }
 0x354   : > { %v1462_v51 = vmax.f32 %v1451_v22, %v1460_v43 }
 0x356   : > { %v1463_v53 = vadd.f32 %v5357_v7, %v1462_v51 }
 0x357   : > { %v979_v59 = vpop.permute.xlu0 %978 }
 0x358   : > { %v1464_v61 = vmax.f32 %v1463_v53, 0.0  ;;  %v981_v30 = vmax.f32 %v970_v55, %v979_v59  ;;  %v5568_v53 = vld [vmem:[%s6202_s3 + $0x90] ss:$8 sps:$4 sm:$0xff]   ;;  %v5577_v59 = vld [vmem:[%s6202_s3 + $0xa4] ss:$8 sps:$4 sm:$0xff]  }
 0x35a   : > { %v1465_v8 = vpack.c.bf16 %v1464_v61, %v1464_v61  ;;  %v982_v31 = vadd.f32 %v5357_v7, %v981_v30  ;;  %v5587_v30 = vld [vmem:[%s6202_s3 + $0xa0] ss:$8 sps:$4 sm:$0xff]  }
 0x35b   : > { %v1680_v42 = vpop.permute.xlu0 %1679 }
 0x35c   : > { %v983_v5 = vmax.f32 %v982_v31, 0.0  ;;  %v1683_v46 = vsel %vm720_vm13, %v1680_v42, %v1682_v4  ;;  %2090 = vrot.lane.b32.xlu1 %v1465_v8, %s6241_s26  ;;  %s6244_s26 = smov 64   ;;  %v5594_v8 = vld [vmem:[%s6202_s3 + $0xb4] ss:$8 sps:$4 sm:$0xff]   ;;  %v5601_v31 = vld [vmem:[%s6202_s3 + $0xb0] ss:$8 sps:$4 sm:$0xff]  }
 0x35d   : > { %v1685_v52 = vmax.f32 %v5294_v60, %v1683_v46  ;;  %v5608_v42 = vld [vmem:[%s6202_s3 + $0xc4] ss:$8 sps:$4 sm:$0xff]   ;;  %v5622_v46 = vld [vmem:[%s6202_s3 + $0xd4] ss:$8 sps:$4 sm:$0xff]  }
 0x35e   : > { %v984_v33 = vpack.c.bf16 %v983_v5, %v983_v5  ;;  %v5615_v5 = vld [vmem:[%s6202_s3 + $0xc0] ss:$8 sps:$4 sm:$0xff]  }
 0x360   : > { %2078 = vrot.lane.b32.xlu1 %v984_v33, %s6242_s13  ;;  %v5636_v33 = vld [vmem:[%s6202_s3 + $0xe4] ss:$8 sps:$4 sm:$0xff]  }
 0x361   : > { %v5398_v22 = vpop.permute.xlu0 %1808 }
 0x364   : > { %2055 = vrot.lane.b32.xlu1 %v5379_v25, %s4096_s24 }
 0x368   : > { %1806 = vrot.lane.b32.xlu1 %v5326_v28, %s4096_s24 }
 0x37f   : > { %v1580_v1 = vpop.permute.xlu1 %1579 }
 0x380   : > { %v1582_v20 = vmax.f32 %v1571_v58, %v1580_v1  ;;  %v5643_v1 = vld [vmem:[%s6202_s3 + $0xe0] ss:$8 sps:$4 sm:$0xff]  }
 0x381   : > { %6246 = vst [vmem:[#allocation10_spill] sm:$0xff] %v5643_v1 }
 0x382   : > { %v1583_v57 = vadd.f32 %v5357_v7, %v1582_v20  ;;  %v5650_v20 = vld [vmem:[%s6202_s3 + $0xf4] ss:$8 sps:$4 sm:$0xff]  }
 0x383   : > { %v1815_v4 = vpop.permute.xlu1 %1814  ;;  %6247 = vst [vmem:[#allocation11_spill] sm:$0xff] %v5650_v20 }
 0x384   : > { %v1584_v54 = vmax.f32 %v1583_v57, 0.0  ;;  %v1816_v60 = vsel %vm720_vm13, %v5398_v22, %v1815_v4  ;;  %v5657_v57 = vld [vmem:[%s6202_s3 + $0xf0] ss:$8 sps:$4 sm:$0xff]   ;;  %v5667_v4 = vld [vmem:[%s6202_s3 + $0x104] ss:$8 sps:$4 sm:$0xff]  }
 0x385   : > { %v1818_v9 = vmax.f32 %v5328_v63, %v1816_v60  ;;  %v5415_v63 = vld [vmem:[%s6202_s3 + $0x4] ss:$8 sps:$4 sm:$0xff]   ;;  %6248 = vst [vmem:[#allocation12_spill] sm:$0xff] %v5657_v57  ;;  %6249 = vst [vmem:[#allocation13_spill] sm:$0xff] %v5667_v4 }
 0x386   : > { %v1585_v24 = vpack.c.bf16 %v1584_v54, %v1584_v54  ;;  %2595 = vmatprep.subr.bf16.mxu1 %v5415_v63  ;;  %2471 = vmatprep.subr.bf16.mxu0 %v5415_v63 }
 0x387   : > { %1820 = vrot.lane.b32.xlu1 %v1818_v9, %s4097_s15  ;;  %2596 = vmatpush1.bf16.msra.mxu1 %v5423_v35 }
 0x388   : > { %2093 = vrot.lane.b32.xlu0 %v1585_v24, %s6243_s25  ;;  %2472 = vmatpush1.bf16.msra.mxu0 %v5423_v35  ;;  %s392_s25 = sand.u32 1, %s4071_s18  }
 0x389   : > { %2597 = vmatprep.subr.bf16.mxu1 %v5428_v56  ;;  %2473 = vmatprep.subr.bf16.mxu0 %v5428_v56  ;;  %s3427_s14 = sshll.u32 %s392_s25, 3  ;;  %s3337_s13 = scalar_lea.sflag [#allocation4], %s392_s25 }
 0x38b   : > { %2598 = vmatpush1.bf16.msra.mxu1 %v5442_v38 }
 0x38c   : > { %2061 = vrot.lane.b32.xlu0 %v2045_v16, %s4096_s24  ;;  %2474 = vmatpush1.bf16.msra.mxu0 %v5442_v38  ;;  %v5520_v16 = vld [vmem:[%s6202_s3 + $0x64] ss:$8 sps:$4 sm:$0xff]  }
 0x38d   : > { %v5409_v10 = vpop.permute.xlu0 %1928 }
 0x390   : > { %1926 = vrot.lane.b32.xlu0 %v5341_v41, %s4096_s24 }
 0x3ab   : > { %v1694_v62 = vpop.permute.xlu1 %1693 }
 0x3ac   : > { %v1696_v47 = vmax.f32 %v1685_v52, %v1694_v62  ;;  %v5629_v52 = vld [vmem:[%s6202_s3 + $0xd0] ss:$8 sps:$4 sm:$0xff]  }
 0x3ae   : > { %v1697_v58 = vadd.f32 %v5357_v7, %v1696_v47 }
 0x3af   : > { %v1935_v29 = vpop.permute.xlu1 %1934 }
 0x3b0   : > { %v1698_v32 = vmax.f32 %v1697_v58, 0.0  ;;  %v1936_v34 = vsel %vm720_vm13, %v5409_v10, %v1935_v29 }
 0x3b1   : > { %v1938_v36 = vmax.f32 %v5343_v0, %v1936_v34  ;;  %v5447_v0 = vld [vmem:[%s6202_s3 + $0x24] ss:$8 sps:$4 sm:$0xff]  }
 0x3b2   : > { %v1699_v26 = vpack.c.bf16 %v1698_v32, %v1698_v32  ;;  %2599 = vmatprep.subr.bf16.mxu1 %v5447_v0  ;;  %2475 = vmatprep.subr.bf16.mxu0 %v5447_v0 }
 0x3b3   : > { %1940 = vrot.lane.b32.xlu0 %v1938_v36, %s4097_s15  ;;  %v5435_v2 = vpop.permute.xlu0 %2081  ;;  %2600 = vmatpush1.bf16.msra.mxu1 %v5460_v12 }
 0x3b4   : > { %2096 = vrot.lane.b32.xlu1 %v1699_v26, %s6244_s26  ;;  %2476 = vmatpush1.bf16.msra.mxu0 %v5460_v12 }
 0x3b5   : > { %2601 = vmatprep.subr.bf16.mxu1 %v5465_v21  ;;  %2477 = vmatprep.subr.bf16.mxu0 %v5465_v21 }
 0x3b7   : > { %718 = vrot.lane.b32.xlu0 %v4734_v40, %s4096_s24  ;;  %v5468_v27 = vpop.permute.xlu0 %2087  ;;  %2602 = vmatpush1.bf16.msra.mxu1 %v5484_v44 }
 0x3b8   : > { %v2085_v14 = vpop.permute.xlu1 %2084  ;;  %725 = vrot.lane.b32.xlu1 %v4730_v37, %s4096_s24  ;;  %2478 = vmatpush1.bf16.msra.mxu0 %v5484_v44 }
 0x3b9   : > { %v2121_v45 = vsel %vm1121_vm5, %v5435_v2, %v2085_v14  ;;  %2603 = vmatprep.subr.bf16.mxu1 %v5489_v39  ;;  %2479 = vmatprep.subr.bf16.mxu0 %v5489_v39 }
 0x3ba   : > { %v5474_v37 = vsel %vm1242_vm6, %v2121_v45, %v5468_v27 }
 0x3bb   : > { %6245 = vst [vmem:[#allocation9_spill] sm:$0xff] %v5474_v37  ;;  %2579 = vrot.lane.b32.xlu0 %v5474_v37, %s4097_s15  ;;  %2604 = vmatpush1.bf16.msra.mxu1 %v5499_v11  ;;  %v5562_v43 = vpop.permute.xlu0 %2075 }
 0x3bc   : > { %2480 = vmatpush1.bf16.msra.mxu0 %v5499_v11  ;;  %2605 = vmatprep.subr.bf16.mxu1 %v5504_v13 }
 0x3bd   : > { %2481 = vmatprep.subr.bf16.mxu0 %v5504_v13 }
 0x3bf   : > { %2606 = vmatpush1.bf16.msra.mxu1 %v5510_v15 }
 0x3c0   : > { %2482 = vmatpush1.bf16.msra.mxu0 %v5510_v15  ;;  %2607 = vmatprep.subr.bf16.mxu1 %v5520_v16 }
 0x3c1   : > { %2483 = vmatprep.subr.bf16.mxu0 %v5520_v16 }
 0x3c3   : > { %2608 = vmatpush1.bf16.msra.mxu1 %v5525_v17 }
 0x3c4   : > { %2484 = vmatpush1.bf16.msra.mxu0 %v5525_v17  ;;  %2609 = vmatprep.subr.bf16.mxu1 %v5530_v18 }
 0x3c5   : > { %2485 = vmatprep.subr.bf16.mxu0 %v5530_v18 }
 0x3c7   : > { %2610 = vmatpush1.bf16.msra.mxu1 %v5538_v19 }
 0x3c8   : > { %2486 = vmatpush1.bf16.msra.mxu0 %v5538_v19  ;;  %2611 = vmatprep.subr.bf16.mxu1 %v5545_v48 }
 0x3c9   : > { %2487 = vmatprep.subr.bf16.mxu0 %v5545_v48 }
 0x3cb   : > { %2612 = vmatpush1.bf16.msra.mxu1 %v5552_v49 }
 0x3cc   : > { %2488 = vmatpush1.bf16.msra.mxu0 %v5552_v49  ;;  %2613 = vmatprep.subr.bf16.mxu1 %v5559_v50 }
 0x3cd   : > { %2489 = vmatprep.subr.bf16.mxu0 %v5559_v50 }
 0x3ce   : > { %v2091_v23 = vpop.permute.xlu1 %2090 }
 0x3cf   : > { %2614 = vmatpush1.bf16.msra.mxu1 %v5568_v53  ;;  %v2128_v54 = vsel %vm1356_vm7, %v5468_v27, %v2091_v23 }
 0x3d0   : > { %2490 = vmatpush1.bf16.msra.mxu0 %v5568_v53  ;;  %2615 = vmatprep.subr.bf16.mxu1 %v5577_v59 }
 0x3d1   : > { %2491 = vmatprep.subr.bf16.mxu0 %v5577_v59 }
 0x3d2   : > { %v2079_v51 = vpop.permute.xlu1 %2078 }
 0x3d3   : > { %v2114_v55 = vsel %vm874_vm3, %v5562_v43, %v2079_v51  ;;  %2616 = vmatpush1.bf16.msra.mxu1 %v5587_v30 }
 0x3d4   : > { %v2117_v61 = vsel %vm995_vm4, %v2114_v55, %v5435_v2  ;;  %2492 = vmatpush1.bf16.msra.mxu0 %v5587_v30  ;;  %2617 = vmatprep.subr.bf16.mxu1 %v5594_v8 }
 0x3d5   : > { %2577 = vrot.lane.b32.xlu0 %v2117_v61, %s4097_s15  ;;  %2503 = vmatprep.mubr.bf16.mxu0 %v2117_v61 }
 0x3d6   : > { %2493 = vmatprep.subr.bf16.mxu0 %v5594_v8  ;;  %v2056_v24 = vpop.permute.xlu1 %2055 }
 0x3d7   : > { %2618 = vmatpush1.bf16.msra.mxu1 %v5601_v31 }
 0x3d8   : > { %2494 = vmatpush1.bf16.msra.mxu0 %v5601_v31  ;;  %2619 = vmatprep.subr.bf16.mxu1 %v5608_v42 }
 0x3d9   : > { %2495 = vmatprep.subr.bf16.mxu0 %v5608_v42 }
 0x3da   : > { %v1807_v29 = vpop.permute.xlu1 %1806 }
 0x3db   : > { %2620 = vmatpush1.bf16.msra.mxu1 %v5615_v5  ;;  %v1810_v32 = vsel %vm720_vm13, %v1807_v29, %v5398_v22 }
 0x3dc   : > { %2496 = vmatpush1.bf16.msra.mxu0 %v5615_v5  ;;  %2621 = vmatprep.subr.bf16.mxu1 %v5622_v46  ;;  %v1812_v36 = vmax.f32 %v5326_v28, %v1810_v32  ;;  %v5720_v32 = vld [vmem:[%s6202_s3 + $0x100] ss:$8 sps:$4 sm:$0xff]  }
 0x3dd   : > { %2497 = vmatprep.subr.bf16.mxu0 %v5622_v46 }
 0x3df   : > { %2622 = vmatpush1.bf16.msra.mxu1 %v5629_v52 }
 0x3e0   : > { %2498 = vmatpush1.bf16.msra.mxu0 %v5629_v52  ;;  %2623 = vmatprep.subr.bf16.mxu1 %v5636_v33 }
 0x3e1   : > { %2499 = vmatprep.subr.bf16.mxu0 %v5636_v33 }
 0x3e3   : > { %2624 = vmatpush1.bf16.msra.mxu1 %v5643_v1 }
 0x3e4   : > { %2500 = vmatpush1.bf16.msra.mxu0 %v5643_v1  ;;  %2625 = vmatprep.subr.bf16.mxu1 %v5650_v20 }
 0x3e5   : > { %2501 = vmatprep.subr.bf16.mxu0 %v5650_v20 }
 0x3e7   : > { %2626 = vmatpush1.bf16.msra.mxu1 %v5657_v57 }
 0x3e8   : > { %2502 = vmatpush1.bf16.msra.mxu0 %v5657_v57  ;;  %2636 = vmatprep.subr.bf16.mxu1 %v5667_v4 }
 0x3e9   : > { %2512 = vmatprep.subr.bf16.mxu0 %v5667_v4 }
 0x3f9   : > { %v1821_v34 = vpop.permute.xlu1 %1820 }
 0x3fa   : > { %v2094_v60 = vpop.permute.xlu0 %2093  ;;  %v1823_v26 = vmax.f32 %v1812_v36, %v1821_v34  ;;  %v5726_v36 = vld [vmem:[%s6202_s3 + $0x114] ss:$8 sps:$4 sm:$0xff]  }
 0x3fb   : > { %v5674_v9 = vsel %vm1476_vm8, %v2128_v54, %v2094_v60 }
 0x3fc   : > { %2581 = vrot.lane.b32.xlu1 %v5674_v9, %s4097_s15  ;;  %v1824_v14 = vadd.f32 %v5357_v7, %v1823_v26 }
 0x3fe   : > { %v2062_v62 = vpop.permute.xlu0 %2061  ;;  %v1825_v23 = vmax.f32 %v1824_v14, 0.0 }
 0x3ff   : > { %v2063_v47 = vsel %vm720_vm13, %v2056_v24, %v2062_v62 }
 0x400   : > { %v2065_v58 = vmax.f32 %v5379_v25, %v2063_v47  ;;  %2053 = vrot.lane.b32.xlu1 %v5376_v6, %s4096_s24 }
 0x402   : > { %2067 = vrot.lane.b32.xlu0 %v2065_v58, %s4097_s15  ;;  %v1927_v2 = vpop.permute.xlu0 %1926 }
 0x403   : > { %v1930_v25 = vsel %vm720_vm13, %v1927_v2, %v5409_v10  ;;  %v1826_v10 = vpack.c.bf16 %v1825_v23, %v1825_v23 }
 0x404   : > { %v1932_v27 = vmax.f32 %v5341_v41, %v1930_v25  ;;  %v5733_v25 = vld [vmem:[%s6202_s3 + $0x110] ss:$8 sps:$4 sm:$0xff]  }
 0x406   : > { %716 = vrot.lane.b32.xlu0 %v4728_v3, %s4096_s24  ;;  %s6251_s24 = smov 8  }
 0x425   : > { %v1941_v45 = vpop.permute.xlu0 %1940 }
 0x426   : > { %v1943_v51 = vmax.f32 %v1932_v27, %v1941_v45  ;;  %v5692_v55 = vpop.permute.xlu1 %2096  ;;  %v5740_v27 = vld [vmem:[%s6202_s3 + $0x124] ss:$8 sps:$4 sm:$0xff]  }
 0x427   : > { %v5696_v22 = vsel %vm1590_vm9, %v2094_v60, %v5692_v55 }
 0x428   : > { %6250 = vst [vmem:[#allocation14_spill] sm:$0xff] %v5696_v22  ;;  %v1944_v28 = vadd.f32 %v5357_v7, %v1943_v51  ;;  %2583 = vrot.lane.b32.xlu1 %v5696_v22, %s4097_s15 }
 0x429   : > { %v5701_v61 = vpop.permute.xlu0 %718 }
 0x42a   : > { %v1945_v54 = vmax.f32 %v1944_v28, 0.0  ;;  %v726_v62 = vpop.permute.xlu1 %725  ;;  %v5747_v28 = vld [vmem:[%s6202_s3 + $0x120] ss:$8 sps:$4 sm:$0xff]  }
 0x42b   : > { %v727_v41 = vsel %vm720_vm13, %v5701_v61, %v726_v62  ;;  %v5766_v62 = vld [vmem:[%s6202_s3 + $0x144] ss:$8 sps:$4 sm:$0xff]  }
 0x42c   : > { %v1946_v47 = vpack.c.bf16 %v1945_v54, %v1945_v54  ;;  %2099 = vrot.lane.b32.xlu1 %v1826_v10, %s6251_s24  ;;  %v729_v58 = vmax.f32 %v4734_v40, %v727_v41  ;;  %s3616_s24 = sshll.u32 %s4183_s21, 7 }
 0x42d   : > { %v2580_v60 = vpop.permute.xlu0 %2579 }
 0x42e   : > { %2102 = vrot.lane.b32.xlu0 %v1946_v47, %s6252_s30  ;;  %v5773_v47 = vld [vmem:[%s6202_s3 + $0x140] ss:$8 sps:$4 sm:$0xff]  }
 0x430   : > { %731 = vrot.lane.b32.xlu1 %v729_v58, %s4097_s15  ;;  %v5779_v58 = vld [vmem:[%s6202_s3 + $0x154] ss:$8 sps:$4 sm:$0xff]  }
 0x434   : > { %2809 = vrot.lane.b32.xlu1 %v5696_v22, %s6252_s30 }
 0x438   : > { %2807 = vrot.lane.b32.xlu1 %v5674_v9, %s6252_s30 }
 0x43c   : > { %2694 = vrot.lane.b32.xlu1 %v5674_v9, %s4098_s29 }
 0x440   : > { %2692 = vrot.lane.b32.xlu1 %v5474_v37, %s4098_s29 }
 0x447   : > { %v2578_v40 = vpop.permute.xlu0 %2577 }
 0x448   : > { %v2586_v26 = vsel %vm2585_vm14, %v2578_v40, %v2580_v60  ;;  %v5791_v40 = vld [vmem:[%s6202_s3 + $0x164] ss:$8 sps:$4 sm:$0xff]  }
 0x46e   : > { %v2582_v29 = vpop.permute.xlu1 %2581 }
 0x46f   : > { %v2587_v34 = vsel %vm2585_vm14, %v2580_v60, %v2582_v29  ;;  %v5785_v60 = vld [vmem:[%s6202_s3 + $0x150] ss:$8 sps:$4 sm:$0xff]  }
 0x470   : > { %2627 = vmatprep.mubr.bf16.mxu1 %v2587_v34  ;;  %v5797_v34 = vld [vmem:[%s6202_s3 + $0x160] ss:$8 sps:$4 sm:$0xff]  }
 0x471   : > { %2628 = vmatmul.mubr.bf16.vlgmr.msra.gmra.mrb[48].mxu1 %v2586_v26  ;;  %v5803_v26 = vld [vmem:[%s6202_s3 + $0x174] ss:$8 sps:$4 sm:$0xff]  }
 0x472   : > { %2637 = vmatpush1.bf16.msra.mxu1 %v5720_v32  ;;  %v2054_v2 = vpop.permute.xlu1 %2053 }
 0x473   : > { %v2057_v14 = vsel %vm720_vm13, %v2054_v2, %v2056_v24  ;;  %2638 = vmatprep.subr.bf16.mxu1 %v5726_v36  ;;  %v5753_v24 = vld [vmem:[%s6202_s3 + $0x134] ss:$8 sps:$4 sm:$0xff]   ;;  %v5809_v2 = vld [vmem:[%s6202_s3 + $0x170] ss:$8 sps:$4 sm:$0xff]  }
 0x474   : > { %v2068_v45 = vpop.permute.xlu0 %2067  ;;  %v2059_v23 = vmax.f32 %v5376_v6, %v2057_v14  ;;  %v5760_v6 = vld [vmem:[%s6202_s3 + $0x130] ss:$8 sps:$4 sm:$0xff]   ;;  %v5815_v14 = vld [vmem:[%s6202_s3 + $0x184] ss:$8 sps:$4 sm:$0xff]  }
 0x476   : > { %v2070_v51 = vmax.f32 %v2059_v23, %v2068_v45  ;;  %2639 = vmatpush1.bf16.msra.mxu1 %v5733_v25  ;;  %v5821_v45 = vld [vmem:[%s6202_s3 + $0x180] ss:$8 sps:$4 sm:$0xff]   ;;  %v5827_v23 = vld [vmem:[%s6202_s3 + $0x194] ss:$8 sps:$4 sm:$0xff]  }
 0x477   : > { %2640 = vmatprep.subr.bf16.mxu1 %v5740_v27 }
 0x478   : > { %v2071_v10 = vadd.f32 %v5357_v7, %v2070_v51  ;;  %v5833_v51 = vld [vmem:[%s6202_s3 + $0x190] ss:$8 sps:$4 sm:$0xff]   ;;  %v717_v22 = vpop.permute.xlu0 %716 }
 0x479   : > { %v721_v57 = vsel %vm720_vm13, %v717_v22, %v5701_v61  ;;  %v6258_v61 = vld [vmem:[#allocation13_spill] sm:$0xff] }
 0x47a   : > { %v2072_v54 = vmax.f32 %v2071_v10, 0.0  ;;  %2641 = vmatpush1.bf16.msra.mxu1 %v5747_v28  ;;  %v5839_v10 = vld [vmem:[%s6202_s3 + $0x1a4] ss:$8 sps:$4 sm:$0xff]  }
 0x47b   : > { %2642 = vmatprep.subr.bf16.mxu1 %v5753_v24 }
 0x47c   : > { %v2073_v41 = vpack.c.bf16 %v2072_v54, %v2072_v54  ;;  %v5845_v54 = vld [vmem:[%s6202_s3 + $0x1a0] ss:$8 sps:$4 sm:$0xff]  }
 0x47e   : > { %2643 = vmatpush1.bf16.msra.mxu1 %v5760_v6  ;;  %2105 = vrot.lane.b32.xlu0 %v2073_v41, %s6253_s12  ;;  %s394_s12 = scalar_lea.vmem [#allocation5], %s3427_s14  ;;  %s4101_s14 = smov [#allocation5]  }
 0x47f   : > { %2644 = vmatprep.subr.bf16.mxu1 %v5766_v62  ;;  %s3350_s22 = sshll.u32 %s394_s12, 4  ;;  %s4017_s16 = sshll.u32 %s4101_s14, 4  ;;  %s6159_s22 = int_to_ptr.vmem [resolvable:$true] %s3350_s22  ;;  %s4018_s16 = int_to_ptr.vmem [resolvable:$false] %s4017_s16 }
 0x480   : > { %s4013_s21 = scalar_lea.vmem %s6159_s22, 128  ;;  %p4020_p2 = scmp.lt.s32.totalorder %s6159_s22, %s4018_s16 }
 0x481   : > { %p4014_p6 = scmp.ne.s32.totalorder %s6159_s22, %s4013_s21 }
 0x482   : > { %2645 = vmatpush1.bf16.msra.mxu1 %v5773_v47 }
 0x483   : > { %2646 = vmatprep.subr.bf16.mxu1 %v5779_v58  ;;  %p4015_p10 = pnand %p4014_p6, %p6260_p9 }
 0x485   : > { %p4016_p12 = pneg %p4015_p10 }
 0x486   : > { %2647 = vmatpush1.bf16.msra.mxu1 %v5785_v60 }
 0x487   : > { %2648 = vmatprep.subr.bf16.mxu1 %v5791_v40 }
 0x48a   : > { %2649 = vmatpush1.bf16.msra.mxu1 %v5797_v34 }
 0x48b   : > { %2650 = vmatprep.subr.bf16.mxu1 %v5803_v26 }
 0x48e   : > { %2651 = vmatpush1.bf16.msra.mxu1 %v5809_v2 }
 0x48f   : > { %2652 = vmatprep.subr.bf16.mxu1 %v5815_v14 }
 0x492   : > { %2653 = vmatpush1.bf16.msra.mxu1 %v5821_v45 }
 0x493   : > { %2654 = vmatprep.subr.bf16.mxu1 %v5827_v23 }
 0x496   : > { %2655 = vmatpush1.bf16.msra.mxu1 %v5833_v51 }
 0x497   : > { %2656 = vmatprep.subr.bf16.mxu1 %v5839_v10 }
 0x49a   : > { %2657 = vmatpush1.bf16.msra.mxu1 %v5845_v54  ;;  %v2584_v41 = vpop.permute.xlu1 %2583 }
 0x49b   : > { %v2588_v4 = vsel %vm2585_vm14, %v2582_v29, %v2584_v41  ;;  %3577 = vmatprep.mubr.msk.bf16.mxu1 %vm1356_vm7, %v2584_v41  ;;  %2824 = vmatprep.subr.bf16.mxu1 %v5415_v63  ;;  %v723_v41 = vmax.f32 %v4728_v3, %v721_v57  ;;  %v6256_v57 = vld [vmem:[#allocation9_spill] sm:$0xff] }
 0x49d   : > { %2669 = vmatmul.mubr.bf16.vlgmr.msra.gmra.mrb[48].mxu1 %v2588_v4 }
 0x49e   : > { %v2100_v37 = vpop.permute.xlu1 %2099  ;;  %2825 = vmatpush1.bf16.msra.mxu1 %v5423_v35 }
 0x49f   : > { %v2137_v20 = vsel %vm1716_vm10, %v5692_v55, %v2100_v37  ;;  %2826 = vmatprep.subr.bf16.mxu1 %v5428_v56 }
 0x4a0   : > { %v5858_v1 = vpop.permute.xlu0 %2102 }
 0x4a1   : > { %v5862_v29 = vsel %vm1837_vm11, %v2137_v20, %v5858_v1 }
 0x4a2   : > { %2811 = vrot.lane.b32.xlu0 %v5862_v29, %s6252_s30  ;;  %v732_v4 = vpop.permute.xlu1 %731  ;;  %2827 = vmatpush1.bf16.msra.mxu1 %v5442_v38 }
 0x4a3   : > { %v734_v22 = vmax.f32 %v723_v41, %v732_v4  ;;  %2828 = vmatprep.subr.bf16.mxu1 %v5447_v0  ;;  %v3576_v4 = vld [vmem:[%s6203_s4] ss:$0 sm:$0xff] }
 0x4a5   : > { %v741_v37 = vadd.f32 %v5357_v7, %v734_v22  ;;  %v6254_v7 = vld [vmem:[#allocation10_spill] sm:$0xff] }
 0x4a6   : > { %2829 = vmatpush1.bf16.msra.mxu1 %v5460_v12 }
 0x4a7   : > { %v742_v55 = vmax.f32 %v741_v37, 0.0  ;;  %2830 = vmatprep.subr.bf16.mxu1 %v5465_v21 }
 0x4a9   : > { %v743_v20 = vpack.c.bf16 %v742_v55, %v742_v55  ;;  %v3939_v55 = vld [vmem:[%s6206_s7] sm:$0xff]  }
 0x4aa   : > { %2831 = vmatpush1.bf16.msra.mxu1 %v5484_v44 }
 0x4ab   : > { %v2110_v3 = vsel %vm748_vm2, %v743_v20, %v5562_v43  ;;  %2832 = vmatprep.subr.bf16.mxu1 %v5489_v39  ;;  %v6255_v43 = vld [vmem:[#allocation11_spill] sm:$0xff] }
 0x4ac   : > { %2504 = vmatmul.mubr.bf16.vlgmr.msra.gmra.mrb[48].mxu0 %v2110_v3 }
 0x4ad   : > { %2513 = vmatpush1.bf16.msra.mxu0 %v5720_v32  ;;  %3575 = vmatprep.mubr.msk.bf16.mxu0 %vm1356_vm7, %v5674_v9  ;;  %v6257_v9 = vld [vmem:[#allocation12_spill] sm:$0xff] }
 0x4ae   : > { %2514 = vmatprep.subr.bf16.mxu0 %v5726_v36  ;;  %2833 = vmatpush1.bf16.msra.mxu1 %v5499_v11 }
 0x4af   : > { %2834 = vmatprep.subr.bf16.mxu1 %v5504_v13 }
 0x4b1   : > { %2515 = vmatpush1.bf16.msra.mxu0 %v5733_v25 }
 0x4b2   : > { %2516 = vmatprep.subr.bf16.mxu0 %v5740_v27  ;;  %2835 = vmatpush1.bf16.msra.mxu1 %v5510_v15 }
 0x4b3   : > { %2836 = vmatprep.subr.bf16.mxu1 %v5520_v16 }
 0x4b5   : > { %2517 = vmatpush1.bf16.msra.mxu0 %v5747_v28 }
 0x4b6   : > { %2518 = vmatprep.subr.bf16.mxu0 %v5753_v24  ;;  %2837 = vmatpush1.bf16.msra.mxu1 %v5525_v17 }
 0x4b7   : > { %2838 = vmatprep.subr.bf16.mxu1 %v5530_v18 }
 0x4b9   : > { %2519 = vmatpush1.bf16.msra.mxu0 %v5760_v6 }
 0x4ba   : > { %2520 = vmatprep.subr.bf16.mxu0 %v5766_v62  ;;  %2839 = vmatpush1.bf16.msra.mxu1 %v5538_v19 }
 0x4bb   : > { %2840 = vmatprep.subr.bf16.mxu1 %v5545_v48 }
 0x4bd   : > { %2521 = vmatpush1.bf16.msra.mxu0 %v5773_v47 }
 0x4be   : > { %2522 = vmatprep.subr.bf16.mxu0 %v5779_v58  ;;  %2841 = vmatpush1.bf16.msra.mxu1 %v5552_v49 }
 0x4bf   : > { %2842 = vmatprep.subr.bf16.mxu1 %v5559_v50 }
 0x4c1   : > { %2523 = vmatpush1.bf16.msra.mxu0 %v5785_v60 }
 0x4c2   : > { %2524 = vmatprep.subr.bf16.mxu0 %v5791_v40  ;;  %2843 = vmatpush1.bf16.msra.mxu1 %v5568_v53 }
 0x4c3   : > { %2844 = vmatprep.subr.bf16.mxu1 %v5577_v59 }
 0x4c5   : > { %2525 = vmatpush1.bf16.msra.mxu0 %v5797_v34 }
 0x4c6   : > { %2526 = vmatprep.subr.bf16.mxu0 %v5803_v26  ;;  %2845 = vmatpush1.bf16.msra.mxu1 %v5587_v30 }
 0x4c7   : > { %2846 = vmatprep.subr.bf16.mxu1 %v5594_v8 }
 0x4c9   : > { %2527 = vmatpush1.bf16.msra.mxu0 %v5809_v2 }
 0x4ca   : > { %2528 = vmatprep.subr.bf16.mxu0 %v5815_v14  ;;  %2847 = vmatpush1.bf16.msra.mxu1 %v5601_v31 }
 0x4cb   : > { %2848 = vmatprep.subr.bf16.mxu1 %v5608_v42 }
 0x4cd   : > { %2529 = vmatpush1.bf16.msra.mxu0 %v5821_v45 }
 0x4ce   : > { %2530 = vmatprep.subr.bf16.mxu0 %v5827_v23  ;;  %2849 = vmatpush1.bf16.msra.mxu1 %v5615_v5 }
 0x4cf   : > { %2850 = vmatprep.subr.bf16.mxu1 %v5622_v46 }
 0x4d1   : > { %2531 = vmatpush1.bf16.msra.mxu0 %v5833_v51 }
 0x4d2   : > { %2532 = vmatprep.subr.bf16.mxu0 %v5839_v10  ;;  %2851 = vmatpush1.bf16.msra.mxu1 %v5629_v52 }
 0x4d3   : > { %2852 = vmatprep.subr.bf16.mxu1 %v5636_v33 }
 0x4d5   : > { %2533 = vmatpush1.bf16.msra.mxu0 %v5845_v54 }
 0x4d6   : > { %2853 = vmatpush1.bf16.msra.mxu1 %v6254_v7  ;;  %2710 = vmatprep.subr.bf16.mxu0 %v5415_v63 }
 0x4d7   : > { %2854 = vmatprep.subr.bf16.mxu1 %v6255_v43 }
 0x4d8   : > { %2545 = vmatmul.mubr.bf16.vlgmr.msra.gmra.mrb[48].mxu0 %v6256_v57 }
 0x4d9   : > { %2711 = vmatpush1.bf16.msra.mxu0 %v5423_v35 }
 0x4da   : > { %2855 = vmatpush1.bf16.msra.mxu1 %v6257_v9  ;;  %2712 = vmatprep.subr.bf16.mxu0 %v5428_v56  ;;  %v6259_v56 = vld [vmem:[#allocation14_spill] sm:$0xff] }
 0x4db   : > { %2865 = vmatprep.subr.bf16.mxu1 %v6258_v61 }
 0x4dd   : > { %2713 = vmatpush1.bf16.msra.mxu0 %v5442_v38  ;;  %v2810_v38 = vpop.permute.xlu1 %2809 }
 0x4de   : > { %2714 = vmatprep.subr.bf16.mxu0 %v5447_v0 }
 0x4e1   : > { %2715 = vmatpush1.bf16.msra.mxu0 %v5460_v12  ;;  %v2808_v0 = vpop.permute.xlu1 %2807 }
 0x4e2   : > { %2716 = vmatprep.subr.bf16.mxu0 %v5465_v21 }
 0x4e5   : > { %2717 = vmatpush1.bf16.msra.mxu0 %v5484_v44  ;;  %v2815_v44 = vsel %vm1837_vm11, %v2808_v0, %v2810_v38 }
 0x4e6   : > { %2718 = vmatprep.subr.bf16.mxu0 %v5489_v39  ;;  %v2695_v39 = vpop.permute.xlu1 %2694 }
 0x4e9   : > { %2719 = vmatpush1.bf16.msra.mxu0 %v5499_v11 }
 0x4ea   : > { %2720 = vmatprep.subr.bf16.mxu0 %v5504_v13 }
 0x4ed   : > { %2721 = vmatpush1.bf16.msra.mxu0 %v5510_v15  ;;  %v2693_v15 = vpop.permute.xlu1 %2692 }
 0x4ee   : > { %2722 = vmatprep.subr.bf16.mxu0 %v5520_v16 }
 0x4f0   : > { %v2106_v63 = vpop.permute.xlu0 %2105 }
 0x4f1   : > { %v2143_v35 = vsel %vm1963_vm12, %v5858_v1, %v2106_v63  ;;  %2723 = vmatpush1.bf16.msra.mxu0 %v5525_v17 }
 0x4f2   : > { %2813 = vrot.lane.b32.xlu0 %v2143_v35, %s6252_s30  ;;  %2724 = vmatprep.subr.bf16.mxu0 %v5530_v18  ;;  %v2701_v18 = vsel %vm2700_vm15, %v2693_v15, %v2695_v39 }
 0x4f5   : > { %2725 = vmatpush1.bf16.msra.mxu0 %v5538_v19 }
 0x4f6   : > { %2696 = vrot.lane.b32.xlu0 %v6259_v56, %s4098_s29  ;;  %2726 = vmatprep.subr.bf16.mxu0 %v5545_v48 }
 0x4f9   : > { %2727 = vmatpush1.bf16.msra.mxu0 %v5552_v49 }
 0x4fa   : > { %2698 = vrot.lane.b32.xlu0 %v5862_v29, %s4098_s29  ;;  %2728 = vmatprep.subr.bf16.mxu0 %v5559_v50  ;;  %s6157_s29 = scalar_lea.hbm %s6210_s11, %s3616_s24 }
 0x4fd   : > { %2729 = vmatpush1.bf16.msra.mxu0 %v5568_v53 }
 0x4fe   : > { %2730 = vmatprep.subr.bf16.mxu0 %v5577_v59 }
 0x501   : > { %2731 = vmatpush1.bf16.msra.mxu0 %v5587_v30 }
 0x502   : > { %2732 = vmatprep.subr.bf16.mxu0 %v5594_v8 }
 0x505   : > { %2733 = vmatpush1.bf16.msra.mxu0 %v5601_v31 }
 0x506   : > { %2734 = vmatprep.subr.bf16.mxu0 %v5608_v42 }
 0x509   : > { %2735 = vmatpush1.bf16.msra.mxu0 %v5615_v5 }
 0x50a   : > { %2736 = vmatprep.subr.bf16.mxu0 %v5622_v46 }
 0x50d   : > { %2737 = vmatpush1.bf16.msra.mxu0 %v5629_v52 }
 0x50e   : > { %2738 = vmatprep.subr.bf16.mxu0 %v5636_v33 }
 0x511   : > { %2739 = vmatpush1.bf16.msra.mxu0 %v6254_v7  ;;  %v4099_v7 = vmov 0.0  }
 0x512   : > { %2740 = vmatprep.subr.bf16.mxu0 %v6255_v43 }
 0x514   : > { %v2812_v12 = vpop.permute.xlu0 %2811 }
 0x515   : > { %v2816_v21 = vsel %vm1837_vm11, %v2810_v38, %v2812_v12  ;;  %2741 = vmatpush1.bf16.msra.mxu0 %v6257_v9  ;;  %v3940_v9 = vld [vmem:[%s6206_s7 + $0x8] sm:$0xff]   ;;  %v3941_v38 = vld [vmem:[%s6206_s7 + $0x10] sm:$0xff]  }
 0x516   : > { %2856 = vmatprep.mubr.bf16.mxu1 %v2816_v21  ;;  %2751 = vmatprep.subr.bf16.mxu0 %v6258_v61  ;;  %v3942_v21 = vld [vmem:[%s6206_s7 + $0x18] sm:$0xff]  }
 0x517   : > { %2857 = vmatmul.mubr.bf16.vlgmr.msra.gmra.mrb[52].mxu1 %v2815_v44  ;;  %v3943_v44 = vld [vmem:[%s6206_s7 + $0x20] sm:$0xff]  }
 0x518   : > { %2866 = vmatpush1.bf16.msra.mxu1 %v5720_v32 }
 0x519   : > { %2867 = vmatprep.subr.bf16.mxu1 %v5726_v36 }
 0x51c   : > { %2868 = vmatpush1.bf16.msra.mxu1 %v5733_v25 }
 0x51d   : > { %2869 = vmatprep.subr.bf16.mxu1 %v5740_v27 }
 0x520   : > { %2870 = vmatpush1.bf16.msra.mxu1 %v5747_v28 }
 0x521   : > { %2871 = vmatprep.subr.bf16.mxu1 %v5753_v24 }
 0x524   : > { %2872 = vmatpush1.bf16.msra.mxu1 %v5760_v6 }
 0x525   : > { %2873 = vmatprep.subr.bf16.mxu1 %v5766_v62 }
 0x528   : > { %2874 = vmatpush1.bf16.msra.mxu1 %v5773_v47 }
 0x529   : > { %2875 = vmatprep.subr.bf16.mxu1 %v5779_v58 }
 0x52c   : > { %2876 = vmatpush1.bf16.msra.mxu1 %v5785_v60 }
 0x52d   : > { %2877 = vmatprep.subr.bf16.mxu1 %v5791_v40 }
 0x530   : > { %2878 = vmatpush1.bf16.msra.mxu1 %v5797_v34 }
 0x531   : > { %2879 = vmatprep.subr.bf16.mxu1 %v5803_v26 }
 0x534   : > { %2880 = vmatpush1.bf16.msra.mxu1 %v5809_v2 }
 0x535   : > { %2881 = vmatprep.subr.bf16.mxu1 %v5815_v14 }
 0x538   : > { %2882 = vmatpush1.bf16.msra.mxu1 %v5821_v45 }
 0x539   : > { %2883 = vmatprep.subr.bf16.mxu1 %v5827_v23 }
 0x53c   : > { %2884 = vmatpush1.bf16.msra.mxu1 %v5833_v51 }
 0x53d   : > { %2885 = vmatprep.subr.bf16.mxu1 %v5839_v10 }
 0x540   : > { %2886 = vmatpush1.bf16.msra.mxu1 %v5845_v54 }
 0x541   : > { %3659 = vmatprep.subr.bf16.mxu1 %v4099_v7 }
 0x564   : > { %v2814_v11 = vpop.permute.xlu0 %2813 }
 0x565   : > { %v2817_v13 = vsel %vm1837_vm11, %v2812_v12, %v2814_v11  ;;  %3579 = vmatprep.mubr.msk.bf16.mxu1 %vm1356_vm7, %v2814_v11 }
 0x566   : > { %2898 = vmatmul.mubr.bf16.vlgmr.msra.gmra.mrb[52].mxu1 %v2817_v13 }
 0x567   : > { %3660 = vmatpush3.bf16.msra.mxu1 %v3939_v55  ;;  %3675 = vmatprep.mubr.msk.bf16.mxu1 %vm4100_vm0, %v4099_v7  ;;  %v3606_v55 = vld [vmem:[%s6209_s10] ss:$0 sm:$0xff] }
 0x568   : > { %v2697_v16 = vpop.permute.xlu0 %2696  ;;  %3661 = vmatprep.subr.bf16.mxu1 %v4099_v7 }
 0x569   : > { %v2702_v17 = vsel %vm2700_vm15, %v2695_v39, %v2697_v16  ;;  %v3944_v39 = vld [vmem:[%s6206_s7 + $0x28] sm:$0xff]  }
 0x56a   : > { %2742 = vmatprep.mubr.bf16.mxu0 %v2702_v17 }
 0x56b   : > { %2743 = vmatmul.mubr.bf16.vlgmr.msra.gmra.mrb[52].mxu0 %v2701_v18  ;;  %3662 = vmatpush3.bf16.msra.mxu1 %v3940_v9 }
 0x56c   : > { %2752 = vmatpush1.bf16.msra.mxu0 %v5720_v32  ;;  %v2699_v19 = vpop.permute.xlu0 %2698  ;;  %3663 = vmatprep.subr.bf16.mxu1 %v4099_v7 }
 0x56d   : > { %3578 = vmatprep.mubr.msk.bf16.mxu0 %vm1356_vm7, %v2699_v19  ;;  %2753 = vmatprep.subr.bf16.mxu0 %v5726_v36  ;;  %v2703_v59 = vsel %vm2700_vm15, %v2697_v16, %v2699_v19  ;;  %v3923_v36 = vld [vmem:[%s6204_s5 + $0x40] sm:$0xff]  }
 0x56f   : > { %3664 = vmatpush3.bf16.msra.mxu1 %v3941_v38 }
 0x570   : > { %v5994_v48 = vpop.f32.mrb[48].mxu1  ;;  %2754 = vmatpush1.bf16.msra.mxu0 %v5733_v25  ;;  %v3924_v25 = vld [vmem:[%s6204_s5] sm:$0xff]   ;;  %3665 = vmatprep.subr.bf16.mxu1 %v4099_v7 }
 0x571   : > { %v5997_v49 = vpop.f32.mrb[49].mxu1  ;;  %2755 = vmatprep.subr.bf16.mxu0 %v5740_v27  ;;  %v3925_v27 = vld [vmem:[%s6204_s5 + $0x48] sm:$0xff]  }
 0x572   : > { %v2674_v50 = vpop.f32.mrb[50].mxu1 }
 0x573   : > { %v2675_v53 = vpop.f32.mrb[51].mxu1  ;;  %3666 = vmatpush3.bf16.msra.mxu1 %v3942_v21 }
 0x574   : > { %2756 = vmatpush1.bf16.msra.mxu0 %v5747_v28  ;;  %3667 = vmatprep.subr.bf16.mxu1 %v4099_v7 }
 0x575   : > { %2757 = vmatprep.subr.bf16.mxu0 %v5753_v24 }
 0x577   : > { %3668 = vmatpush3.bf16.msra.mxu1 %v3943_v44 }
 0x578   : > { %2758 = vmatpush1.bf16.msra.mxu0 %v5760_v6  ;;  %v3926_v6 = vld [vmem:[%s6204_s5 + $0x8] sm:$0xff]   ;;  %3669 = vmatprep.subr.bf16.mxu1 %v4099_v7 }
 0x579   : > { %2759 = vmatprep.subr.bf16.mxu0 %v5766_v62  ;;  %v3927_v62 = vld [vmem:[%s6204_s5 + $0x50] sm:$0xff]  }
 0x57b   : > { %3670 = vmatpush3.bf16.msra.mxu1 %v3944_v39 }
 0x57c   : > { %2760 = vmatpush1.bf16.msra.mxu0 %v5773_v47  ;;  %v3928_v47 = vld [vmem:[%s6204_s5 + $0x10] sm:$0xff]   ;;  %3671 = vmatprep.subr.bf16.mxu1 %v4099_v7 }
 0x57d   : > { %2761 = vmatprep.subr.bf16.mxu0 %v5779_v58  ;;  %v3929_v58 = vld [vmem:[%s6204_s5 + $0x58] sm:$0xff]  }
 0x580   : > { %2762 = vmatpush1.bf16.msra.mxu0 %v5785_v60  ;;  %v3930_v60 = vld [vmem:[%s6204_s5 + $0x18] sm:$0xff]  }
 0x581   : > { %2763 = vmatprep.subr.bf16.mxu0 %v5791_v40  ;;  %v3931_v40 = vld [vmem:[%s6204_s5 + $0x60] sm:$0xff]  }
 0x584   : > { %2764 = vmatpush1.bf16.msra.mxu0 %v5797_v34  ;;  %v3932_v34 = vld [vmem:[%s6204_s5 + $0x20] sm:$0xff]  }
 0x585   : > { %2765 = vmatprep.subr.bf16.mxu0 %v5803_v26  ;;  %v3933_v26 = vld [vmem:[%s6204_s5 + $0x68] sm:$0xff]  }
 0x588   : > { %2766 = vmatpush1.bf16.msra.mxu0 %v5809_v2  ;;  %v3934_v2 = vld [vmem:[%s6204_s5 + $0x28] sm:$0xff]  }
 0x589   : > { %2767 = vmatprep.subr.bf16.mxu0 %v5815_v14  ;;  %v3935_v14 = vld [vmem:[%s6204_s5 + $0x70] sm:$0xff]  }
 0x58c   : > { %2768 = vmatpush1.bf16.msra.mxu0 %v5821_v45  ;;  %v3936_v45 = vld [vmem:[%s6204_s5 + $0x30] sm:$0xff]  }
 0x58d   : > { %2769 = vmatprep.subr.bf16.mxu0 %v5827_v23  ;;  %v3937_v23 = vld [vmem:[%s6204_s5 + $0x78] sm:$0xff]  }
 0x590   : > { %2770 = vmatpush1.bf16.msra.mxu0 %v5833_v51 }
 0x591   : > { %2771 = vmatprep.subr.bf16.mxu0 %v5839_v10  ;;  %v3938_v10 = vld [vmem:[%s6204_s5 + $0x38] sm:$0xff]  }
 0x594   : > { %2772 = vmatpush1.bf16.msra.mxu0 %v5845_v54 }
 0x595   : > { %3619 = vmatprep.subr.bf16.mxu0 %v3923_v36  ;;  %v3947_v36 = vld [vmem:[#allocation2] sm:$0xff]  }
 0x597   : > { %2784 = vmatmul.mubr.bf16.vlgmr.msra.gmra.mrb[52].mxu0 %v2703_v59 }
 0x598   : > { %3620 = vmatpush3.bf16.msra.mxu0 %v3924_v25  ;;  %v3948_v25 = vld [vmem:[#allocation2 + $0x8] sm:$0xff]  }
 0x599   : > { %3621 = vmatprep.subr.bf16.mxu0 %v3925_v27  ;;  %v3949_v27 = vld [vmem:[#allocation2 + $0x10] sm:$0xff]  }
 0x59c   : > { %3622 = vmatpush3.bf16.msra.mxu0 %v3926_v6  ;;  %v3952_v6 = vld [vmem:[#allocation2 + $0x28] sm:$0xff]  }
 0x59d   : > { %3623 = vmatprep.subr.bf16.mxu0 %v3927_v62 }
 0x5a0   : > { %3624 = vmatpush3.bf16.msra.mxu0 %v3928_v47  ;;  %v3580_v47 = vld [vmem:[%s6205_s6] ss:$0 sm:$0xff] }
 0x5a1   : > { %3625 = vmatprep.subr.bf16.mxu0 %v3929_v58 }
 0x5a4   : > { %3626 = vmatpush3.bf16.msra.mxu0 %v3930_v60 }
 0x5a5   : > { %3627 = vmatprep.subr.bf16.mxu0 %v3931_v40 }
 0x5a8   : > { %3628 = vmatpush3.bf16.msra.mxu0 %v3932_v34 }
 0x5a9   : > { %3629 = vmatprep.subr.bf16.mxu0 %v3933_v26 }
 0x5ab   : > { %v6018_v30 = vpop.f32.mrb[48].mxu0 }
 0x5ac   : > { %v6020_v8 = vpop.f32.mrb[49].mxu0  ;;  %3630 = vmatpush3.bf16.msra.mxu0 %v3934_v2 }
 0x5ad   : > { %v2550_v31 = vpop.f32.mrb[50].mxu0  ;;  %3631 = vmatprep.subr.bf16.mxu0 %v3935_v14 }
 0x5ae   : > { %v2551_v42 = vpop.f32.mrb[51].mxu0 }
 0x5b0   : > { %3632 = vmatpush3.bf16.msra.mxu0 %v3936_v45  ;;  %v3953_v45 = vld [vmem:[#allocation2 + $0x30] sm:$0xff]  }
 0x5b1   : > { %3633 = vmatprep.subr.bf16.mxu0 %v3937_v23  ;;  %v3954_v23 = vld [vmem:[#allocation2 + $0x38] sm:$0xff]  }
 0x5b4   : > { %3634 = vmatpush3.bf16.msra.mxu0 %v3938_v10 }
 0x5b5   : > { %3679 = vmatprep.subr.bf16.mxu0 %v4099_v7 }
 0x639   : > { %v2899_v5 = vpop.f32.mrb[52].mxu1 }
 0x63a   : > { %2907 = vrot.lane.b32.xlu1 %v2899_v5, %s6244_s26  ;;  %v2901_v46 = vpop.f32.mrb[53].mxu1 }
 0x63b   : > { %2912 = vrot.lane.b32.xlu0 %v2901_v46, %s6244_s26  ;;  %v2903_v52 = vpop.f32.mrb[54].mxu1 }
 0x63c   : > { %v2904_v33 = vpop.f32.mrb[55].mxu1 }
 0x63e   : > { %2678 = vrot.lane.b32.xlu1 %v5994_v48, %s6244_s26 }
 0x63f   : > { %2683 = vrot.lane.b32.xlu0 %v5997_v49, %s6244_s26 }
 0x66a   : > { %v6028_v1 = vpop.f32.mrb[52].mxu0 }
 0x66b   : > { %2793 = vrot.lane.b32.xlu1 %v6028_v1, %s6244_s26  ;;  %v6032_v32 = vpop.f32.mrb[53].mxu0 }
 0x66c   : > { %2798 = vrot.lane.b32.xlu0 %v6032_v32, %s6244_s26  ;;  %v2789_v28 = vpop.f32.mrb[54].mxu0 }
 0x66d   : > { %v2790_v24 = vpop.f32.mrb[55].mxu0  ;;  %v3950_v28 = vld [vmem:[#allocation2 + $0x18] sm:$0xff]  }
 0x66e   : > { %v3951_v24 = vld [vmem:[#allocation2 + $0x20] sm:$0xff]  }
 0x66f   : > { %2554 = vrot.lane.b32.xlu1 %v6018_v30, %s6244_s26 }
 0x670   : > { %2559 = vrot.lane.b32.xlu0 %v6020_v8, %s6244_s26 }
 0x6ac   : > { %v2908_v51 = vpop.permute.xlu1 %2907 }
 0x6ad   : > { %v2910_v54 = vmax.f32 %v2899_v5, %v2908_v51  ;;  %v2913_v29 = vpop.permute.xlu0 %2912  ;;  %v3597_v51 = vld [vmem:[%s6207_s8] ss:$0 sm:$0xff] }
 0x6ae   : > { %v2915_v41 = vmax.f32 %v2901_v46, %v2913_v29 }
 0x6b0   : > { %v2916_v22 = vmax.f32 %v2910_v54, %v2915_v41  ;;  %v2679_v37 = vpop.permute.xlu1 %2678 }
 0x6b1   : > { %v2681_v20 = vmax.f32 %v5994_v48, %v2679_v37  ;;  %v2684_v3 = vpop.permute.xlu0 %2683 }
 0x6b2   : > { %v2917_v43 = vadd.f32 %v3576_v4, %v2916_v22  ;;  %v2686_v57 = vmax.f32 %v5997_v49, %v2684_v3 }
 0x6b4   : > { %v2918_v61 = vmax.f32 %v2917_v43, 0.0  ;;  %v2687_v63 = vmax.f32 %v2681_v20, %v2686_v57 }
 0x6b6   : > { %v2919_v35 = vpack.c.bf16 %v2918_v61, %v2918_v61  ;;  %v2688_v56 = vadd.f32 %v3576_v4, %v2687_v63 }
 0x6b8   : > { %v2689_v0 = vmax.f32 %v2688_v56, 0.0  ;;  %2924 = vrot.lane.b32.xlu1 %v2919_v35, %s6244_s26 }
 0x6ba   : > { %v2690_v12 = vpack.c.bf16 %v2689_v0, %v2689_v0 }
 0x6bc   : > { %2921 = vrot.lane.b32.xlu0 %v2690_v12, %s6244_s26  ;;  %s4019_s26 = scalar_lea.vmem %s4018_s16, 256 }
 0x6bd   : > { %p4021_p3 = scmp.lt.s32.totalorder %s4019_s26, %s4013_s21 }
 0x6bf   : > { %p4022_p4 = por %p4021_p3, %p4020_p2 }
 0x6c1   : > { %p4023_p7 = pnand %p4022_p4, %p4016_p12 }
 0x6dd   : > { %v2794_v11 = vpop.permute.xlu1 %2793 }
 0x6de   : > { %v2796_v13 = vmax.f32 %v6028_v1, %v2794_v11  ;;  %v2799_v15 = vpop.permute.xlu0 %2798 }
 0x6df   : > { %v2801_v16 = vmax.f32 %v6032_v32, %v2799_v15 }
 0x6e1   : > { %v2802_v17 = vmax.f32 %v2796_v13, %v2801_v16  ;;  %v2555_v18 = vpop.permute.xlu1 %2554 }
 0x6e2   : > { %v2557_v19 = vmax.f32 %v6018_v30, %v2555_v18  ;;  %v2560_v48 = vpop.permute.xlu0 %2559  ;;  %v3945_v30 = vld [vmem:[%s6206_s7 + $0x30] sm:$0xff]  }
 0x6e3   : > { %v2803_v49 = vadd.f32 %v3576_v4, %v2802_v17  ;;  %v2562_v50 = vmax.f32 %v6020_v8, %v2560_v48  ;;  %3672 = vmatpush3.bf16.msra.mxu1 %v3945_v30  ;;  %v3946_v8 = vld [vmem:[%s6206_s7 + $0x38] sm:$0xff]  }
 0x6e4   : > { %3673 = vmatprep.subr.bf16.mxu1 %v4099_v7 }
 0x6e5   : > { %v2563_v53 = vmax.f32 %v2557_v19, %v2562_v50  ;;  %v2804_v31 = vmax.f32 %v2803_v49, 0.0 }
 0x6e7   : > { %v2570_v59 = vadd.f32 %v3576_v4, %v2563_v53  ;;  %v2805_v42 = vpack.c.bf16 %v2804_v31, %v2804_v31  ;;  %3674 = vmatpush3.bf16.msra.mxu1 %v3946_v8 }
 0x6e9   : > { %v2571_v5 = vmax.f32 %v2570_v59, 0.0 }
 0x6eb   : > { %v2572_v33 = vpack.c.bf16 %v2571_v5, %v2571_v5 }
 0x72a   : > { %v2925_v46 = vpop.permute.xlu1 %2924 }
 0x72b   : > { %v2932_v52 = vsel %vm1590_vm9, %v2805_v42, %v2925_v46 }
 0x72c   : > { %3101 = vmatprep.mubr.bf16.mxu0 %v2932_v52 }
 0x72e   : > { %v2922_v1 = vpop.permute.xlu0 %2921 }
 0x72f   : > { %v2928_v32 = vsel %vm1590_vm9, %v2572_v33, %v2922_v1 }
 0x730   : > { %3102 = vmatmul.mubr.bf16.vlgmr.msra.gmra.mrb[56].mxu0 %v2928_v32 }
 0x731   : > { %3695 = vmatprep.mubr.msk.bf16.mxu0 %vm4100_vm0, %v4099_v7  ;;  %3680 = vmatpush3.bf16.msra.mxu0 %v3947_v36 }
 0x732   : > { %3681 = vmatprep.subr.bf16.mxu0 %v4099_v7 }
 0x735   : > { %3682 = vmatpush3.bf16.msra.mxu0 %v3948_v25 }
 0x736   : > { %3683 = vmatprep.subr.bf16.mxu0 %v4099_v7 }
 0x739   : > { %3684 = vmatpush3.bf16.msra.mxu0 %v3949_v27 }
 0x73a   : > { %3685 = vmatprep.subr.bf16.mxu0 %v4099_v7 }
 0x73d   : > { %3686 = vmatpush3.bf16.msra.mxu0 %v3950_v28 }
 0x73e   : > { %3687 = vmatprep.subr.bf16.mxu0 %v4099_v7 }
 0x741   : > { %3688 = vmatpush3.bf16.msra.mxu0 %v3951_v24 }
 0x742   : > { %3689 = vmatprep.subr.bf16.mxu0 %v4099_v7 }
 0x745   : > { %3690 = vmatpush3.bf16.msra.mxu0 %v3952_v6 }
 0x746   : > { %3691 = vmatprep.subr.bf16.mxu0 %v4099_v7 }
 0x749   : > { %3692 = vmatpush3.bf16.msra.mxu0 %v3953_v45 }
 0x74a   : > { %3693 = vmatprep.subr.bf16.mxu0 %v4099_v7 }
 0x74d   : > { %3694 = vmatpush3.bf16.msra.mxu0 %v3954_v23 }
 0x803   : > { %v3635_v62 = vpop.f32.mrb[56].mxu0 }
 0x804   : > { %v3636_v58 = vpop.f32.mrb[57].mxu0 }
 0x805   : > { %v3637_v60 = vadd.f32 %v3636_v58, %v3635_v62  ;;  %v3638_v40 = vpop.f32.mrb[58].mxu0 }
 0x806   : > { %v3639_v34 = vpop.f32.mrb[59].mxu0 }
 0x807   : > { %v3104_v26 = vadd.f32 %v3637_v60, %v3580_v47 }
 0x809   : > { %v3109_v2 = vmax.f32 %v3104_v26, 0.0 }
 0x80b   : > { %v3110_v14 = vpack.c.bf16 %v3109_v2, %v3109_v2 }
 0x80d   : > { %3676 = vmatmul.mubr.bf16.vlgmr.msra.gmra.mrb[56].mxu1 %v3110_v14 }
 0x8e0   : > { %v3216_v10 = vpop.f32.mrb[56].mxu1 }
 0x8e1   : > { %v3217_v54 = vadd.f32 %v3597_v51, %v3216_v10  ;;  %v3677_v29 = vpop.f32.mrb[57].mxu1 }
 0x8e2   : > { %v3219_v41 = vpop.f32.mrb[58].mxu1 }
 0x8e3   : > { %v3222_v4 = vmax.f32 %v3217_v54, 0.0  ;;  %v3678_v22 = vpop.f32.mrb[59].mxu1 }
 0x8e5   : > { %v3223_v37 = vpack.c.bf16 %v3222_v4, %v3222_v4 }
 0x8e7   : > { %3696 = vmatmul.mubr.bf16.vlgmr.msra.gmra.mrb[60].mxu0 %v3223_v37 }
 0x9ba   : > { %v3329_v20 = vpop.f32.mrb[60].mxu0 }
 0x9bb   : > { %v3330_v3 = vadd.f32 %v3606_v55, %v3329_v20  ;;  %v3697_v7 = vpop.f32.mrb[61].mxu0 }
 0x9bc   : > { %v3332_v43 = vpop.f32.mrb[62].mxu0 }
 0x9bd   : > { %3335 = vst [vmem:[%s394_s12] sm:$0xff] %v3330_v3  ;;  %v3698_v57 = vpop.f32.mrb[63].mxu0 }
 0x9be   : > { %4026 = shalt.err (!%p4023_p7)
}
 0x9bf   : > { %s4027_s25 = scalar_lea.hbm %s6157_s29, 128  ;;  %s4031_s15 = scalar_lea.hbm %s6210_s11, 256 }
 0x9c0   : > { %p4028_p8 = scmp.ne.s32.totalorder %s6157_s29, %s4027_s25  ;;  %p4032_p1 = scmp.lt.u32.totalorder %s6157_s29, %s6210_s11 }
 0x9c1   : > { %p4033_p0 = scmp.lt.u32.totalorder %s4031_s15, %s4027_s25  ;;  %p4035_p6 = scmp.lt.u32.totalorder %s4027_s25, %s6157_s29 }
 0x9c2   : > { %p4029_p11 = pnand %p4028_p8, %p6260_p9 }
 0x9c3   : > { %p4034_p5 = por %p4033_p0, %p4032_p1 }
 0x9c4   : > { %p4030_p13 = pneg %p4029_p11 }
 0x9c5   : > { %p4036_p10 = por %p4035_p6, %p4034_p5 }
 0x9c7   : > { %p4037_p12 = pnand %p4036_p10, %p4030_p13 }
 0x9c9   : > { %4040 = shalt.err (!%p4037_p12)
}
 0x9ca   : > { %3720 = dma.vmem_to_hbm [thread:$0]  (%p6260_p9), %s6159_s22, 128, %s6157_s29, %s3337_s13  }
 0x9cb PF: > { %p3732_p2 = scmp.ge.s32.totalorder %s4079_s20, 2  ;;  %s3362_s21 = sand.u32 1, %s4067_s17  }
 0x9cc   : > { %p6261_p3 = scmp.ne.s32.totalorder %s6235_s28, 0  ;;  %s3363_s16 = scalar_lea.sflag [#allocation4], %s3362_s21 }
 0x9ce   : > { %p3727_p4 = pnand %p3732_p2, %p6261_p3 }
 0x9d0   : > { %4062 = dma.done.wait (!%p3727_p4), %s3363_s16, 128  }
 0x9d1   : > { %4064 = vsyncadd (!%p3727_p4), %s3363_s16, 4294967168  ;;  %s6262_s26 = sld [smem:[#allocation8_spill]]  ;;  %p22_p7 = scmp.ge.s32.totalorder %s4187_s23, 4  }
 0x9d2   : > { %s6263_s17 = smov %s4071_s18  ;;  %s6264_s18 = smov %s4075_s19 }
 0x9d3   : > { %s6266_s20 = smov %s4187_s23  ;;  %24 = sbr.rel (!%p22_p7) target bundleno = 4 (0x4), region = 104 }
 0x9d7   : > { %s6265_s19 = smov %s6262_s26 }
 0x9da   :  { %3368 = vsyncpa [#allocation3], 1 }
 0x9db   :  { %3370 = vsyncpa [#allocation3 + $0x1], 1 }
 0x9dc   :  { %3371 = vsyncpa [#allocation4], 1 }
 0x9dd   :  { %3373 = vsyncpa [#allocation4 + $0x1], 1 }

</bundles_post_ra>
